<compile_context>
chip_gen: v6e
topology: v6e:2x2x1
jax: 0.10.0
libtpu: 0.0.40
codegen_flags: <defaults>
</compile_context>

<pallas_src>
import jax
import jax.numpy as jnp
from jax.experimental import pallas as pl
from jax.experimental.pallas import tpu as pltpu

# ---------------- small synthetic config ('small' model size) ----------------
IMAGE_SIZE = 16
PATCH_SIZE = 4
GRID_SIZE = IMAGE_SIZE // PATCH_SIZE          # 4 -> 16 image tokens
NUM_LATENT_TOKENS = 8
TOKEN_SIZE = 16
WIDTH = 128                                   # 'small'
NUM_LAYERS = 1                                # 'small'
NUM_HEADS = 8                                 # 'small'
HEAD_DIM = WIDTH // NUM_HEADS                 # 16
MLP_DIM = int(WIDTH * 4.0)                    # 512
LN_EPS = 1e-5
S_IMG = GRID_SIZE * GRID_SIZE                 # 16
SEQ = S_IMG + NUM_LATENT_TOKENS               # 24
FFN_OUT = 3 * PATCH_SIZE * PATCH_SIZE         # 48
FFN_PAD = 128                                 # lane-dense padded ffn output width

# -------- row layout of the packed small-vector table (biases / LN params) ---
ROW_EMBED_B = 0
ROW_LN_PRE_G = 1
ROW_LN_PRE_B = 2
_BLOCK_ROW0 = 3
_ROWS_PER_BLOCK = 8                           # ln1_g,ln1_b,qkv_b,out_b,ln2_g,ln2_b,fc_b,proj_b


def _brow(layer, j):
    return _BLOCK_ROW0 + layer * _ROWS_PER_BLOCK + j


ROW_LN_POST_G = _BLOCK_ROW0 + NUM_LAYERS * _ROWS_PER_BLOCK
ROW_LN_POST_B = ROW_LN_POST_G + 1
ROW_FFN_B = ROW_LN_POST_G + 2
VEC_ROWS = ((ROW_FFN_B + 1 + 7) // 8) * 8     # pad row count to a multiple of 8
VEC_W = max(512, 3 * WIDTH, MLP_DIM)          # 512


def _pick_tb(batch):
    """Samples per grid step: grow MXU rows (target TB*SEQ ~ 256) while keeping
    >= 2 grid steps so both v7x TensorCores get work."""
    if batch <= 1:
        return 1
    target = max(1, min(batch // 2, (256 + SEQ - 1) // SEQ))
    for tb in range(target, 0, -1):
        if batch % tb == 0:
            return tb
    return 1


def _gelu_erf(x):
    # Exact-erf GELU (nn.GELU default) via Abramowitz & Stegun 7.1.26
    # (|err| <= 1.5e-7): uses only exp / mul / add / where, so it lowers on
    # Mosaic without needing a lax.erf rule.
    z = x * 0.7071067811865476
    az = jnp.abs(z)
    t = 1.0 / (1.0 + 0.3275911 * az)
    poly = ((((1.061405429 * t - 1.453152027) * t + 1.421413741) * t
             - 0.284496736) * t + 0.254829592) * t
    e = 1.0 - poly * jnp.exp(-az * az)
    erf_z = jnp.where(z < 0.0, -e, e)
    return 0.5 * x * (1.0 + erf_z)


# --------------------------- fused transformer kernel -------------------------
def _decoder_kernel(*refs):
    zt_ref, seq_ref, vec_ref, embed_w = refs[0], refs[1], refs[2], refs[3]
    blk_refs = [refs[4 + 4 * i: 8 + 4 * i] for i in range(NUM_LAYERS)]
    ffn_w = refs[4 + 4 * NUM_LAYERS]
    out_ref = refs[5 + 4 * NUM_LAYERS]

    tb = zt_ref.shape[0]                                      # samples per grid step

    def vec(row, n=WIDTH):
        return vec_ref[row:row + 1, 0:n]                       # (1, n) f32

    def ln(x, g_row, b_row):
        mu = jnp.mean(x, axis=-1, keepdims=True)
        var = jnp.mean(jnp.square(x - mu), axis=-1, keepdims=True)
        return (x - mu) * jax.lax.rsqrt(var + LN_EPS) * vec(g_row) + vec(b_row)

    def mm(a, w_ref, b_row=None, n=WIDTH):
        # activations cast to bf16; weights are already bf16; f32 accumulation
        out = jnp.dot(a.astype(jnp.bfloat16), w_ref[...],
                      preferred_element_type=jnp.float32)
        if b_row is not None:
            out = out + vec(b_row, n)
        return out

    def split_heads(m2):                                       # (WIDTH, SEQ) -> (H, SEQ, D)
        m3 = m2.reshape(NUM_HEADS, HEAD_DIM, SEQ)              # major-dim split (cheap)
        return jnp.transpose(m3, (0, 2, 1))                    # batched minor-dim transpose

    # ---- embed latent tokens, add latent positional embedding, ln_pre ----
    zt2 = zt_ref[...].reshape(tb * NUM_LATENT_TOKENS, TOKEN_SIZE)
    latpos = seq_ref[S_IMG:SEQ, :]                             # (L, W)
    lat = mm(zt2, embed_w, ROW_EMBED_B)                        # (tb*L, W)
    lat = lat + jnp.concatenate([latpos] * tb, axis=0)
    lat = ln(lat, ROW_LN_PRE_G, ROW_LN_PRE_B)

    # ---- image half: ln_pre(mask_token + pos_emb) precomputed in the wrapper ----
    msk = seq_ref[0:S_IMG, :]                                  # (S_IMG, W)
    parts = []
    for s in range(tb):
        parts.append(msk)
        parts.append(lat[s * NUM_LATENT_TOKENS:(s + 1) * NUM_LATENT_TOKENS, :])
    x = jnp.concatenate(parts, axis=0)                         # (tb*SEQ, W)

    # ---- residual attention blocks (pre-LN MHA + exact-erf GELU MLP) ----
    for li, (qkv_w, out_w, fc_w, proj_w) in enumerate(blk_refs):
        h_in = ln(x, _brow(li, 0), _brow(li, 1))
        qkv = mm(h_in, qkv_w, _brow(li, 2), 3 * WIDTH)         # (rows, 3W); q pre-scaled

        attn_parts = []
        for s in range(tb):                                    # attention is per-sample
            qkv_t = qkv[s * SEQ:(s + 1) * SEQ, :].T            # (3W, SEQ)
            qh = split_heads(qkv_t[0:WIDTH, :])                # (H, SEQ, D)
            kh = split_heads(qkv_t[WIDTH:2 * WIDTH, :])
            vh = split_heads(qkv_t[2 * WIDTH:3 * WIDTH, :])

            sc = jnp.einsum("hqd,hkd->hqk",
                            qh.astype(jnp.bfloat16), kh.astype(jnp.bfloat16),
                            preferred_element_type=jnp.float32)        # (H, SEQ, SEQ)
            sc = sc - jnp.max(sc, axis=-1, keepdims=True)
            pr = jnp.exp(sc)
            pr = pr * pl.reciprocal(jnp.sum(pr, axis=-1, keepdims=True),
                                    approx=True)
            o = jnp.einsum("hqk,hkd->hqd",
                           pr.astype(jnp.bfloat16), vh.astype(jnp.bfloat16),
                           preferred_element_type=jnp.float32)          # (H, SEQ, D)
            # merge heads back to (SEQ, WIDTH) once; one big out-proj dot below
            o = jnp.transpose(o, (0, 2, 1)).reshape(WIDTH, SEQ).T
            attn_parts.append(o)
        o_all = jnp.concatenate(attn_parts, axis=0)            # (rows, WIDTH)
        x = x + mm(o_all, out_w, _brow(li, 3), WIDTH)          # single K=128 dot + bias

        h2 = ln(x, _brow(li, 4), _brow(li, 5))
        h2 = mm(h2, fc_w, _brow(li, 6), MLP_DIM)
        h2 = _gelu_erf(h2)
        x = x + mm(h2, proj_w, _brow(li, 7), WIDTH)

    # ---- RemoveLatentTokens + ln_post + ffn 1x1 conv (lane-padded to 128) ----
    xi = jnp.concatenate([x[s * SEQ:s * SEQ + S_IMG, :] for s in range(tb)], axis=0)
    xi = ln(xi, ROW_LN_POST_G, ROW_LN_POST_B)
    y = mm(xi, ffn_w, ROW_FFN_B, FFN_PAD)                      # (tb*S_IMG, 128)
    out_ref[...] = y.reshape(tb, S_IMG, FFN_PAD)


# ------------------------------ 3x3 conv kernel -------------------------------
def _conv3x3_kernel(img_ref, w_ref, b_ref, o_ref, pad_ref):
    # zero halo built in-kernel (no jnp.pad glue between the two pallas_calls)
    pad_ref[...] = jnp.zeros((3, IMAGE_SIZE + 2, IMAGE_SIZE + 2), jnp.float32)
    for ci in range(3):
        pad_ref[ci, 1:IMAGE_SIZE + 1, 1:IMAGE_SIZE + 1] = img_ref[0, ci]
    xp = pad_ref[...]

    accs = [jnp.zeros((IMAGE_SIZE, IMAGE_SIZE), jnp.float32) + b_ref[co]
            for co in range(3)]
    for ci in range(3):
        for dy in range(3):
            for dx in range(3):
                win = xp[ci, dy:dy + IMAGE_SIZE, dx:dx + IMAGE_SIZE]
                for co in range(3):
                    accs[co] = accs[co] + win * w_ref[((co * 3 + ci) * 3 + dy) * 3 + dx]
    o_ref[0] = jnp.stack(accs, axis=0)                          # one store, all 3 planes


# ------------------------- one-time weight preparation -------------------------
def prepare_params(p):
    inv_sqrt_d = 1.0 / (HEAD_DIM ** 0.5)

    # ln_pre(mask_token + positional_embedding) is batch independent -> hoist
    msk = p["mask_token"].reshape(1, WIDTH) + p["pos_emb"]
    mu = jnp.mean(msk, axis=-1, keepdims=True)
    var = jnp.mean(jnp.square(msk - mu), axis=-1, keepdims=True)
    msk_pre = (msk - mu) * jax.lax.rsqrt(var + LN_EPS) * p["ln_pre_g"] + p["ln_pre_b"]
    seq_const = jnp.concatenate([msk_pre, p["latent_pos"]], axis=0)     # (SEQ, W)

    # pack every small bias / LN vector into one (VEC_ROWS, VEC_W) f32 array
    rows = [jnp.zeros((VEC_W,), jnp.float32) for _ in range(VEC_ROWS)]

    def put(row, v):
        rows[row] = rows[row].at[:v.shape[0]].set(v.astype(jnp.float32))

    put(ROW_EMBED_B, p["embed_b"])
    put(ROW_LN_PRE_G, p["ln_pre_g"])
    put(ROW_LN_PRE_B, p["ln_pre_b"])
    blocks = []
    for li, blk in enumerate(p["blocks"]):
        put(_brow(li, 0), blk["ln1_g"])
        put(_brow(li, 1), blk["ln1_b"])
        put(_brow(li, 2), blk["qkv_b"].at[:WIDTH].multiply(inv_sqrt_d))  # fold q scale
        put(_brow(li, 3), blk["out_b"])
        put(_brow(li, 4), blk["ln2_g"])
        put(_brow(li, 5), blk["ln2_b"])
        put(_brow(li, 6), blk["fc_b"])
        put(_brow(li, 7), blk["proj_b"])
        blocks.append({
            "qkv_w": blk["qkv_w"].at[:, :WIDTH].multiply(inv_sqrt_d).astype(jnp.bfloat16),
            "out_w": blk["out_w"].astype(jnp.bfloat16),
            "fc_w": blk["fc_w"].astype(jnp.bfloat16),
            "proj_w": blk["proj_w"].astype(jnp.bfloat16),
        })
    put(ROW_LN_POST_G, p["ln_post_g"])
    put(ROW_LN_POST_B, p["ln_post_b"])
    put(ROW_FFN_B, jnp.pad(p["ffn_b"], (0, FFN_PAD - FFN_OUT)))

    return {
        "seq_const": seq_const,
        "vecs": jnp.stack(rows, axis=0),
        "embed_w": p["embed_w"].astype(jnp.bfloat16),
        "blocks": blocks,
        "ffn_w": jnp.pad(p["ffn_w"], ((0, 0), (0, FFN_PAD - FFN_OUT))).astype(jnp.bfloat16),
        "conv_w": p["conv_w"].astype(jnp.float32),
        "conv_b": p["conv_b"].astype(jnp.float32),
    }


# ------------------------------- forward pass ---------------------------------
def decoder_forward(z_q, w):
    batch, c, latents = z_q.shape
    assert latents == NUM_LATENT_TOKENS and c == TOKEN_SIZE
    tb = _pick_tb(batch)

    zt = jnp.transpose(z_q, (0, 2, 1))                          # 'B C L -> B L C'

    inputs = [zt, w["seq_const"], w["vecs"], w["embed_w"]]
    for blk in w["blocks"]:
        inputs += [blk["qkv_w"], blk["out_w"], blk["fc_w"], blk["proj_w"]]
    inputs.append(w["ffn_w"])

    in_specs = [pl.BlockSpec((tb, NUM_LATENT_TOKENS, TOKEN_SIZE), lambda b: (b, 0, 0))]
    for arr in inputs[1:]:
        in_specs.append(pl.BlockSpec(arr.shape, lambda b, nd=arr.ndim: (0,) * nd))

    # --- fused transformer: batch-blocked grid, both cores split the batch ---
    y = pl.pallas_call(
        _decoder_kernel,
        grid=(batch // tb,),
        in_specs=in_specs,
        out_specs=pl.BlockSpec((tb, S_IMG, FFN_PAD), lambda b: (b, 0, 0)),
        out_shape=jax.ShapeDtypeStruct((batch, S_IMG, FFN_PAD), jnp.float32),
        compiler_params=pltpu.CompilerParams(dimension_semantics=("parallel",)),
    )(*inputs)

    # pixel shuffle 'B (P1 P2 C) H W -> B C (H P1) (W P2)' (one XLA transpose)
    y = y[:, :, :FFN_OUT].reshape(batch, GRID_SIZE, GRID_SIZE, PATCH_SIZE, PATCH_SIZE, 3)
    img = jnp.transpose(y, (0, 5, 1, 3, 2, 4)).reshape(batch, 3, IMAGE_SIZE, IMAGE_SIZE)

    # conv_out: 3x3 conv, padding=1 (halo built in-kernel)
    out = pl.pallas_call(
        _conv3x3_kernel,
        grid=(batch,),
        in_specs=[pl.BlockSpec((1, 3, IMAGE_SIZE, IMAGE_SIZE), lambda b: (b, 0, 0, 0)),
                  pl.BlockSpec(memory_space=pltpu.MemorySpace.SMEM),
                  pl.BlockSpec(memory_space=pltpu.MemorySpace.SMEM)],
        out_specs=pl.BlockSpec((1, 3, IMAGE_SIZE, IMAGE_SIZE), lambda b: (b, 0, 0, 0)),
        out_shape=jax.ShapeDtypeStruct((batch, 3, IMAGE_SIZE, IMAGE_SIZE), jnp.float32),
        scratch_shapes=[pltpu.VMEM((3, IMAGE_SIZE + 2, IMAGE_SIZE + 2), jnp.float32)],
        compiler_params=pltpu.CompilerParams(dimension_semantics=("parallel",)),
    )(img, w["conv_w"], w["conv_b"])
    return out


# ------------------------------- params init ----------------------------------
def init_params(key):
    ks = jax.random.split(key, 64)
    it = iter(ks)

    def nrm(shape, scale=0.02):
        return scale * jax.random.normal(next(it), shape, jnp.float32)

    scale = WIDTH ** -0.5
    p = {
        "embed_w": nrm((TOKEN_SIZE, WIDTH)),
        "embed_b": nrm((WIDTH,), 0.01),
        "pos_emb": scale * jax.random.normal(next(it), (S_IMG, WIDTH), jnp.float32),
        "mask_token": scale * jax.random.normal(next(it), (1, 1, WIDTH), jnp.float32),
        "latent_pos": scale * jax.random.normal(next(it), (NUM_LATENT_TOKENS, WIDTH), jnp.float32),
        "ln_pre_g": jnp.ones((WIDTH,), jnp.float32),
        "ln_pre_b": jnp.zeros((WIDTH,), jnp.float32),
        "ln_post_g": jnp.ones((WIDTH,), jnp.float32),
        "ln_post_b": jnp.zeros((WIDTH,), jnp.float32),
        "ffn_w": nrm((WIDTH, FFN_OUT)),
        "ffn_b": nrm((FFN_OUT,), 0.01),
        "conv_w": nrm((3 * 3 * 3 * 3,)),        # (Cout, Cin, 3, 3) flattened row-major
        "conv_b": nrm((3,), 0.01),
        "blocks": [],
    }
    for _ in range(NUM_LAYERS):
        p["blocks"].append({
            "ln1_g": jnp.ones((WIDTH,), jnp.float32),
            "ln1_b": jnp.zeros((WIDTH,), jnp.float32),
            "qkv_w": nrm((WIDTH, 3 * WIDTH)),
            "qkv_b": nrm((3 * WIDTH,), 0.01),
            "out_w": nrm((WIDTH, WIDTH)),
            "out_b": nrm((WIDTH,), 0.01),
            "ln2_g": jnp.ones((WIDTH,), jnp.float32),
            "ln2_b": jnp.zeros((WIDTH,), jnp.float32),
            "fc_w": nrm((WIDTH, MLP_DIM)),
            "fc_b": nrm((MLP_DIM,), 0.01),
            "proj_w": nrm((MLP_DIM, WIDTH)),
            "proj_b": nrm((WIDTH,), 0.01),
        })
    return p


# ----------------------------------- main --------------------------------------
if __name__ == "__main__":
    key = jax.random.PRNGKey(0)
    kp, kx = jax.random.split(key)
    params = init_params(kp)
    prep = prepare_params(params)          # one-time: bf16 cast, packing, hoisting

    B = 2
    # z_q: (B, token_size, num_latent_tokens) as in the PyTorch forward
    z_q = jax.random.normal(kx, (B, TOKEN_SIZE, NUM_LATENT_TOKENS), jnp.float32)

    out = jax.jit(decoder_forward)(z_q, prep)
    out = jax.block_until_ready(out)
    assert out.shape == (B, 3, IMAGE_SIZE, IMAGE_SIZE), out.shape
    assert out.dtype == jnp.float32
    print("KERNEL_OK")
</pallas_src>

<mosaic_0001>
module attributes {stable_mosaic.version = 11 : i64} {
  func.func @_decoder_kernel(%arg0: i32, %arg1: memref<1x8x16xf32, #tpu.memory_space<vmem>>, %arg2: memref<24x128xf32, #tpu.memory_space<vmem>>, %arg3: memref<16x512xf32, #tpu.memory_space<vmem>>, %arg4: memref<16x128xbf16, #tpu.memory_space<vmem>>, %arg5: memref<128x384xbf16, #tpu.memory_space<vmem>>, %arg6: memref<128x128xbf16, #tpu.memory_space<vmem>>, %arg7: memref<128x512xbf16, #tpu.memory_space<vmem>>, %arg8: memref<512x128xbf16, #tpu.memory_space<vmem>>, %arg9: memref<128x128xbf16, #tpu.memory_space<vmem>>, %arg10: memref<1x16x128xf32, #tpu.memory_space<vmem>>) attributes {dimension_semantics = [#tpu.dimension_semantics<parallel>], iteration_bounds = array<i64: 2>, scalar_prefetch = 0 : i64, scratch_operands = 0 : i64, tpu.core_type = #tpu.core_type<tc>, window_params = [{transform_indices = @transform_0, window_bounds = array<i64: 1, 8, 16>}, {pipeline_mode = #tpu.pipeline_mode<synchronous>, transform_indices = @transform_1, window_bounds = array<i64: 24, 128>}, {pipeline_mode = #tpu.pipeline_mode<synchronous>, transform_indices = @transform_2, window_bounds = array<i64: 16, 512>}, {pipeline_mode = #tpu.pipeline_mode<synchronous>, transform_indices = @transform_3, window_bounds = array<i64: 16, 128>}, {pipeline_mode = #tpu.pipeline_mode<synchronous>, transform_indices = @transform_4, window_bounds = array<i64: 128, 384>}, {pipeline_mode = #tpu.pipeline_mode<synchronous>, transform_indices = @transform_5, window_bounds = array<i64: 128, 128>}, {pipeline_mode = #tpu.pipeline_mode<synchronous>, transform_indices = @transform_6, window_bounds = array<i64: 128, 512>}, {pipeline_mode = #tpu.pipeline_mode<synchronous>, transform_indices = @transform_7, window_bounds = array<i64: 512, 128>}, {pipeline_mode = #tpu.pipeline_mode<synchronous>, transform_indices = @transform_8, window_bounds = array<i64: 128, 128>}, {transform_indices = @transform_9, window_bounds = array<i64: 1, 16, 128>}]} {
    %c0 = arith.constant 0 : index
    %c0_0 = arith.constant 0 : index
    %c0_1 = arith.constant 0 : index
    %0 = vector.load %arg1[%c0, %c0_0, %c0_1] : memref<1x8x16xf32, #tpu.memory_space<vmem>>, vector<1x8x16xf32>
    %1 = vector.shape_cast %0 : vector<1x8x16xf32> to vector<8x16xf32>
    %c16 = arith.constant 16 : index
    %c0_2 = arith.constant 0 : index
    %2 = vector.load %arg2[%c16, %c0_2] : memref<24x128xf32, #tpu.memory_space<vmem>>, vector<8x128xf32>
    %3 = arith.truncf %1 : vector<8x16xf32> to vector<8x16xbf16>
    %c0_3 = arith.constant 0 : index
    %c0_4 = arith.constant 0 : index
    %4 = vector.load %arg4[%c0_3, %c0_4] : memref<16x128xbf16, #tpu.memory_space<vmem>>, vector<16x128xbf16>
    %cst = arith.constant dense<0.000000e+00> : vector<8x128xf32>
    %5 = tpu.matmul %3, %4, %cst {dimension_numbers = #tpu.dot_dimension_numbers<[1], [0], [0], [1], [0, 0, 1, 1], [], []>} : vector<8x16xbf16>, vector<16x128xbf16>, vector<8x128xf32> -> vector<8x128xf32>
    %c0_5 = arith.constant 0 : index
    %c0_6 = arith.constant 0 : index
    %6 = vector.load %arg3[%c0_5, %c0_6] : memref<16x512xf32, #tpu.memory_space<vmem>>, vector<1x128xf32>
    %7 = vector.broadcast %6 : vector<1x128xf32> to vector<8x128xf32>
    %8 = arith.addf %5, %7 : vector<8x128xf32>
    %9 = arith.addf %8, %2 : vector<8x128xf32>
    %cst_7 = arith.constant dense<0.000000e+00> : vector<8xf32>
    %10 = vector.multi_reduction <add>, %9, %cst_7 [1] : vector<8x128xf32> to vector<8xf32>
    %11 = vector.shape_cast %10 : vector<8xf32> to vector<8x1xf32>
    %cst_8 = arith.constant 1.280000e+02 : f32
    %12 = vector.broadcast %cst_8 : f32 to vector<8x1xf32>
    %13 = arith.divf %11, %12 : vector<8x1xf32>
    %14 = vector.broadcast %13 : vector<8x1xf32> to vector<8x128xf32>
    %15 = arith.subf %9, %14 : vector<8x128xf32>
    %16 = arith.mulf %15, %15 : vector<8x128xf32>
    %cst_9 = arith.constant dense<0.000000e+00> : vector<8xf32>
    %17 = vector.multi_reduction <add>, %16, %cst_9 [1] : vector<8x128xf32> to vector<8xf32>
    %18 = vector.shape_cast %17 : vector<8xf32> to vector<8x1xf32>
    %cst_10 = arith.constant 1.280000e+02 : f32
    %19 = vector.broadcast %cst_10 : f32 to vector<8x1xf32>
    %20 = arith.divf %18, %19 : vector<8x1xf32>
    %21 = vector.broadcast %13 : vector<8x1xf32> to vector<8x128xf32>
    %22 = arith.subf %9, %21 : vector<8x128xf32>
    %cst_11 = arith.constant 9.99999974E-6 : f32
    %23 = vector.broadcast %cst_11 : f32 to vector<8x1xf32>
    %24 = arith.addf %20, %23 : vector<8x1xf32>
    %25 = math.rsqrt %24 : vector<8x1xf32>
    %26 = vector.broadcast %25 : vector<8x1xf32> to vector<8x128xf32>
    %27 = arith.mulf %22, %26 : vector<8x128xf32>
    %c1 = arith.constant 1 : index
    %c0_12 = arith.constant 0 : index
    %28 = vector.load %arg3[%c1, %c0_12] : memref<16x512xf32, #tpu.memory_space<vmem>>, vector<1x128xf32>
    %29 = vector.broadcast %28 : vector<1x128xf32> to vector<8x128xf32>
    %30 = arith.mulf %27, %29 : vector<8x128xf32>
    %c2 = arith.constant 2 : index
    %c0_13 = arith.constant 0 : index
    %31 = vector.load %arg3[%c2, %c0_13] : memref<16x512xf32, #tpu.memory_space<vmem>>, vector<1x128xf32>
    %32 = vector.broadcast %31 : vector<1x128xf32> to vector<8x128xf32>
    %33 = arith.addf %30, %32 : vector<8x128xf32>
    %c0_14 = arith.constant 0 : index
    %c0_15 = arith.constant 0 : index
    %34 = vector.load %arg2[%c0_14, %c0_15] : memref<24x128xf32, #tpu.memory_space<vmem>>, vector<16x128xf32>
    %35 = tpu.concatenate %34, %33 in 0 : vector<16x128xf32>, vector<8x128xf32> -> vector<24x128xf32>
    %cst_16 = arith.constant dense<0.000000e+00> : vector<24xf32>
    %36 = vector.multi_reduction <add>, %35, %cst_16 [1] : vector<24x128xf32> to vector<24xf32>
    %37 = vector.shape_cast %36 : vector<24xf32> to vector<24x1xf32>
    %cst_17 = arith.constant 1.280000e+02 : f32
    %38 = vector.broadcast %cst_17 : f32 to vector<24x1xf32>
    %39 = arith.divf %37, %38 : vector<24x1xf32>
    %40 = vector.broadcast %39 : vector<24x1xf32> to vector<24x128xf32>
    %41 = arith.subf %35, %40 : vector<24x128xf32>
    %42 = arith.mulf %41, %41 : vector<24x128xf32>
    %cst_18 = arith.constant dense<0.000000e+00> : vector<24xf32>
    %43 = vector.multi_reduction <add>, %42, %cst_18 [1] : vector<24x128xf32> to vector<24xf32>
    %44 = vector.shape_cast %43 : vector<24xf32> to vector<24x1xf32>
    %cst_19 = arith.constant 1.280000e+02 : f32
    %45 = vector.broadcast %cst_19 : f32 to vector<24x1xf32>
    %46 = arith.divf %44, %45 : vector<24x1xf32>
    %47 = vector.broadcast %39 : vector<24x1xf32> to vector<24x128xf32>
    %48 = arith.subf %35, %47 : vector<24x128xf32>
    %cst_20 = arith.constant 9.99999974E-6 : f32
    %49 = vector.broadcast %cst_20 : f32 to vector<24x1xf32>
    %50 = arith.addf %46, %49 : vector<24x1xf32>
    %51 = math.rsqrt %50 : vector<24x1xf32>
    %52 = vector.broadcast %51 : vector<24x1xf32> to vector<24x128xf32>
    %53 = arith.mulf %48, %52 : vector<24x128xf32>
    %c3 = arith.constant 3 : index
    %c0_21 = arith.constant 0 : index
    %54 = vector.load %arg3[%c3, %c0_21] : memref<16x512xf32, #tpu.memory_space<vmem>>, vector<1x128xf32>
    %55 = vector.broadcast %54 : vector<1x128xf32> to vector<24x128xf32>
    %56 = arith.mulf %53, %55 : vector<24x128xf32>
    %c4 = arith.constant 4 : index
    %c0_22 = arith.constant 0 : index
    %57 = vector.load %arg3[%c4, %c0_22] : memref<16x512xf32, #tpu.memory_space<vmem>>, vector<1x128xf32>
    %58 = vector.broadcast %57 : vector<1x128xf32> to vector<24x128xf32>
    %59 = arith.addf %56, %58 : vector<24x128xf32>
    %60 = arith.truncf %59 : vector<24x128xf32> to vector<24x128xbf16>
    %c0_23 = arith.constant 0 : index
    %c0_24 = arith.constant 0 : index
    %61 = vector.load %arg5[%c0_23, %c0_24] : memref<128x384xbf16, #tpu.memory_space<vmem>>, vector<128x384xbf16>
    %cst_25 = arith.constant dense<0.000000e+00> : vector<24x384xf32>
    %62 = tpu.matmul %60, %61, %cst_25 {dimension_numbers = #tpu.dot_dimension_numbers<[1], [0], [0], [1], [0, 0, 1, 1], [], []>} : vector<24x128xbf16>, vector<128x384xbf16>, vector<24x384xf32> -> vector<24x384xf32>
    %c5 = arith.constant 5 : index
    %c0_26 = arith.constant 0 : index
    %63 = vector.load %arg3[%c5, %c0_26] : memref<16x512xf32, #tpu.memory_space<vmem>>, vector<1x384xf32>
    %64 = vector.broadcast %63 : vector<1x384xf32> to vector<24x384xf32>
    %65 = arith.addf %62, %64 : vector<24x384xf32>
    %66 = tpu.transpose %65, [1, 0] : vector<24x384xf32> -> vector<384x24xf32>
    %67 = vector.extract_strided_slice %66 {offsets = [0, 0], sizes = [128, 24], strides = [1, 1]} : vector<384x24xf32> to vector<128x24xf32>
    %68 = vector.shape_cast %67 : vector<128x24xf32> to vector<8x16x24xf32>
    %69 = tpu.transpose %68, [0, 2, 1] : vector<8x16x24xf32> -> vector<8x24x16xf32>
    %70 = vector.extract_strided_slice %66 {offsets = [128, 0], sizes = [128, 24], strides = [1, 1]} : vector<384x24xf32> to vector<128x24xf32>
    %71 = vector.shape_cast %70 : vector<128x24xf32> to vector<8x16x24xf32>
    %72 = tpu.transpose %71, [0, 2, 1] : vector<8x16x24xf32> -> vector<8x24x16xf32>
    %73 = vector.extract_strided_slice %66 {offsets = [256, 0], sizes = [128, 24], strides = [1, 1]} : vector<384x24xf32> to vector<128x24xf32>
    %74 = vector.shape_cast %73 : vector<128x24xf32> to vector<8x16x24xf32>
    %75 = tpu.transpose %74, [0, 2, 1] : vector<8x16x24xf32> -> vector<8x24x16xf32>
    %76 = arith.truncf %69 : vector<8x24x16xf32> to vector<8x24x16xbf16>
    %77 = arith.truncf %72 : vector<8x24x16xf32> to vector<8x24x16xbf16>
    "tpu.trace_start"() <{level = 10 : i32, message = "hqd,hkd->hqk"}> : () -> ()
    %cst_27 = arith.constant dense<0.000000e+00> : vector<8x24x24xf32>
    %78 = tpu.matmul %76, %77, %cst_27 {dimension_numbers = #tpu.dot_dimension_numbers<[2], [2], [1], [1], [0, 0, 0, 1, 1, 1], [0], [0]>} : vector<8x24x16xbf16>, vector<8x24x16xbf16>, vector<8x24x24xf32> -> vector<8x24x24xf32>
    "tpu.trace_stop"() : () -> ()
    %cst_28 = arith.constant dense<0xFF800000> : vector<8x24xf32>
    %79 = vector.multi_reduction <maximumf>, %78, %cst_28 [2] : vector<8x24x24xf32> to vector<8x24xf32>
    %80 = vector.shape_cast %79 : vector<8x24xf32> to vector<8x24x1xf32>
    %81 = vector.broadcast %80 : vector<8x24x1xf32> to vector<8x24x24xf32>
    %82 = arith.subf %78, %81 : vector<8x24x24xf32>
    %83 = math.exp %82 : vector<8x24x24xf32>
    %cst_29 = arith.constant dense<0.000000e+00> : vector<8x24xf32>
    %84 = vector.multi_reduction <add>, %83, %cst_29 [2] : vector<8x24x24xf32> to vector<8x24xf32>
    %85 = vector.shape_cast %84 : vector<8x24xf32> to vector<8x24x1xf32>
    %86 = tpu.reciprocal %85 {approx = true} : vector<8x24x1xf32> -> vector<8x24x1xf32>
    %87 = vector.broadcast %86 : vector<8x24x1xf32> to vector<8x24x24xf32>
    %88 = arith.mulf %83, %87 : vector<8x24x24xf32>
    %89 = arith.truncf %88 : vector<8x24x24xf32> to vector<8x24x24xbf16>
    %90 = arith.truncf %75 : vector<8x24x16xf32> to vector<8x24x16xbf16>
    "tpu.trace_start"() <{level = 10 : i32, message = "hqk,hkd->hqd"}> : () -> ()
    %cst_30 = arith.constant dense<0.000000e+00> : vector<8x24x16xf32>
    %91 = tpu.matmul %89, %90, %cst_30 {dimension_numbers = #tpu.dot_dimension_numbers<[2], [1], [1], [2], [0, 0, 0, 1, 1, 2], [0], [0]>} : vector<8x24x24xbf16>, vector<8x24x16xbf16>, vector<8x24x16xf32> -> vector<8x24x16xf32>
    "tpu.trace_stop"() : () -> ()
    %92 = tpu.transpose %91, [0, 2, 1] : vector<8x24x16xf32> -> vector<8x16x24xf32>
    %93 = vector.shape_cast %92 : vector<8x16x24xf32> to vector<128x24xf32>
    %94 = tpu.transpose %93, [1, 0] : vector<128x24xf32> -> vector<24x128xf32>
    %95 = arith.truncf %94 : vector<24x128xf32> to vector<24x128xbf16>
    %c0_31 = arith.constant 0 : index
    %c0_32 = arith.constant 0 : index
    %96 = vector.load %arg6[%c0_31, %c0_32] : memref<128x128xbf16, #tpu.memory_space<vmem>>, vector<128x128xbf16>
    %cst_33 = arith.constant dense<0.000000e+00> : vector<24x128xf32>
    %97 = tpu.matmul %95, %96, %cst_33 {dimension_numbers = #tpu.dot_dimension_numbers<[1], [0], [0], [1], [0, 0, 1, 1], [], []>} : vector<24x128xbf16>, vector<128x128xbf16>, vector<24x128xf32> -> vector<24x128xf32>
    %c6 = arith.constant 6 : index
    %c0_34 = arith.constant 0 : index
    %98 = vector.load %arg3[%c6, %c0_34] : memref<16x512xf32, #tpu.memory_space<vmem>>, vector<1x128xf32>
    %99 = vector.broadcast %98 : vector<1x128xf32> to vector<24x128xf32>
    %100 = arith.addf %97, %99 : vector<24x128xf32>
    %101 = arith.addf %35, %100 : vector<24x128xf32>
    %cst_35 = arith.constant dense<0.000000e+00> : vector<24xf32>
    %102 = vector.multi_reduction <add>, %101, %cst_35 [1] : vector<24x128xf32> to vector<24xf32>
    %103 = vector.shape_cast %102 : vector<24xf32> to vector<24x1xf32>
    %cst_36 = arith.constant 1.280000e+02 : f32
    %104 = vector.broadcast %cst_36 : f32 to vector<24x1xf32>
    %105 = arith.divf %103, %104 : vector<24x1xf32>
    %106 = vector.broadcast %105 : vector<24x1xf32> to vector<24x128xf32>
    %107 = arith.subf %101, %106 : vector<24x128xf32>
    %108 = arith.mulf %107, %107 : vector<24x128xf32>
    %cst_37 = arith.constant dense<0.000000e+00> : vector<24xf32>
    %109 = vector.multi_reduction <add>, %108, %cst_37 [1] : vector<24x128xf32> to vector<24xf32>
    %110 = vector.shape_cast %109 : vector<24xf32> to vector<24x1xf32>
    %cst_38 = arith.constant 1.280000e+02 : f32
    %111 = vector.broadcast %cst_38 : f32 to vector<24x1xf32>
    %112 = arith.divf %110, %111 : vector<24x1xf32>
    %113 = vector.broadcast %105 : vector<24x1xf32> to vector<24x128xf32>
    %114 = arith.subf %101, %113 : vector<24x128xf32>
    %cst_39 = arith.constant 9.99999974E-6 : f32
    %115 = vector.broadcast %cst_39 : f32 to vector<24x1xf32>
    %116 = arith.addf %112, %115 : vector<24x1xf32>
    %117 = math.rsqrt %116 : vector<24x1xf32>
    %118 = vector.broadcast %117 : vector<24x1xf32> to vector<24x128xf32>
    %119 = arith.mulf %114, %118 : vector<24x128xf32>
    %c7 = arith.constant 7 : index
    %c0_40 = arith.constant 0 : index
    %120 = vector.load %arg3[%c7, %c0_40] : memref<16x512xf32, #tpu.memory_space<vmem>>, vector<1x128xf32>
    %121 = vector.broadcast %120 : vector<1x128xf32> to vector<24x128xf32>
    %122 = arith.mulf %119, %121 : vector<24x128xf32>
    %c8 = arith.constant 8 : index
    %c0_41 = arith.constant 0 : index
    %123 = vector.load %arg3[%c8, %c0_41] : memref<16x512xf32, #tpu.memory_space<vmem>>, vector<1x128xf32>
    %124 = vector.broadcast %123 : vector<1x128xf32> to vector<24x128xf32>
    %125 = arith.addf %122, %124 : vector<24x128xf32>
    %126 = arith.truncf %125 : vector<24x128xf32> to vector<24x128xbf16>
    %c0_42 = arith.constant 0 : index
    %c0_43 = arith.constant 0 : index
    %127 = vector.load %arg7[%c0_42, %c0_43] : memref<128x512xbf16, #tpu.memory_space<vmem>>, vector<128x512xbf16>
    %cst_44 = arith.constant dense<0.000000e+00> : vector<24x512xf32>
    %128 = tpu.matmul %126, %127, %cst_44 {dimension_numbers = #tpu.dot_dimension_numbers<[1], [0], [0], [1], [0, 0, 1, 1], [], []>} : vector<24x128xbf16>, vector<128x512xbf16>, vector<24x512xf32> -> vector<24x512xf32>
    %c9 = arith.constant 9 : index
    %c0_45 = arith.constant 0 : index
    %129 = vector.load %arg3[%c9, %c0_45] : memref<16x512xf32, #tpu.memory_space<vmem>>, vector<1x512xf32>
    %130 = vector.broadcast %129 : vector<1x512xf32> to vector<24x512xf32>
    %131 = arith.addf %128, %130 : vector<24x512xf32>
    %cst_46 = arith.constant 0.707106769 : f32
    %132 = vector.broadcast %cst_46 : f32 to vector<24x512xf32>
    %133 = arith.mulf %131, %132 : vector<24x512xf32>
    %134 = math.absf %133 : vector<24x512xf32>
    %cst_47 = arith.constant 0.327591091 : f32
    %135 = vector.broadcast %cst_47 : f32 to vector<24x512xf32>
    %136 = arith.mulf %135, %134 : vector<24x512xf32>
    %cst_48 = arith.constant 1.000000e+00 : f32
    %137 = vector.broadcast %cst_48 : f32 to vector<24x512xf32>
    %138 = arith.addf %137, %136 : vector<24x512xf32>
    %cst_49 = arith.constant 1.000000e+00 : f32
    %139 = vector.broadcast %cst_49 : f32 to vector<24x512xf32>
    %140 = arith.divf %139, %138 : vector<24x512xf32>
    %cst_50 = arith.constant 1.06140542 : f32
    %141 = vector.broadcast %cst_50 : f32 to vector<24x512xf32>
    %142 = arith.mulf %141, %140 : vector<24x512xf32>
    %cst_51 = arith.constant 1.45315206 : f32
    %143 = vector.broadcast %cst_51 : f32 to vector<24x512xf32>
    %144 = arith.subf %142, %143 : vector<24x512xf32>
    %145 = arith.mulf %144, %140 : vector<24x512xf32>
    %cst_52 = arith.constant 1.42141378 : f32
    %146 = vector.broadcast %cst_52 : f32 to vector<24x512xf32>
    %147 = arith.addf %145, %146 : vector<24x512xf32>
    %148 = arith.mulf %147, %140 : vector<24x512xf32>
    %cst_53 = arith.constant 0.284496725 : f32
    %149 = vector.broadcast %cst_53 : f32 to vector<24x512xf32>
    %150 = arith.subf %148, %149 : vector<24x512xf32>
    %151 = arith.mulf %150, %140 : vector<24x512xf32>
    %cst_54 = arith.constant 0.254829586 : f32
    %152 = vector.broadcast %cst_54 : f32 to vector<24x512xf32>
    %153 = arith.addf %151, %152 : vector<24x512xf32>
    %154 = arith.mulf %153, %140 : vector<24x512xf32>
    %cst_55 = arith.constant 0.000000e+00 : f32
    %155 = vector.broadcast %cst_55 : f32 to vector<24x512xf32>
    %156 = arith.subf %155, %134 : vector<24x512xf32>
    %157 = arith.mulf %156, %134 : vector<24x512xf32>
    %158 = math.exp %157 : vector<24x512xf32>
    %159 = arith.mulf %154, %158 : vector<24x512xf32>
    %cst_56 = arith.constant 1.000000e+00 : f32
    %160 = vector.broadcast %cst_56 : f32 to vector<24x512xf32>
    %161 = arith.subf %160, %159 : vector<24x512xf32>
    %cst_57 = arith.constant 0.000000e+00 : f32
    %162 = vector.broadcast %cst_57 : f32 to vector<24x512xf32>
    %163 = arith.cmpf olt, %133, %162 : vector<24x512xf32>
    %cst_58 = arith.constant 0.000000e+00 : f32
    %164 = vector.broadcast %cst_58 : f32 to vector<24x512xf32>
    %165 = arith.subf %164, %161 : vector<24x512xf32>
    %166 = arith.select %163, %165, %161 : vector<24x512xi1>, vector<24x512xf32>
    %cst_59 = arith.constant 5.000000e-01 : f32
    %167 = vector.broadcast %cst_59 : f32 to vector<24x512xf32>
    %168 = arith.mulf %167, %131 : vector<24x512xf32>
    %cst_60 = arith.constant 1.000000e+00 : f32
    %169 = vector.broadcast %cst_60 : f32 to vector<24x512xf32>
    %170 = arith.addf %169, %166 : vector<24x512xf32>
    %171 = arith.mulf %168, %170 : vector<24x512xf32>
    %172 = arith.truncf %171 : vector<24x512xf32> to vector<24x512xbf16>
    %c0_61 = arith.constant 0 : index
    %c0_62 = arith.constant 0 : index
    %173 = vector.load %arg8[%c0_61, %c0_62] : memref<512x128xbf16, #tpu.memory_space<vmem>>, vector<512x128xbf16>
    %cst_63 = arith.constant dense<0.000000e+00> : vector<24x128xf32>
    %174 = tpu.matmul %172, %173, %cst_63 {dimension_numbers = #tpu.dot_dimension_numbers<[1], [0], [0], [1], [0, 0, 1, 1], [], []>} : vector<24x512xbf16>, vector<512x128xbf16>, vector<24x128xf32> -> vector<24x128xf32>
    %c10 = arith.constant 10 : index
    %c0_64 = arith.constant 0 : index
    %175 = vector.load %arg3[%c10, %c0_64] : memref<16x512xf32, #tpu.memory_space<vmem>>, vector<1x128xf32>
    %176 = vector.broadcast %175 : vector<1x128xf32> to vector<24x128xf32>
    %177 = arith.addf %174, %176 : vector<24x128xf32>
    %178 = arith.addf %101, %177 : vector<24x128xf32>
    %179 = vector.extract_strided_slice %178 {offsets = [0, 0], sizes = [16, 128], strides = [1, 1]} : vector<24x128xf32> to vector<16x128xf32>
    %cst_65 = arith.constant dense<0.000000e+00> : vector<16xf32>
    %180 = vector.multi_reduction <add>, %179, %cst_65 [1] : vector<16x128xf32> to vector<16xf32>
    %181 = vector.shape_cast %180 : vector<16xf32> to vector<16x1xf32>
    %cst_66 = arith.constant 1.280000e+02 : f32
    %182 = vector.broadcast %cst_66 : f32 to vector<16x1xf32>
    %183 = arith.divf %181, %182 : vector<16x1xf32>
    %184 = vector.broadcast %183 : vector<16x1xf32> to vector<16x128xf32>
    %185 = arith.subf %179, %184 : vector<16x128xf32>
    %186 = arith.mulf %185, %185 : vector<16x128xf32>
    %cst_67 = arith.constant dense<0.000000e+00> : vector<16xf32>
    %187 = vector.multi_reduction <add>, %186, %cst_67 [1] : vector<16x128xf32> to vector<16xf32>
    %188 = vector.shape_cast %187 : vector<16xf32> to vector<16x1xf32>
    %cst_68 = arith.constant 1.280000e+02 : f32
    %189 = vector.broadcast %cst_68 : f32 to vector<16x1xf32>
    %190 = arith.divf %188, %189 : vector<16x1xf32>
    %191 = vector.broadcast %183 : vector<16x1xf32> to vector<16x128xf32>
    %192 = arith.subf %179, %191 : vector<16x128xf32>
    %cst_69 = arith.constant 9.99999974E-6 : f32
    %193 = vector.broadcast %cst_69 : f32 to vector<16x1xf32>
    %194 = arith.addf %190, %193 : vector<16x1xf32>
    %195 = math.rsqrt %194 : vector<16x1xf32>
    %196 = vector.broadcast %195 : vector<16x1xf32> to vector<16x128xf32>
    %197 = arith.mulf %192, %196 : vector<16x128xf32>
    %c11 = arith.constant 11 : index
    %c0_70 = arith.constant 0 : index
    %198 = vector.load %arg3[%c11, %c0_70] : memref<16x512xf32, #tpu.memory_space<vmem>>, vector<1x128xf32>
    %199 = vector.broadcast %198 : vector<1x128xf32> to vector<16x128xf32>
    %200 = arith.mulf %197, %199 : vector<16x128xf32>
    %c12 = arith.constant 12 : index
    %c0_71 = arith.constant 0 : index
    %201 = vector.load %arg3[%c12, %c0_71] : memref<16x512xf32, #tpu.memory_space<vmem>>, vector<1x128xf32>
    %202 = vector.broadcast %201 : vector<1x128xf32> to vector<16x128xf32>
    %203 = arith.addf %200, %202 : vector<16x128xf32>
    %204 = arith.truncf %203 : vector<16x128xf32> to vector<16x128xbf16>
    %c0_72 = arith.constant 0 : index
    %c0_73 = arith.constant 0 : index
    %205 = vector.load %arg9[%c0_72, %c0_73] : memref<128x128xbf16, #tpu.memory_space<vmem>>, vector<128x128xbf16>
    %cst_74 = arith.constant dense<0.000000e+00> : vector<16x128xf32>
    %206 = tpu.matmul %204, %205, %cst_74 {dimension_numbers = #tpu.dot_dimension_numbers<[1], [0], [0], [1], [0, 0, 1, 1], [], []>} : vector<16x128xbf16>, vector<128x128xbf16>, vector<16x128xf32> -> vector<16x128xf32>
    %c13 = arith.constant 13 : index
    %c0_75 = arith.constant 0 : index
    %207 = vector.load %arg3[%c13, %c0_75] : memref<16x512xf32, #tpu.memory_space<vmem>>, vector<1x128xf32>
    %208 = vector.broadcast %207 : vector<1x128xf32> to vector<16x128xf32>
    %209 = arith.addf %206, %208 : vector<16x128xf32>
    %210 = vector.shape_cast %209 : vector<16x128xf32> to vector<1x16x128xf32>
    %c0_76 = arith.constant 0 : index
    %c0_77 = arith.constant 0 : index
    %c0_78 = arith.constant 0 : index
    %211 = vector.load %arg10[%c0_76, %c0_77, %c0_78] : memref<1x16x128xf32, #tpu.memory_space<vmem>>, vector<1x16x128xf32>
    tpu.vector_store %arg10[%c0_76, %c0_77, %c0_78], %210 {strides = array<i32>} : memref<1x16x128xf32, #tpu.memory_space<vmem>>, vector<1x16x128xf32>,
    return
  }
  func.func @transform_0(%arg0: i32) -> (i32, i32, i32) {
    %c0_i32 = arith.constant 0 : i32
    %c0_i32_0 = arith.constant 0 : i32
    %c0_i32_1 = arith.constant 0 : i32
    return %arg0, %c0_i32, %c0_i32_0 : i32, i32, i32
  }
  func.func @transform_1(%arg0: i32) -> (i32, i32) {
    %c0_i32 = arith.constant 0 : i32
    %c0_i32_0 = arith.constant 0 : i32
    %c0_i32_1 = arith.constant 0 : i32
    return %c0_i32, %c0_i32_0 : i32, i32
  }
  func.func @transform_2(%arg0: i32) -> (i32, i32) {
    %c0_i32 = arith.constant 0 : i32
    %c0_i32_0 = arith.constant 0 : i32
    %c0_i32_1 = arith.constant 0 : i32
    return %c0_i32, %c0_i32_0 : i32, i32
  }
  func.func @transform_3(%arg0: i32) -> (i32, i32) {
    %c0_i32 = arith.constant 0 : i32
    %c0_i32_0 = arith.constant 0 : i32
    %c0_i32_1 = arith.constant 0 : i32
    return %c0_i32, %c0_i32_0 : i32, i32
  }
  func.func @transform_4(%arg0: i32) -> (i32, i32) {
    %c0_i32 = arith.constant 0 : i32
    %c0_i32_0 = arith.constant 0 : i32
    %c0_i32_1 = arith.constant 0 : i32
    return %c0_i32, %c0_i32_0 : i32, i32
  }
  func.func @transform_5(%arg0: i32) -> (i32, i32) {
    %c0_i32 = arith.constant 0 : i32
    %c0_i32_0 = arith.constant 0 : i32
    %c0_i32_1 = arith.constant 0 : i32
    return %c0_i32, %c0_i32_0 : i32, i32
  }
  func.func @transform_6(%arg0: i32) -> (i32, i32) {
    %c0_i32 = arith.constant 0 : i32
    %c0_i32_0 = arith.constant 0 : i32
    %c0_i32_1 = arith.constant 0 : i32
    return %c0_i32, %c0_i32_0 : i32, i32
  }
  func.func @transform_7(%arg0: i32) -> (i32, i32) {
    %c0_i32 = arith.constant 0 : i32
    %c0_i32_0 = arith.constant 0 : i32
    %c0_i32_1 = arith.constant 0 : i32
    return %c0_i32, %c0_i32_0 : i32, i32
  }
  func.func @transform_8(%arg0: i32) -> (i32, i32) {
    %c0_i32 = arith.constant 0 : i32
    %c0_i32_0 = arith.constant 0 : i32
    %c0_i32_1 = arith.constant 0 : i32
    return %c0_i32, %c0_i32_0 : i32, i32
  }
  func.func @transform_9(%arg0: i32) -> (i32, i32, i32) {
    %c0_i32 = arith.constant 0 : i32
    %c0_i32_0 = arith.constant 0 : i32
    %c0_i32_1 = arith.constant 0 : i32
    return %arg0, %c0_i32, %c0_i32_0 : i32, i32, i32
  }
}

module attributes {stable_mosaic.version = 11 : i64} {
  func.func @_conv3x3_kernel(%arg0: i32, %arg1: memref<1x3x16x16xf32, #tpu.memory_space<vmem>>, %arg2: memref<81xf32, #tpu.memory_space<smem>>, %arg3: memref<3xf32, #tpu.memory_space<smem>>, %arg4: memref<1x3x16x16xf32, #tpu.memory_space<vmem>>, %arg5: memref<3x18x18xf32, #tpu.memory_space<vmem>>) attributes {dimension_semantics = [#tpu.dimension_semantics<parallel>], iteration_bounds = array<i64: 2>, scalar_prefetch = 0 : i64, scratch_operands = 1 : i64, tpu.core_type = #tpu.core_type<tc>, window_params = [{transform_indices = @transform_0, window_bounds = array<i64: 1, 3, 16, 16>}, {transform_indices = @transform_1, window_bounds = array<i64: 81>}, {transform_indices = @transform_2, window_bounds = array<i64: 3>}, {transform_indices = @transform_3, window_bounds = array<i64: 1, 3, 16, 16>}]} {
    %cst = arith.constant 0.000000e+00 : f32
    %0 = vector.broadcast %cst : f32 to vector<3x18x18xf32>
    %c0 = arith.constant 0 : index
    %c0_0 = arith.constant 0 : index
    %c0_1 = arith.constant 0 : index
    %1 = vector.load %arg5[%c0, %c0_0, %c0_1] : memref<3x18x18xf32, #tpu.memory_space<vmem>>, vector<3x18x18xf32>
    tpu.vector_store %arg5[%c0, %c0_0, %c0_1], %0 {strides = array<i32>} : memref<3x18x18xf32, #tpu.memory_space<vmem>>, vector<3x18x18xf32>,
    %c0_2 = arith.constant 0 : index
    %c0_3 = arith.constant 0 : index
    %c0_4 = arith.constant 0 : index
    %c0_5 = arith.constant 0 : index
    %2 = vector.load %arg1[%c0_2, %c0_3, %c0_4, %c0_5] : memref<1x3x16x16xf32, #tpu.memory_space<vmem>>, vector<1x1x16x16xf32>
    %3 = vector.shape_cast %2 : vector<1x1x16x16xf32> to vector<16x16xf32>
    %c0_6 = arith.constant 0 : index
    %c1 = arith.constant 1 : index
    %c1_7 = arith.constant 1 : index
    %4 = vector.load %arg5[%c0_6, %c1, %c1_7] : memref<3x18x18xf32, #tpu.memory_space<vmem>>, vector<1x16x16xf32>
    %5 = vector.shape_cast %4 : vector<1x16x16xf32> to vector<16x16xf32>
    %6 = vector.shape_cast %3 : vector<16x16xf32> to vector<1x16x16xf32>
    tpu.vector_store %arg5[%c0_6, %c1, %c1_7], %6 {strides = array<i32>} : memref<3x18x18xf32, #tpu.memory_space<vmem>>, vector<1x16x16xf32>,
    %c0_8 = arith.constant 0 : index
    %c1_9 = arith.constant 1 : index
    %c0_10 = arith.constant 0 : index
    %c0_11 = arith.constant 0 : index
    %7 = vector.load %arg1[%c0_8, %c1_9, %c0_10, %c0_11] : memref<1x3x16x16xf32, #tpu.memory_space<vmem>>, vector<1x1x16x16xf32>
    %8 = vector.shape_cast %7 : vector<1x1x16x16xf32> to vector<16x16xf32>
    %c1_12 = arith.constant 1 : index
    %c1_13 = arith.constant 1 : index
    %c1_14 = arith.constant 1 : index
    %9 = vector.load %arg5[%c1_12, %c1_13, %c1_14] : memref<3x18x18xf32, #tpu.memory_space<vmem>>, vector<1x16x16xf32>
    %10 = vector.shape_cast %9 : vector<1x16x16xf32> to vector<16x16xf32>
    %11 = vector.shape_cast %8 : vector<16x16xf32> to vector<1x16x16xf32>
    tpu.vector_store %arg5[%c1_12, %c1_13, %c1_14], %11 {strides = array<i32>} : memref<3x18x18xf32, #tpu.memory_space<vmem>>, vector<1x16x16xf32>,
    %c0_15 = arith.constant 0 : index
    %c2 = arith.constant 2 : index
    %c0_16 = arith.constant 0 : index
    %c0_17 = arith.constant 0 : index
    %12 = vector.load %arg1[%c0_15, %c2, %c0_16, %c0_17] : memref<1x3x16x16xf32, #tpu.memory_space<vmem>>, vector<1x1x16x16xf32>
    %13 = vector.shape_cast %12 : vector<1x1x16x16xf32> to vector<16x16xf32>
    %c2_18 = arith.constant 2 : index
    %c1_19 = arith.constant 1 : index
    %c1_20 = arith.constant 1 : index
    %14 = vector.load %arg5[%c2_18, %c1_19, %c1_20] : memref<3x18x18xf32, #tpu.memory_space<vmem>>, vector<1x16x16xf32>
    %15 = vector.shape_cast %14 : vector<1x16x16xf32> to vector<16x16xf32>
    %16 = vector.shape_cast %13 : vector<16x16xf32> to vector<1x16x16xf32>
    tpu.vector_store %arg5[%c2_18, %c1_19, %c1_20], %16 {strides = array<i32>} : memref<3x18x18xf32, #tpu.memory_space<vmem>>, vector<1x16x16xf32>,
    %c0_21 = arith.constant 0 : index
    %c0_22 = arith.constant 0 : index
    %c0_23 = arith.constant 0 : index
    %17 = vector.load %arg5[%c0_21, %c0_22, %c0_23] : memref<3x18x18xf32, #tpu.memory_space<vmem>>, vector<3x18x18xf32>
    %cst_24 = arith.constant 0.000000e+00 : f32
    %18 = vector.broadcast %cst_24 : f32 to vector<16x16xf32>
    %c0_25 = arith.constant 0 : index
    %19 = memref.load %arg3[%c0_25] : memref<3xf32, #tpu.memory_space<smem>>
    %20 = vector.broadcast %19 : f32 to vector<16x16xf32>
    %21 = arith.addf %18, %20 : vector<16x16xf32>
    %cst_26 = arith.constant 0.000000e+00 : f32
    %22 = vector.broadcast %cst_26 : f32 to vector<16x16xf32>
    %c1_27 = arith.constant 1 : index
    %23 = memref.load %arg3[%c1_27] : memref<3xf32, #tpu.memory_space<smem>>
    %24 = vector.broadcast %23 : f32 to vector<16x16xf32>
    %25 = arith.addf %22, %24 : vector<16x16xf32>
    %cst_28 = arith.constant 0.000000e+00 : f32
    %26 = vector.broadcast %cst_28 : f32 to vector<16x16xf32>
    %c2_29 = arith.constant 2 : index
    %27 = memref.load %arg3[%c2_29] : memref<3xf32, #tpu.memory_space<smem>>
    %28 = vector.broadcast %27 : f32 to vector<16x16xf32>
    %29 = arith.addf %26, %28 : vector<16x16xf32>
    %30 = vector.extract_strided_slice %17 {offsets = [0, 0, 0], sizes = [1, 16, 16], strides = [1, 1, 1]} : vector<3x18x18xf32> to vector<1x16x16xf32>
    %31 = vector.shape_cast %30 : vector<1x16x16xf32> to vector<16x16xf32>
    %c0_30 = arith.constant 0 : index
    %32 = memref.load %arg2[%c0_30] : memref<81xf32, #tpu.memory_space<smem>>
    %33 = vector.broadcast %32 : f32 to vector<16x16xf32>
    %34 = arith.mulf %31, %33 : vector<16x16xf32>
    %35 = arith.addf %21, %34 : vector<16x16xf32>
    %c27 = arith.constant 27 : index
    %36 = memref.load %arg2[%c27] : memref<81xf32, #tpu.memory_space<smem>>
    %37 = vector.broadcast %36 : f32 to vector<16x16xf32>
    %38 = arith.mulf %31, %37 : vector<16x16xf32>
    %39 = arith.addf %25, %38 : vector<16x16xf32>
    %c54 = arith.constant 54 : index
    %40 = memref.load %arg2[%c54] : memref<81xf32, #tpu.memory_space<smem>>
    %41 = vector.broadcast %40 : f32 to vector<16x16xf32>
    %42 = arith.mulf %31, %41 : vector<16x16xf32>
    %43 = arith.addf %29, %42 : vector<16x16xf32>
    %44 = vector.extract_strided_slice %17 {offsets = [0, 0, 1], sizes = [1, 16, 16], strides = [1, 1, 1]} : vector<3x18x18xf32> to vector<1x16x16xf32>
    %45 = vector.shape_cast %44 : vector<1x16x16xf32> to vector<16x16xf32>
    %c1_31 = arith.constant 1 : index
    %46 = memref.load %arg2[%c1_31] : memref<81xf32, #tpu.memory_space<smem>>
    %47 = vector.broadcast %46 : f32 to vector<16x16xf32>
    %48 = arith.mulf %45, %47 : vector<16x16xf32>
    %49 = arith.addf %35, %48 : vector<16x16xf32>
    %c28 = arith.constant 28 : index
    %50 = memref.load %arg2[%c28] : memref<81xf32, #tpu.memory_space<smem>>
    %51 = vector.broadcast %50 : f32 to vector<16x16xf32>
    %52 = arith.mulf %45, %51 : vector<16x16xf32>
    %53 = arith.addf %39, %52 : vector<16x16xf32>
    %c55 = arith.constant 55 : index
    %54 = memref.load %arg2[%c55] : memref<81xf32, #tpu.memory_space<smem>>
    %55 = vector.broadcast %54 : f32 to vector<16x16xf32>
    %56 = arith.mulf %45, %55 : vector<16x16xf32>
    %57 = arith.addf %43, %56 : vector<16x16xf32>
    %58 = vector.extract_strided_slice %17 {offsets = [0, 0, 2], sizes = [1, 16, 16], strides = [1, 1, 1]} : vector<3x18x18xf32> to vector<1x16x16xf32>
    %59 = vector.shape_cast %58 : vector<1x16x16xf32> to vector<16x16xf32>
    %c2_32 = arith.constant 2 : index
    %60 = memref.load %arg2[%c2_32] : memref<81xf32, #tpu.memory_space<smem>>
    %61 = vector.broadcast %60 : f32 to vector<16x16xf32>
    %62 = arith.mulf %59, %61 : vector<16x16xf32>
    %63 = arith.addf %49, %62 : vector<16x16xf32>
    %c29 = arith.constant 29 : index
    %64 = memref.load %arg2[%c29] : memref<81xf32, #tpu.memory_space<smem>>
    %65 = vector.broadcast %64 : f32 to vector<16x16xf32>
    %66 = arith.mulf %59, %65 : vector<16x16xf32>
    %67 = arith.addf %53, %66 : vector<16x16xf32>
    %c56 = arith.constant 56 : index
    %68 = memref.load %arg2[%c56] : memref<81xf32, #tpu.memory_space<smem>>
    %69 = vector.broadcast %68 : f32 to vector<16x16xf32>
    %70 = arith.mulf %59, %69 : vector<16x16xf32>
    %71 = arith.addf %57, %70 : vector<16x16xf32>
    %72 = vector.extract_strided_slice %17 {offsets = [0, 1, 0], sizes = [1, 16, 16], strides = [1, 1, 1]} : vector<3x18x18xf32> to vector<1x16x16xf32>
    %73 = vector.shape_cast %72 : vector<1x16x16xf32> to vector<16x16xf32>
    %c3 = arith.constant 3 : index
    %74 = memref.load %arg2[%c3] : memref<81xf32, #tpu.memory_space<smem>>
    %75 = vector.broadcast %74 : f32 to vector<16x16xf32>
    %76 = arith.mulf %73, %75 : vector<16x16xf32>
    %77 = arith.addf %63, %76 : vector<16x16xf32>
    %c30 = arith.constant 30 : index
    %78 = memref.load %arg2[%c30] : memref<81xf32, #tpu.memory_space<smem>>
    %79 = vector.broadcast %78 : f32 to vector<16x16xf32>
    %80 = arith.mulf %73, %79 : vector<16x16xf32>
    %81 = arith.addf %67, %80 : vector<16x16xf32>
    %c57 = arith.constant 57 : index
    %82 = memref.load %arg2[%c57] : memref<81xf32, #tpu.memory_space<smem>>
    %83 = vector.broadcast %82 : f32 to vector<16x16xf32>
    %84 = arith.mulf %73, %83 : vector<16x16xf32>
    %85 = arith.addf %71, %84 : vector<16x16xf32>
    %86 = vector.extract_strided_slice %17 {offsets = [0, 1, 1], sizes = [1, 16, 16], strides = [1, 1, 1]} : vector<3x18x18xf32> to vector<1x16x16xf32>
    %87 = vector.shape_cast %86 : vector<1x16x16xf32> to vector<16x16xf32>
    %c4 = arith.constant 4 : index
    %88 = memref.load %arg2[%c4] : memref<81xf32, #tpu.memory_space<smem>>
    %89 = vector.broadcast %88 : f32 to vector<16x16xf32>
    %90 = arith.mulf %87, %89 : vector<16x16xf32>
    %91 = arith.addf %77, %90 : vector<16x16xf32>
    %c31 = arith.constant 31 : index
    %92 = memref.load %arg2[%c31] : memref<81xf32, #tpu.memory_space<smem>>
    %93 = vector.broadcast %92 : f32 to vector<16x16xf32>
    %94 = arith.mulf %87, %93 : vector<16x16xf32>
    %95 = arith.addf %81, %94 : vector<16x16xf32>
    %c58 = arith.constant 58 : index
    %96 = memref.load %arg2[%c58] : memref<81xf32, #tpu.memory_space<smem>>
    %97 = vector.broadcast %96 : f32 to vector<16x16xf32>
    %98 = arith.mulf %87, %97 : vector<16x16xf32>
    %99 = arith.addf %85, %98 : vector<16x16xf32>
    %100 = vector.extract_strided_slice %17 {offsets = [0, 1, 2], sizes = [1, 16, 16], strides = [1, 1, 1]} : vector<3x18x18xf32> to vector<1x16x16xf32>
    %101 = vector.shape_cast %100 : vector<1x16x16xf32> to vector<16x16xf32>
    %c5 = arith.constant 5 : index
    %102 = memref.load %arg2[%c5] : memref<81xf32, #tpu.memory_space<smem>>
    %103 = vector.broadcast %102 : f32 to vector<16x16xf32>
    %104 = arith.mulf %101, %103 : vector<16x16xf32>
    %105 = arith.addf %91, %104 : vector<16x16xf32>
    %c32 = arith.constant 32 : index
    %106 = memref.load %arg2[%c32] : memref<81xf32, #tpu.memory_space<smem>>
    %107 = vector.broadcast %106 : f32 to vector<16x16xf32>
    %108 = arith.mulf %101, %107 : vector<16x16xf32>
    %109 = arith.addf %95, %108 : vector<16x16xf32>
    %c59 = arith.constant 59 : index
    %110 = memref.load %arg2[%c59] : memref<81xf32, #tpu.memory_space<smem>>
    %111 = vector.broadcast %110 : f32 to vector<16x16xf32>
    %112 = arith.mulf %101, %111 : vector<16x16xf32>
    %113 = arith.addf %99, %112 : vector<16x16xf32>
    %114 = vector.extract_strided_slice %17 {offsets = [0, 2, 0], sizes = [1, 16, 16], strides = [1, 1, 1]} : vector<3x18x18xf32> to vector<1x16x16xf32>
    %115 = vector.shape_cast %114 : vector<1x16x16xf32> to vector<16x16xf32>
    %c6 = arith.constant 6 : index
    %116 = memref.load %arg2[%c6] : memref<81xf32, #tpu.memory_space<smem>>
    %117 = vector.broadcast %116 : f32 to vector<16x16xf32>
    %118 = arith.mulf %115, %117 : vector<16x16xf32>
    %119 = arith.addf %105, %118 : vector<16x16xf32>
    %c33 = arith.constant 33 : index
    %120 = memref.load %arg2[%c33] : memref<81xf32, #tpu.memory_space<smem>>
    %121 = vector.broadcast %120 : f32 to vector<16x16xf32>
    %122 = arith.mulf %115, %121 : vector<16x16xf32>
    %123 = arith.addf %109, %122 : vector<16x16xf32>
    %c60 = arith.constant 60 : index
    %124 = memref.load %arg2[%c60] : memref<81xf32, #tpu.memory_space<smem>>
    %125 = vector.broadcast %124 : f32 to vector<16x16xf32>
    %126 = arith.mulf %115, %125 : vector<16x16xf32>
    %127 = arith.addf %113, %126 : vector<16x16xf32>
    %128 = vector.extract_strided_slice %17 {offsets = [0, 2, 1], sizes = [1, 16, 16], strides = [1, 1, 1]} : vector<3x18x18xf32> to vector<1x16x16xf32>
    %129 = vector.shape_cast %128 : vector<1x16x16xf32> to vector<16x16xf32>
    %c7 = arith.constant 7 : index
    %130 = memref.load %arg2[%c7] : memref<81xf32, #tpu.memory_space<smem>>
    %131 = vector.broadcast %130 : f32 to vector<16x16xf32>
    %132 = arith.mulf %129, %131 : vector<16x16xf32>
    %133 = arith.addf %119, %132 : vector<16x16xf32>
    %c34 = arith.constant 34 : index
    %134 = memref.load %arg2[%c34] : memref<81xf32, #tpu.memory_space<smem>>
    %135 = vector.broadcast %134 : f32 to vector<16x16xf32>
    %136 = arith.mulf %129, %135 : vector<16x16xf32>
    %137 = arith.addf %123, %136 : vector<16x16xf32>
    %c61 = arith.constant 61 : index
    %138 = memref.load %arg2[%c61] : memref<81xf32, #tpu.memory_space<smem>>
    %139 = vector.broadcast %138 : f32 to vector<16x16xf32>
    %140 = arith.mulf %129, %139 : vector<16x16xf32>
    %141 = arith.addf %127, %140 : vector<16x16xf32>
    %142 = vector.extract_strided_slice %17 {offsets = [0, 2, 2], sizes = [1, 16, 16], strides = [1, 1, 1]} : vector<3x18x18xf32> to vector<1x16x16xf32>
    %143 = vector.shape_cast %142 : vector<1x16x16xf32> to vector<16x16xf32>
    %c8 = arith.constant 8 : index
    %144 = memref.load %arg2[%c8] : memref<81xf32, #tpu.memory_space<smem>>
    %145 = vector.broadcast %144 : f32 to vector<16x16xf32>
    %146 = arith.mulf %143, %145 : vector<16x16xf32>
    %147 = arith.addf %133, %146 : vector<16x16xf32>
    %c35 = arith.constant 35 : index
    %148 = memref.load %arg2[%c35] : memref<81xf32, #tpu.memory_space<smem>>
    %149 = vector.broadcast %148 : f32 to vector<16x16xf32>
    %150 = arith.mulf %143, %149 : vector<16x16xf32>
    %151 = arith.addf %137, %150 : vector<16x16xf32>
    %c62 = arith.constant 62 : index
    %152 = memref.load %arg2[%c62] : memref<81xf32, #tpu.memory_space<smem>>
    %153 = vector.broadcast %152 : f32 to vector<16x16xf32>
    %154 = arith.mulf %143, %153 : vector<16x16xf32>
    %155 = arith.addf %141, %154 : vector<16x16xf32>
    %156 = vector.extract_strided_slice %17 {offsets = [1, 0, 0], sizes = [1, 16, 16], strides = [1, 1, 1]} : vector<3x18x18xf32> to vector<1x16x16xf32>
    %157 = vector.shape_cast %156 : vector<1x16x16xf32> to vector<16x16xf32>
    %c9 = arith.constant 9 : index
    %158 = memref.load %arg2[%c9] : memref<81xf32, #tpu.memory_space<smem>>
    %159 = vector.broadcast %158 : f32 to vector<16x16xf32>
    %160 = arith.mulf %157, %159 : vector<16x16xf32>
    %161 = arith.addf %147, %160 : vector<16x16xf32>
    %c36 = arith.constant 36 : index
    %162 = memref.load %arg2[%c36] : memref<81xf32, #tpu.memory_space<smem>>
    %163 = vector.broadcast %162 : f32 to vector<16x16xf32>
    %164 = arith.mulf %157, %163 : vector<16x16xf32>
    %165 = arith.addf %151, %164 : vector<16x16xf32>
    %c63 = arith.constant 63 : index
    %166 = memref.load %arg2[%c63] : memref<81xf32, #tpu.memory_space<smem>>
    %167 = vector.broadcast %166 : f32 to vector<16x16xf32>
    %168 = arith.mulf %157, %167 : vector<16x16xf32>
    %169 = arith.addf %155, %168 : vector<16x16xf32>
    %170 = vector.extract_strided_slice %17 {offsets = [1, 0, 1], sizes = [1, 16, 16], strides = [1, 1, 1]} : vector<3x18x18xf32> to vector<1x16x16xf32>
    %171 = vector.shape_cast %170 : vector<1x16x16xf32> to vector<16x16xf32>
    %c10 = arith.constant 10 : index
    %172 = memref.load %arg2[%c10] : memref<81xf32, #tpu.memory_space<smem>>
    %173 = vector.broadcast %172 : f32 to vector<16x16xf32>
    %174 = arith.mulf %171, %173 : vector<16x16xf32>
    %175 = arith.addf %161, %174 : vector<16x16xf32>
    %c37 = arith.constant 37 : index
    %176 = memref.load %arg2[%c37] : memref<81xf32, #tpu.memory_space<smem>>
    %177 = vector.broadcast %176 : f32 to vector<16x16xf32>
    %178 = arith.mulf %171, %177 : vector<16x16xf32>
    %179 = arith.addf %165, %178 : vector<16x16xf32>
    %c64 = arith.constant 64 : index
    %180 = memref.load %arg2[%c64] : memref<81xf32, #tpu.memory_space<smem>>
    %181 = vector.broadcast %180 : f32 to vector<16x16xf32>
    %182 = arith.mulf %171, %181 : vector<16x16xf32>
    %183 = arith.addf %169, %182 : vector<16x16xf32>
    %184 = vector.extract_strided_slice %17 {offsets = [1, 0, 2], sizes = [1, 16, 16], strides = [1, 1, 1]} : vector<3x18x18xf32> to vector<1x16x16xf32>
    %185 = vector.shape_cast %184 : vector<1x16x16xf32> to vector<16x16xf32>
    %c11 = arith.constant 11 : index
    %186 = memref.load %arg2[%c11] : memref<81xf32, #tpu.memory_space<smem>>
    %187 = vector.broadcast %186 : f32 to vector<16x16xf32>
    %188 = arith.mulf %185, %187 : vector<16x16xf32>
    %189 = arith.addf %175, %188 : vector<16x16xf32>
    %c38 = arith.constant 38 : index
    %190 = memref.load %arg2[%c38] : memref<81xf32, #tpu.memory_space<smem>>
    %191 = vector.broadcast %190 : f32 to vector<16x16xf32>
    %192 = arith.mulf %185, %191 : vector<16x16xf32>
    %193 = arith.addf %179, %192 : vector<16x16xf32>
    %c65 = arith.constant 65 : index
    %194 = memref.load %arg2[%c65] : memref<81xf32, #tpu.memory_space<smem>>
    %195 = vector.broadcast %194 : f32 to vector<16x16xf32>
    %196 = arith.mulf %185, %195 : vector<16x16xf32>
    %197 = arith.addf %183, %196 : vector<16x16xf32>
    %198 = vector.extract_strided_slice %17 {offsets = [1, 1, 0], sizes = [1, 16, 16], strides = [1, 1, 1]} : vector<3x18x18xf32> to vector<1x16x16xf32>
    %199 = vector.shape_cast %198 : vector<1x16x16xf32> to vector<16x16xf32>
    %c12 = arith.constant 12 : index
    %200 = memref.load %arg2[%c12] : memref<81xf32, #tpu.memory_space<smem>>
    %201 = vector.broadcast %200 : f32 to vector<16x16xf32>
    %202 = arith.mulf %199, %201 : vector<16x16xf32>
    %203 = arith.addf %189, %202 : vector<16x16xf32>
    %c39 = arith.constant 39 : index
    %204 = memref.load %arg2[%c39] : memref<81xf32, #tpu.memory_space<smem>>
    %205 = vector.broadcast %204 : f32 to vector<16x16xf32>
    %206 = arith.mulf %199, %205 : vector<16x16xf32>
    %207 = arith.addf %193, %206 : vector<16x16xf32>
    %c66 = arith.constant 66 : index
    %208 = memref.load %arg2[%c66] : memref<81xf32, #tpu.memory_space<smem>>
    %209 = vector.broadcast %208 : f32 to vector<16x16xf32>
    %210 = arith.mulf %199, %209 : vector<16x16xf32>
    %211 = arith.addf %197, %210 : vector<16x16xf32>
    %212 = vector.extract_strided_slice %17 {offsets = [1, 1, 1], sizes = [1, 16, 16], strides = [1, 1, 1]} : vector<3x18x18xf32> to vector<1x16x16xf32>
    %213 = vector.shape_cast %212 : vector<1x16x16xf32> to vector<16x16xf32>
    %c13 = arith.constant 13 : index
    %214 = memref.load %arg2[%c13] : memref<81xf32, #tpu.memory_space<smem>>
    %215 = vector.broadcast %214 : f32 to vector<16x16xf32>
    %216 = arith.mulf %213, %215 : vector<16x16xf32>
    %217 = arith.addf %203, %216 : vector<16x16xf32>
    %c40 = arith.constant 40 : index
    %218 = memref.load %arg2[%c40] : memref<81xf32, #tpu.memory_space<smem>>
    %219 = vector.broadcast %218 : f32 to vector<16x16xf32>
    %220 = arith.mulf %213, %219 : vector<16x16xf32>
    %221 = arith.addf %207, %220 : vector<16x16xf32>
    %c67 = arith.constant 67 : index
    %222 = memref.load %arg2[%c67] : memref<81xf32, #tpu.memory_space<smem>>
    %223 = vector.broadcast %222 : f32 to vector<16x16xf32>
    %224 = arith.mulf %213, %223 : vector<16x16xf32>
    %225 = arith.addf %211, %224 : vector<16x16xf32>
    %226 = vector.extract_strided_slice %17 {offsets = [1, 1, 2], sizes = [1, 16, 16], strides = [1, 1, 1]} : vector<3x18x18xf32> to vector<1x16x16xf32>
    %227 = vector.shape_cast %226 : vector<1x16x16xf32> to vector<16x16xf32>
    %c14 = arith.constant 14 : index
    %228 = memref.load %arg2[%c14] : memref<81xf32, #tpu.memory_space<smem>>
    %229 = vector.broadcast %228 : f32 to vector<16x16xf32>
    %230 = arith.mulf %227, %229 : vector<16x16xf32>
    %231 = arith.addf %217, %230 : vector<16x16xf32>
    %c41 = arith.constant 41 : index
    %232 = memref.load %arg2[%c41] : memref<81xf32, #tpu.memory_space<smem>>
    %233 = vector.broadcast %232 : f32 to vector<16x16xf32>
    %234 = arith.mulf %227, %233 : vector<16x16xf32>
    %235 = arith.addf %221, %234 : vector<16x16xf32>
    %c68 = arith.constant 68 : index
    %236 = memref.load %arg2[%c68] : memref<81xf32, #tpu.memory_space<smem>>
    %237 = vector.broadcast %236 : f32 to vector<16x16xf32>
    %238 = arith.mulf %227, %237 : vector<16x16xf32>
    %239 = arith.addf %225, %238 : vector<16x16xf32>
    %240 = vector.extract_strided_slice %17 {offsets = [1, 2, 0], sizes = [1, 16, 16], strides = [1, 1, 1]} : vector<3x18x18xf32> to vector<1x16x16xf32>
    %241 = vector.shape_cast %240 : vector<1x16x16xf32> to vector<16x16xf32>
    %c15 = arith.constant 15 : index
    %242 = memref.load %arg2[%c15] : memref<81xf32, #tpu.memory_space<smem>>
    %243 = vector.broadcast %242 : f32 to vector<16x16xf32>
    %244 = arith.mulf %241, %243 : vector<16x16xf32>
    %245 = arith.addf %231, %244 : vector<16x16xf32>
    %c42 = arith.constant 42 : index
    %246 = memref.load %arg2[%c42] : memref<81xf32, #tpu.memory_space<smem>>
    %247 = vector.broadcast %246 : f32 to vector<16x16xf32>
    %248 = arith.mulf %241, %247 : vector<16x16xf32>
    %249 = arith.addf %235, %248 : vector<16x16xf32>
    %c69 = arith.constant 69 : index
    %250 = memref.load %arg2[%c69] : memref<81xf32, #tpu.memory_space<smem>>
    %251 = vector.broadcast %250 : f32 to vector<16x16xf32>
    %252 = arith.mulf %241, %251 : vector<16x16xf32>
    %253 = arith.addf %239, %252 : vector<16x16xf32>
    %254 = vector.extract_strided_slice %17 {offsets = [1, 2, 1], sizes = [1, 16, 16], strides = [1, 1, 1]} : vector<3x18x18xf32> to vector<1x16x16xf32>
    %255 = vector.shape_cast %254 : vector<1x16x16xf32> to vector<16x16xf32>
    %c16 = arith.constant 16 : index
    %256 = memref.load %arg2[%c16] : memref<81xf32, #tpu.memory_space<smem>>
    %257 = vector.broadcast %256 : f32 to vector<16x16xf32>
    %258 = arith.mulf %255, %257 : vector<16x16xf32>
    %259 = arith.addf %245, %258 : vector<16x16xf32>
    %c43 = arith.constant 43 : index
    %260 = memref.load %arg2[%c43] : memref<81xf32, #tpu.memory_space<smem>>
    %261 = vector.broadcast %260 : f32 to vector<16x16xf32>
    %262 = arith.mulf %255, %261 : vector<16x16xf32>
    %263 = arith.addf %249, %262 : vector<16x16xf32>
    %c70 = arith.constant 70 : index
    %264 = memref.load %arg2[%c70] : memref<81xf32, #tpu.memory_space<smem>>
    %265 = vector.broadcast %264 : f32 to vector<16x16xf32>
    %266 = arith.mulf %255, %265 : vector<16x16xf32>
    %267 = arith.addf %253, %266 : vector<16x16xf32>
    %268 = vector.extract_strided_slice %17 {offsets = [1, 2, 2], sizes = [1, 16, 16], strides = [1, 1, 1]} : vector<3x18x18xf32> to vector<1x16x16xf32>
    %269 = vector.shape_cast %268 : vector<1x16x16xf32> to vector<16x16xf32>
    %c17 = arith.constant 17 : index
    %270 = memref.load %arg2[%c17] : memref<81xf32, #tpu.memory_space<smem>>
    %271 = vector.broadcast %270 : f32 to vector<16x16xf32>
    %272 = arith.mulf %269, %271 : vector<16x16xf32>
    %273 = arith.addf %259, %272 : vector<16x16xf32>
    %c44 = arith.constant 44 : index
    %274 = memref.load %arg2[%c44] : memref<81xf32, #tpu.memory_space<smem>>
    %275 = vector.broadcast %274 : f32 to vector<16x16xf32>
    %276 = arith.mulf %269, %275 : vector<16x16xf32>
    %277 = arith.addf %263, %276 : vector<16x16xf32>
    %c71 = arith.constant 71 : index
    %278 = memref.load %arg2[%c71] : memref<81xf32, #tpu.memory_space<smem>>
    %279 = vector.broadcast %278 : f32 to vector<16x16xf32>
    %280 = arith.mulf %269, %279 : vector<16x16xf32>
    %281 = arith.addf %267, %280 : vector<16x16xf32>
    %282 = vector.extract_strided_slice %17 {offsets = [2, 0, 0], sizes = [1, 16, 16], strides = [1, 1, 1]} : vector<3x18x18xf32> to vector<1x16x16xf32>
    %283 = vector.shape_cast %282 : vector<1x16x16xf32> to vector<16x16xf32>
    %c18 = arith.constant 18 : index
    %284 = memref.load %arg2[%c18] : memref<81xf32, #tpu.memory_space<smem>>
    %285 = vector.broadcast %284 : f32 to vector<16x16xf32>
    %286 = arith.mulf %283, %285 : vector<16x16xf32>
    %287 = arith.addf %273, %286 : vector<16x16xf32>
    %c45 = arith.constant 45 : index
    %288 = memref.load %arg2[%c45] : memref<81xf32, #tpu.memory_space<smem>>
    %289 = vector.broadcast %288 : f32 to vector<16x16xf32>
    %290 = arith.mulf %283, %289 : vector<16x16xf32>
    %291 = arith.addf %277, %290 : vector<16x16xf32>
    %c72 = arith.constant 72 : index
    %292 = memref.load %arg2[%c72] : memref<81xf32, #tpu.memory_space<smem>>
    %293 = vector.broadcast %292 : f32 to vector<16x16xf32>
    %294 = arith.mulf %283, %293 : vector<16x16xf32>
    %295 = arith.addf %281, %294 : vector<16x16xf32>
    %296 = vector.extract_strided_slice %17 {offsets = [2, 0, 1], sizes = [1, 16, 16], strides = [1, 1, 1]} : vector<3x18x18xf32> to vector<1x16x16xf32>
    %297 = vector.shape_cast %296 : vector<1x16x16xf32> to vector<16x16xf32>
    %c19 = arith.constant 19 : index
    %298 = memref.load %arg2[%c19] : memref<81xf32, #tpu.memory_space<smem>>
    %299 = vector.broadcast %298 : f32 to vector<16x16xf32>
    %300 = arith.mulf %297, %299 : vector<16x16xf32>
    %301 = arith.addf %287, %300 : vector<16x16xf32>
    %c46 = arith.constant 46 : index
    %302 = memref.load %arg2[%c46] : memref<81xf32, #tpu.memory_space<smem>>
    %303 = vector.broadcast %302 : f32 to vector<16x16xf32>
    %304 = arith.mulf %297, %303 : vector<16x16xf32>
    %305 = arith.addf %291, %304 : vector<16x16xf32>
    %c73 = arith.constant 73 : index
    %306 = memref.load %arg2[%c73] : memref<81xf32, #tpu.memory_space<smem>>
    %307 = vector.broadcast %306 : f32 to vector<16x16xf32>
    %308 = arith.mulf %297, %307 : vector<16x16xf32>
    %309 = arith.addf %295, %308 : vector<16x16xf32>
    %310 = vector.extract_strided_slice %17 {offsets = [2, 0, 2], sizes = [1, 16, 16], strides = [1, 1, 1]} : vector<3x18x18xf32> to vector<1x16x16xf32>
    %311 = vector.shape_cast %310 : vector<1x16x16xf32> to vector<16x16xf32>
    %c20 = arith.constant 20 : index
    %312 = memref.load %arg2[%c20] : memref<81xf32, #tpu.memory_space<smem>>
    %313 = vector.broadcast %312 : f32 to vector<16x16xf32>
    %314 = arith.mulf %311, %313 : vector<16x16xf32>
    %315 = arith.addf %301, %314 : vector<16x16xf32>
    %c47 = arith.constant 47 : index
    %316 = memref.load %arg2[%c47] : memref<81xf32, #tpu.memory_space<smem>>
    %317 = vector.broadcast %316 : f32 to vector<16x16xf32>
    %318 = arith.mulf %311, %317 : vector<16x16xf32>
    %319 = arith.addf %305, %318 : vector<16x16xf32>
    %c74 = arith.constant 74 : index
    %320 = memref.load %arg2[%c74] : memref<81xf32, #tpu.memory_space<smem>>
    %321 = vector.broadcast %320 : f32 to vector<16x16xf32>
    %322 = arith.mulf %311, %321 : vector<16x16xf32>
    %323 = arith.addf %309, %322 : vector<16x16xf32>
    %324 = vector.extract_strided_slice %17 {offsets = [2, 1, 0], sizes = [1, 16, 16], strides = [1, 1, 1]} : vector<3x18x18xf32> to vector<1x16x16xf32>
    %325 = vector.shape_cast %324 : vector<1x16x16xf32> to vector<16x16xf32>
    %c21 = arith.constant 21 : index
    %326 = memref.load %arg2[%c21] : memref<81xf32, #tpu.memory_space<smem>>
    %327 = vector.broadcast %326 : f32 to vector<16x16xf32>
    %328 = arith.mulf %325, %327 : vector<16x16xf32>
    %329 = arith.addf %315, %328 : vector<16x16xf32>
    %c48 = arith.constant 48 : index
    %330 = memref.load %arg2[%c48] : memref<81xf32, #tpu.memory_space<smem>>
    %331 = vector.broadcast %330 : f32 to vector<16x16xf32>
    %332 = arith.mulf %325, %331 : vector<16x16xf32>
    %333 = arith.addf %319, %332 : vector<16x16xf32>
    %c75 = arith.constant 75 : index
    %334 = memref.load %arg2[%c75] : memref<81xf32, #tpu.memory_space<smem>>
    %335 = vector.broadcast %334 : f32 to vector<16x16xf32>
    %336 = arith.mulf %325, %335 : vector<16x16xf32>
    %337 = arith.addf %323, %336 : vector<16x16xf32>
    %338 = vector.extract_strided_slice %17 {offsets = [2, 1, 1], sizes = [1, 16, 16], strides = [1, 1, 1]} : vector<3x18x18xf32> to vector<1x16x16xf32>
    %339 = vector.shape_cast %338 : vector<1x16x16xf32> to vector<16x16xf32>
    %c22 = arith.constant 22 : index
    %340 = memref.load %arg2[%c22] : memref<81xf32, #tpu.memory_space<smem>>
    %341 = vector.broadcast %340 : f32 to vector<16x16xf32>
    %342 = arith.mulf %339, %341 : vector<16x16xf32>
    %343 = arith.addf %329, %342 : vector<16x16xf32>
    %c49 = arith.constant 49 : index
    %344 = memref.load %arg2[%c49] : memref<81xf32, #tpu.memory_space<smem>>
    %345 = vector.broadcast %344 : f32 to vector<16x16xf32>
    %346 = arith.mulf %339, %345 : vector<16x16xf32>
    %347 = arith.addf %333, %346 : vector<16x16xf32>
    %c76 = arith.constant 76 : index
    %348 = memref.load %arg2[%c76] : memref<81xf32, #tpu.memory_space<smem>>
    %349 = vector.broadcast %348 : f32 to vector<16x16xf32>
    %350 = arith.mulf %339, %349 : vector<16x16xf32>
    %351 = arith.addf %337, %350 : vector<16x16xf32>
    %352 = vector.extract_strided_slice %17 {offsets = [2, 1, 2], sizes = [1, 16, 16], strides = [1, 1, 1]} : vector<3x18x18xf32> to vector<1x16x16xf32>
    %353 = vector.shape_cast %352 : vector<1x16x16xf32> to vector<16x16xf32>
    %c23 = arith.constant 23 : index
    %354 = memref.load %arg2[%c23] : memref<81xf32, #tpu.memory_space<smem>>
    %355 = vector.broadcast %354 : f32 to vector<16x16xf32>
    %356 = arith.mulf %353, %355 : vector<16x16xf32>
    %357 = arith.addf %343, %356 : vector<16x16xf32>
    %c50 = arith.constant 50 : index
    %358 = memref.load %arg2[%c50] : memref<81xf32, #tpu.memory_space<smem>>
    %359 = vector.broadcast %358 : f32 to vector<16x16xf32>
    %360 = arith.mulf %353, %359 : vector<16x16xf32>
    %361 = arith.addf %347, %360 : vector<16x16xf32>
    %c77 = arith.constant 77 : index
    %362 = memref.load %arg2[%c77] : memref<81xf32, #tpu.memory_space<smem>>
    %363 = vector.broadcast %362 : f32 to vector<16x16xf32>
    %364 = arith.mulf %353, %363 : vector<16x16xf32>
    %365 = arith.addf %351, %364 : vector<16x16xf32>
    %366 = vector.extract_strided_slice %17 {offsets = [2, 2, 0], sizes = [1, 16, 16], strides = [1, 1, 1]} : vector<3x18x18xf32> to vector<1x16x16xf32>
    %367 = vector.shape_cast %366 : vector<1x16x16xf32> to vector<16x16xf32>
    %c24 = arith.constant 24 : index
    %368 = memref.load %arg2[%c24] : memref<81xf32, #tpu.memory_space<smem>>
    %369 = vector.broadcast %368 : f32 to vector<16x16xf32>
    %370 = arith.mulf %367, %369 : vector<16x16xf32>
    %371 = arith.addf %357, %370 : vector<16x16xf32>
    %c51 = arith.constant 51 : index
    %372 = memref.load %arg2[%c51] : memref<81xf32, #tpu.memory_space<smem>>
    %373 = vector.broadcast %372 : f32 to vector<16x16xf32>
    %374 = arith.mulf %367, %373 : vector<16x16xf32>
    %375 = arith.addf %361, %374 : vector<16x16xf32>
    %c78 = arith.constant 78 : index
    %376 = memref.load %arg2[%c78] : memref<81xf32, #tpu.memory_space<smem>>
    %377 = vector.broadcast %376 : f32 to vector<16x16xf32>
    %378 = arith.mulf %367, %377 : vector<16x16xf32>
    %379 = arith.addf %365, %378 : vector<16x16xf32>
    %380 = vector.extract_strided_slice %17 {offsets = [2, 2, 1], sizes = [1, 16, 16], strides = [1, 1, 1]} : vector<3x18x18xf32> to vector<1x16x16xf32>
    %381 = vector.shape_cast %380 : vector<1x16x16xf32> to vector<16x16xf32>
    %c25 = arith.constant 25 : index
    %382 = memref.load %arg2[%c25] : memref<81xf32, #tpu.memory_space<smem>>
    %383 = vector.broadcast %382 : f32 to vector<16x16xf32>
    %384 = arith.mulf %381, %383 : vector<16x16xf32>
    %385 = arith.addf %371, %384 : vector<16x16xf32>
    %c52 = arith.constant 52 : index
    %386 = memref.load %arg2[%c52] : memref<81xf32, #tpu.memory_space<smem>>
    %387 = vector.broadcast %386 : f32 to vector<16x16xf32>
    %388 = arith.mulf %381, %387 : vector<16x16xf32>
    %389 = arith.addf %375, %388 : vector<16x16xf32>
    %c79 = arith.constant 79 : index
    %390 = memref.load %arg2[%c79] : memref<81xf32, #tpu.memory_space<smem>>
    %391 = vector.broadcast %390 : f32 to vector<16x16xf32>
    %392 = arith.mulf %381, %391 : vector<16x16xf32>
    %393 = arith.addf %379, %392 : vector<16x16xf32>
    %394 = vector.extract_strided_slice %17 {offsets = [2, 2, 2], sizes = [1, 16, 16], strides = [1, 1, 1]} : vector<3x18x18xf32> to vector<1x16x16xf32>
    %395 = vector.shape_cast %394 : vector<1x16x16xf32> to vector<16x16xf32>
    %c26 = arith.constant 26 : index
    %396 = memref.load %arg2[%c26] : memref<81xf32, #tpu.memory_space<smem>>
    %397 = vector.broadcast %396 : f32 to vector<16x16xf32>
    %398 = arith.mulf %395, %397 : vector<16x16xf32>
    %399 = arith.addf %385, %398 : vector<16x16xf32>
    %c53 = arith.constant 53 : index
    %400 = memref.load %arg2[%c53] : memref<81xf32, #tpu.memory_space<smem>>
    %401 = vector.broadcast %400 : f32 to vector<16x16xf32>
    %402 = arith.mulf %395, %401 : vector<16x16xf32>
    %403 = arith.addf %389, %402 : vector<16x16xf32>
    %c80 = arith.constant 80 : index
    %404 = memref.load %arg2[%c80] : memref<81xf32, #tpu.memory_space<smem>>
    %405 = vector.broadcast %404 : f32 to vector<16x16xf32>
    %406 = arith.mulf %395, %405 : vector<16x16xf32>
    %407 = arith.addf %393, %406 : vector<16x16xf32>
    %408 = vector.shape_cast %399 : vector<16x16xf32> to vector<1x16x16xf32>
    %409 = vector.shape_cast %403 : vector<16x16xf32> to vector<1x16x16xf32>
    %410 = vector.shape_cast %407 : vector<16x16xf32> to vector<1x16x16xf32>
    %411 = tpu.concatenate %408, %409, %410 in 0 : vector<1x16x16xf32>, vector<1x16x16xf32>, vector<1x16x16xf32> -> vector<3x16x16xf32>
    %c0_33 = arith.constant 0 : index
    %c0_34 = arith.constant 0 : index
    %c0_35 = arith.constant 0 : index
    %c0_36 = arith.constant 0 : index
    %412 = vector.load %arg4[%c0_33, %c0_34, %c0_35, %c0_36] : memref<1x3x16x16xf32, #tpu.memory_space<vmem>>, vector<1x3x16x16xf32>
    %413 = vector.shape_cast %412 : vector<1x3x16x16xf32> to vector<3x16x16xf32>
    %414 = vector.shape_cast %411 : vector<3x16x16xf32> to vector<1x3x16x16xf32>
    tpu.vector_store %arg4[%c0_33, %c0_34, %c0_35, %c0_36], %414 {strides = array<i32>} : memref<1x3x16x16xf32, #tpu.memory_space<vmem>>, vector<1x3x16x16xf32>,
    return
  }
  func.func @transform_0(%arg0: i32) -> (i32, i32, i32, i32) {
    %c0_i32 = arith.constant 0 : i32
    %c0_i32_0 = arith.constant 0 : i32
    %c0_i32_1 = arith.constant 0 : i32
    %c0_i32_2 = arith.constant 0 : i32
    return %arg0, %c0_i32, %c0_i32_0, %c0_i32_1 : i32, i32, i32, i32
  }
  func.func @transform_1(%arg0: i32) -> i32 {
    %c0_i32 = arith.constant 0 : i32
    %c0_i32_0 = arith.constant 0 : i32
    return %c0_i32 : i32
  }
  func.func @transform_2(%arg0: i32) -> i32 {
    %c0_i32 = arith.constant 0 : i32
    %c0_i32_0 = arith.constant 0 : i32
    return %c0_i32 : i32
  }
  func.func @transform_3(%arg0: i32) -> (i32, i32, i32, i32) {
    %c0_i32 = arith.constant 0 : i32
    %c0_i32_0 = arith.constant 0 : i32
    %c0_i32_1 = arith.constant 0 : i32
    %c0_i32_2 = arith.constant 0 : i32
    return %arg0, %c0_i32, %c0_i32_0, %c0_i32_1 : i32, i32, i32, i32
  }
}

</mosaic_0001>

<bundles_post_ra>
// kernel: decoder_forward.3
= control target key start
LH: loop header
LB: loop body
LE: loop exit
PB: predicated region body
PF: predicated region fallthrough
CT: control target
= control target key end

     0   :  { %s3106_s0 = inlined_call_operand.vmem [shape: f32[2,3,16,16], index: 0, kind: input, shape index: {}]   ;;  %s3107_s1 = inlined_call_operand.vmem [shape: f32[81], index: 1, kind: input, shape index: {}]   ;;  %s3108_s2 = inlined_call_operand.vmem [shape: f32[3], index: 2, kind: input, shape index: {}]   ;;  %s3109_s3 = inlined_call_operand.hbm [shape: f32[2,3,16,16], index: 3, kind: output, shape index: {}]  }
   0x1   :  { %3115 = sst [smem:[#allocation23_spill]] %s3106_s0 }
   0x2   :  { %3116 = sst [smem:[#allocation24_spill]] %s3107_s1 }
   0x3   :  { %3117 = sst [smem:[#allocation25_spill]] %s3108_s2 }
   0x4   :  { %8 = vsyncpa [#allocation5], 0 }
   0x5   :  { %9 = vsyncpa [#allocation7], 0 }
   0x6   :  { %10 = vsyncpa [#allocation4], 0 }
   0x7   :  { %12 = vsyncpa [#allocation4 + $0x1], 0  ;;  %s2045_s12 = smov 0   ;;  %s2047_s13 = smov 0  }
   0x8   :  { %s2049_s14 = smov 0   ;;  %s2051_s15 = smov 0  }
   0x9 LB: > { %s2066_s16 = sadd.s32 4294967295, %s2014_s15   ;;  %s1741_s17 = sadd.s32 4294967294, %s2014_s15   ;;  %s2014_s15 = sphi %s2051_s15, %s3164_s15   ;;  %s2010_s14 = sphi %s2049_s14, %s3163_s14   ;;  %s2006_s13 = sphi %s2047_s13, %s3162_s13   ;;  %s2002_s12 = sphi %s2045_s12, %s3161_s12  }
   0xa   : > { %s2070_s18 = sadd.s32 1, %s2014_s15   ;;  %s93_s19 = sadd.s32 1, %s2010_s14 }
   0xb   : > { %s90_s20 = ssub.s32 %s2014_s15, %s2070_s18  ;;  %p103_p0 = scmp.ne.s32.totalorder %s2010_s14, %s2006_s13 }
   0xc   : > { %p91_p1 = scmp.eq.s32.totalorder %s90_s20, 0  ;;  %p104_p2 = scmp.eq.s32.totalorder %s2066_s16, 1 }
   0xd   : > { %p109_p3 = scmp.ne.s32.totalorder %s2006_s13, %s2002_s12  ;;  %p110_p4 = scmp.eq.s32.totalorder %s1741_s17, 1 }
   0xe   : > { %s2081_s21 = scalar_select %p91_p1, %s2010_s14, %s93_s19  }
   0xf   : > { %p2083_p5 = por %p104_p2, %p103_p0  ;;  %p2087_p6 = por %p110_p4, %p109_p3 }
  0x10   : > { %p1742_p7 = scmp.ge.s32.totalorder %s2014_s15, 1  ;;  %p117_p8 = scmp.lt.s32.totalorder %s2014_s15, 3 }
  0x11   : > { %s3118_s22 = scalar_select %p2083_p5, 1, 0 }
  0x12   : > { %s3119_s23 = scalar_select %p2087_p6, 1, 0 }
  0x13   : > { %p3110_p9 = scmp.eq.s32.totalorder %s2066_s16, 0  ;;  %p2094_p10 = pnand %p1742_p7, %p117_p8 }
  0x14   : > { %s3121_s1 = sld [smem:[#allocation24_spill]] }
  0x15   : > { %s3120_s24 = scalar_select %p2094_p10, 1, 0 }
  0x16   : > { %p1852_p11 = pneg %p2094_p10  ;;  %s3122_s2 = sld [smem:[#allocation25_spill]] }
  0x18   : > { %p2108_p12 = pnand %p3110_p9, %p1852_p11 }
  0x1a   : > { %s130_s27 = sshll.u32 %s3121_s1, 4  ;;  %p1918_p0 = pneg %p2108_p12  ;;  %s131_s27 = int_to_ptr.vmem [resolvable:$true] %s130_s27 }
  0x1b   : > { %s1916_s5 = scalar_lea.vmem %s131_s27, 16  ;;  %p1924_p3 = scmp.lt.s32.totalorder %s131_s27, %s131_s27 }
  0x1c   : > { %s141_s30 = sshll.u32 %s3122_s2, 4  ;;  %p1917_p13 = scmp.ne.s32.totalorder %s131_s27, %s1916_s5  ;;  %s142_s30 = int_to_ptr.vmem [resolvable:$true] %s141_s30 }
  0x1d   : > { %p1925_p4 = scmp.lt.s32.totalorder %s1916_s5, %s1916_s5 }
  0x1e   : > { %p1919_p1 = pnand %p1918_p0, %p1917_p13 }
  0x1f   : > { %p1926_p7 = por %p1925_p4, %p1924_p3 }
  0x20   : > { %p1920_p2 = pneg %p1919_p1 }
  0x22   : > { %p1927_p8 = pnand %p1926_p7, %p1920_p2 }
  0x24   : > { %1930 = shalt.err (!%p1927_p8)
}
  0x25   : > { %s2016_s6 = smov [#allocation3]   ;;  %s1931_s7 = scalar_lea.vmem %s142_s30, 16 }
  0x26   : > { %1855 = dma.vmem_to_smem (!%p2108_p12), %s131_s27, 16, %s2016_s6, [#allocation5]  }
  0x27   : > { %p1932_p11 = scmp.ne.s32.totalorder %s142_s30, %s1931_s7  ;;  %p1939_p5 = scmp.lt.s32.totalorder %s142_s30, %s142_s30 }
  0x28   : > { %p1940_p10 = scmp.lt.s32.totalorder %s1931_s7, %s1931_s7 }
  0x29   : > { %p1934_p9 = pnand %p1932_p11, %p1918_p0 }
  0x2a   : > { %p1941_p13 = por %p1940_p10, %p1939_p5 }
  0x2b   : > { %p1935_p6 = pneg %p1934_p9 }
  0x2d   : > { %p1942_p1 = pnand %p1941_p13, %p1935_p6 }
  0x2f   : > { %1945 = shalt.err (!%p1942_p1)
}
  0x30   : > { %s2017_s8 = smov [#allocation6]   ;;  %p3124_p2 = scmp.ne.s32.totalorder %s3120_s24, 0 }
  0x31   : > { %1858 = dma.vmem_to_smem (!%p2108_p12), %s142_s30, 16, %s2017_s8, [#allocation7]  }
  0x32   : > { %162 = sbr.rel (%p3124_p2) target bundleno = 544 (0x220), region = 32 }
  0x37   : > { %p3125_p3 = scmp.eq.s32.totalorder %s2066_s16, 0 }
  0x39   : > { %1989 = dma.done.wait (%p3125_p3), [#allocation5], 16   ;;  %p3126_p4 = pmov %p3125_p3 }
  0x3a   : > { %p3127_p9 = pmov %p3125_p3 }
  0x3b   : > { %1991 = vsyncadd (%p3126_p4), [#allocation5], 4294967280 }
  0x3c   : > { %1993 = dma.done.wait (%p3127_p9), [#allocation7], 16   ;;  %p3128_p5 = pmov %p3125_p3 }
  0x3e   : > { %1995 = vsyncadd (%p3128_p5), [#allocation7], 4294967280 }
  0x3f   : > { %172 = sfence }
  0x40   : > { %p191_p6 = scmp.lt.s32.totalorder %s2066_s16, 1  ;;  %vm196_vm0 = vcmask 146432   ;;  %vm199_vm1 = vcmask 140288   ;;  %v2018_v0 = vmov 0.0   ;;  %s3129_s0 = sld [smem:[#allocation23_spill]]  ;;  %vm217_vm2 = vcmask 138248  }
  0x41   : > { %197 = vst.msk [vmem:[#allocation2] sm:$0xff] %vm196_vm0, %v2018_v0  ;;  %198 = vst.msk [vmem:[#allocation2 + $0x8] sm:$0xff] %vm196_vm0, %v2018_v0  ;;  %s2019_s20 = smov 1   ;;  %s1758_s24 = sld [smem:[#allocation3 + $0x1]]  ;;  %vm376_vm3 = vcmask 1046528   ;;  %vm554_vm4 = vcmask 1045504  }
  0x42   : > { %201 = vst.msk [vmem:[#allocation2 + $0x18] sm:$0xff] %vm196_vm0, %v2018_v0  ;;  %202 = vst.msk [vmem:[#allocation2 + $0x20] sm:$0xff] %vm196_vm0, %v2018_v0  ;;  %s192_s9 = scalar_select %p191_p6, %s2066_s16, 1  ;;  %vm1636_vm5 = vcmask 130048  }
  0x43   : > { %204 = vst.msk [vmem:[#allocation2 + $0x30] sm:$0xff] %vm196_vm0, %v2018_v0  ;;  %205 = vst.msk [vmem:[#allocation2 + $0x38] sm:$0xff] %vm196_vm0, %v2018_v0  ;;  %s1759_s25 = sld [smem:[#allocation3 + $0x1c]]  ;;  %s3113_s28 = smov 127  }
  0x44   : > { %200 = vst.msk [vmem:[#allocation2 + $0x10] sm:$0x3] %vm199_vm1, %v2018_v0  ;;  %203 = vst.msk [vmem:[#allocation2 + $0x28] sm:$0x3] %vm199_vm1, %v2018_v0  ;;  %s1840_s10 = smul.u32 48, %s192_s9  ;;  %s1760_s26 = sld [smem:[#allocation3 + $0x37]] }
  0x45   : > { %206 = vst.msk [vmem:[#allocation2 + $0x40] sm:$0x3] %vm199_vm1, %v2018_v0  ;;  %s1761_s27 = sld [smem:[#allocation3 + $0x2]]  ;;  %s2021_s5 = smov 126  }
  0x46   : > { %s195_s19 = scalar_lea.vmem %s3129_s0, %s1840_s10  ;;  %s1762_s29 = sld [smem:[#allocation3 + $0x1d]] }
  0x47   : > { %v207_v1 = vld [vmem:[%s195_s19] sm:$0xff]  ;;  %v1750_v2 = vld [vmem:[%s195_s19 + $0x10] sm:$0xff]  ;;  %v208_v3 = vld [vmem:[%s195_s19 + $0x8] sm:$0xff]  ;;  %v285_v11 = vstv %s1758_s24  ;;  %s1763_s30 = sld [smem:[#allocation3 + $0x38]]  ;;  %p3159_p12 = scmp.ne.s32.totalorder %s3118_s22, 0 }
  0x48   : > { %211 = vrot.lane.b32.xlu0 %v207_v1, %s2019_s20  ;;  %225 = vrot.lane.b32.xlu1 %v1750_v2, %s2019_s20  ;;  %v1751_v4 = vld [vmem:[%s195_s19 + $0x18] sm:$0xff]  ;;  %v1752_v5 = vld [vmem:[%s195_s19 + $0x20] sm:$0xff]  ;;  %s1785_s4 = sld [smem:[#allocation3 + $0xa]] }
  0x49   : > { %v1753_v6 = vld [vmem:[%s195_s19 + $0x28] sm:$0xff]  ;;  %v299_v16 = vstv %s1759_s25  ;;  %s1786_s6 = sld [smem:[#allocation3 + $0x25]] }
  0x4a   : > { %v313_v20 = vstv %s1760_s26  ;;  %s1787_s7 = sld [smem:[#allocation3 + $0x40]] }
  0x4b   : > { %v327_v23 = vstv %s1761_s27  ;;  %s1788_s8 = sld [smem:[#allocation3 + $0xb]] }
  0x4c   : > { %213 = vrot.lane.b32.xlu0 %v208_v3, %s2019_s20  ;;  %227 = vrot.lane.b32.xlu1 %v1751_v4, %s2019_s20  ;;  %v341_v26 = vstv %s1762_s29  ;;  %s1789_s9 = sld [smem:[#allocation3 + $0x26]] }
  0x4d   : > { %v355_v29 = vstv %s1763_s30  ;;  %s1767_s10 = sld [smem:[#allocation3 + $0x4]] }
  0x4e   : > { %v743_v31 = vstv %s1785_s4  ;;  %s2179_s11 = sld [smem:[#allocation3 + $0x41]] }
  0x4f   : > { %v757_v37 = vstv %s1786_s6  ;;  %s1768_s17 = sld [smem:[#allocation3 + $0x1f]] }
  0x50   : > { %239 = vrot.lane.b32.xlu0 %v1752_v5, %s2019_s20  ;;  %241 = vrot.lane.b32.xlu1 %v1753_v6, %s2019_s20  ;;  %v771_v40 = vstv %s1787_s7  ;;  %s1769_s19 = sld [smem:[#allocation3 + $0x3a]] }
  0x51   : > { %v785_v43 = vstv %s1788_s8  ;;  %s1770_s20 = sld [smem:[#allocation3 + $0x5]] }
  0x52   : > { %v799_v46 = vstv %s1789_s9  ;;  %s1771_s24 = sld [smem:[#allocation3 + $0x20]] }
  0x53   : > { %v421_v49 = vstv %s1767_s10  ;;  %s1772_s25 = sld [smem:[#allocation3 + $0x3b]] }
  0x54   : > { %v813_v50 = vstv %s2179_s11  ;;  %s1776_s26 = sld [smem:[#allocation3 + $0x7]] }
  0x55   : > { %v442_v56 = vstv %s1768_s17  ;;  %s1777_s27 = sld [smem:[#allocation3 + $0x22]] }
  0x56   : > { %v463_v62 = vstv %s1769_s19  ;;  %s1778_s29 = sld [smem:[#allocation3 + $0x3d]] }
  0x57   : > { %s1779_s30 = sld [smem:[#allocation3 + $0x8]] }
  0x58   : > { %s1780_s4 = sld [smem:[#allocation3 + $0x23]] }
  0x59   : > { %s1781_s6 = sld [smem:[#allocation3 + $0x3e]] }
  0x5a   : > { %s1794_s7 = sld [smem:[#allocation3 + $0xd]] }
  0x5b   : > { %s1795_s8 = sld [smem:[#allocation3 + $0x28]] }
  0x5c   : > { %s1796_s9 = sld [smem:[#allocation3 + $0x43]] }
  0x5d   : > { %s1797_s10 = sld [smem:[#allocation3 + $0xe]] }
  0x5e   : > { %s1798_s11 = sld [smem:[#allocation3 + $0x29]] }
  0x5f   : > { %s1799_s17 = sld [smem:[#allocation3 + $0x44]] }
  0x60   : > { %s1803_s19 = sld [smem:[#allocation3 + $0x10]] }
  0x61   : > { %s2423_s0 = sld [smem:[#allocation3 + $0xc]] }
  0x62   : > { %s2426_s1 = sld [smem:[#allocation3 + $0x27]] }
  0x63   : > { %s2436_s2 = sld [smem:[#allocation3 + $0x49]] }
  0xba   : > { %v212_v7 = vpop.permute.xlu0 %211  ;;  %v226_v8 = vpop.permute.xlu1 %225 }
  0xbb   : > { %218 = vst.msk [vmem:[#allocation2 + $0x1] sm:$0xff] %vm217_vm2, %v212_v7  ;;  %232 = vst.msk [vmem:[#allocation2 + $0x19] sm:$0xff] %vm217_vm2, %v226_v8  ;;  %v484_v7 = vstv %s1770_s20  ;;  %s1804_s20 = sld [smem:[#allocation3 + $0x2b]] }
  0xbe   : > { %v214_v9 = vpop.permute.xlu0 %213  ;;  %v228_v10 = vpop.permute.xlu1 %227 }
  0xbf   : > { %219 = vst.msk [vmem:[#allocation2 + $0x9] sm:$0xff] %vm217_vm2, %v214_v9  ;;  %233 = vst.msk [vmem:[#allocation2 + $0x21] sm:$0xff] %vm217_vm2, %v228_v10 }
  0xc2   : > { %v2137_v12 = vld [vmem:[#allocation2] sm:$0xff]  ;;  %v240_v13 = vpop.permute.xlu0 %239  ;;  %v242_v14 = vpop.permute.xlu1 %241  ;;  %v2161_v30 = vld [vmem:[#allocation2 + $0x18] sm:$0xff] }
  0xc3   : > { %v286_v15 = vmul.f32 %v285_v11, %v2137_v12  ;;  %246 = vst.msk [vmem:[#allocation2 + $0x31] sm:$0xff] %vm217_vm2, %v240_v13  ;;  %247 = vst.msk [vmem:[#allocation2 + $0x39] sm:$0xff] %vm217_vm2, %v242_v14  ;;  %v300_v18 = vmul.f32 %v299_v16, %v2137_v12  ;;  %v314_v21 = vmul.f32 %v313_v20, %v2137_v12 }
  0xc4   : > { %v328_v24 = vmul.f32 %v327_v23, %v2137_v12  ;;  %v342_v27 = vmul.f32 %v341_v26, %v2137_v12  ;;  %v356_v32 = vmul.f32 %v355_v29, %v2137_v12  ;;  %v744_v34 = vmul.f32 %v743_v31, %v2161_v30 }
  0xc5   : > { %290 = vrot.lane.b32.xlu0 %v286_v15, %s3113_s28  ;;  %v758_v38 = vmul.f32 %v757_v37, %v2161_v30  ;;  %v772_v41 = vmul.f32 %v771_v40, %v2161_v30  ;;  %v786_v44 = vmul.f32 %v785_v43, %v2161_v30  ;;  %v800_v47 = vmul.f32 %v799_v46, %v2161_v30 }
  0xc6   : > { %v2143_v17 = vld [vmem:[#allocation2 + $0x8] sm:$0xff]  ;;  %v2169_v36 = vld [vmem:[#allocation2 + $0x20] sm:$0xff]  ;;  %v2191_v52 = vld [vmem:[#allocation2 + $0x10] sm:$0x3]  ;;  %v422_v53 = vmul.f32 %v421_v49, %v2137_v12  ;;  %v814_v54 = vmul.f32 %v813_v50, %v2161_v30  ;;  %v443_v61 = vmul.f32 %v442_v56, %v2137_v12  ;;  %v464_v6 = vmul.f32 %v463_v62, %v2137_v12 }
  0xc7   : > { %v287_v19 = vmul.f32 %v285_v11, %v2143_v17  ;;  %v301_v22 = vmul.f32 %v299_v16, %v2143_v17  ;;  %v315_v25 = vmul.f32 %v313_v20, %v2143_v17  ;;  %v329_v28 = vmul.f32 %v327_v23, %v2143_v17 }
  0xc8   : > { %v343_v33 = vmul.f32 %v341_v26, %v2143_v17  ;;  %v357_v35 = vmul.f32 %v355_v29, %v2143_v17  ;;  %v745_v39 = vmul.f32 %v743_v31, %v2169_v36  ;;  %v759_v42 = vmul.f32 %v757_v37, %v2169_v36 }
  0xc9   : > { %304 = vrot.lane.b32.xlu0 %v300_v18, %s3113_s28  ;;  %292 = vrot.lane.b32.xlu1 %v287_v19, %s3113_s28  ;;  %v773_v45 = vmul.f32 %v771_v40, %v2169_v36  ;;  %v787_v48 = vmul.f32 %v785_v43, %v2169_v36  ;;  %v423_v51 = vmul.f32 %v421_v49, %v2143_v17  ;;  %v428_v60 = vrot.slane %v422_v53, 1 }
  0xca   : > { %v801_v55 = vmul.f32 %v799_v46, %v2169_v36  ;;  %v444_v58 = vmul.f32 %v442_v56, %v2143_v17  ;;  %v424_v59 = vmul.f32 %v421_v49, %v2191_v52  ;;  %v815_v63 = vmul.f32 %v813_v50, %v2169_v36 }
  0xcb   : > { %v429_v57 = vrot.slane %v423_v51, 1  ;;  %v465_v0 = vmul.f32 %v463_v62, %v2143_v17  ;;  %v445_v4 = vmul.f32 %v442_v56, %v2191_v52  ;;  %v449_v5 = vrot.slane %v443_v61, 1 }
  0xcc   : > { %v450_v2 = vrot.slane %v444_v58, 1  ;;  %v431_v3 = vrot.slane %v424_v59, 1  ;;  %v486_v8 = vmul.f32 %v484_v7, %v2143_v17  ;;  %v466_v9 = vmul.f32 %v463_v62, %v2191_v52 }
  0xcd   : > { %318 = vrot.lane.b32.xlu0 %v314_v21, %s3113_s28  ;;  %306 = vrot.lane.b32.xlu1 %v301_v22, %s3113_s28  ;;  %v430_v1 = vsel %vm376_vm3, %v428_v60, %v429_v57  ;;  %v471_v13 = vrot.slane %v465_v0, 1  ;;  %v452_v14 = vrot.slane %v445_v4, 1  ;;  %v485_v15 = vmul.f32 %v484_v7, %v2137_v12 }
  0xce   : > { %v451_v10 = vsel %vm376_vm3, %v449_v5, %v450_v2  ;;  %v432_v11 = vsel %vm376_vm3, %v429_v57, %v431_v3  ;;  %v470_v16 = vrot.slane %v464_v6, 1  ;;  %v492_v18 = vrot.slane %v486_v8, 1 }
  0xcf   : > { %v473_v19 = vrot.slane %v466_v9, 1  ;;  %v505_v20 = vstv %s1771_s24  ;;  %v453_v22 = vsel %vm376_vm3, %v450_v2, %v452_v14  ;;  %v526_v29 = vstv %s1772_s25  ;;  %s1805_s24 = sld [smem:[#allocation3 + $0x46]] }
  0xd0   : > { %v472_v21 = vsel %vm376_vm3, %v470_v16, %v471_v13  ;;  %v507_v23 = vmul.f32 %v505_v20, %v2143_v17  ;;  %v506_v26 = vmul.f32 %v505_v20, %v2137_v12  ;;  %v527_v37 = vmul.f32 %v526_v29, %v2137_v12  ;;  %s1806_s25 = sld [smem:[#allocation3 + $0x11]] }
  0xd1   : > { %332 = vrot.lane.b32.xlu0 %v328_v24, %s2021_s5  ;;  %320 = vrot.lane.b32.xlu1 %v315_v25, %s3113_s28  ;;  %v487_v24 = vmul.f32 %v484_v7, %v2191_v52  ;;  %v491_v25 = vrot.slane %v485_v15, 1  ;;  %v529_v40 = vmul.f32 %v526_v29, %v2191_v52  ;;  %v620_v49 = vstv %s1777_s27  ;;  %s2333_s27 = sld [smem:[#allocation3 + $0x47]] }
  0xd2   : > { %v513_v31 = vrot.slane %v507_v23, 1  ;;  %v533_v46 = vrot.slane %v527_v37, 1  ;;  %v622_v53 = vmul.f32 %v620_v49, %v2143_v17  ;;  %v621_v56 = vmul.f32 %v620_v49, %v2137_v12 }
  0xd3   : > { %v641_v59 = vstv %s1778_s29  ;;  %v662_v2 = vstv %s1779_s30  ;;  %v683_v14 = vstv %s1780_s4  ;;  %v899_v37 = vstv %s1795_s8  ;;  %s2341_s29 = sld [smem:[#allocation6]] }
  0xd4   : > { %v628_v60 = vrot.slane %v622_v53, 2  ;;  %v643_v62 = vmul.f32 %v641_v59, %v2143_v17  ;;  %v627_v0 = vrot.slane %v621_v56, 2  ;;  %v664_v3 = vmul.f32 %v662_v2, %v2143_v17  ;;  %s2346_s30 = sld [smem:[#allocation3]] }
  0xd5   : > { %346 = vrot.lane.b32.xlu0 %v342_v27, %s2021_s5  ;;  %334 = vrot.lane.b32.xlu1 %v329_v28, %s2021_s5  ;;  %v493_v27 = vsel %vm376_vm3, %v491_v25, %v492_v18  ;;  %v474_v28 = vsel %vm376_vm3, %v471_v13, %v473_v19  ;;  %v644_v4 = vmul.f32 %v641_v59, %v2191_v52  ;;  %v878_v25 = vstv %s1794_s7  ;;  %s2350_s4 = sld [smem:[#allocation3 + $0x1b]] }
  0xd6   : > { %v629_v5 = vsel %vm554_vm4, %v627_v0, %v628_v60  ;;  %v649_v7 = vrot.slane %v643_v62, 2  ;;  %v663_v9 = vmul.f32 %v662_v2, %v2137_v12  ;;  %v665_v19 = vmul.f32 %v662_v2, %v2191_v52  ;;  %s2361_s7 = sld [smem:[#allocation3 + $0x36]] }
  0xd7   : > { %v651_v13 = vrot.slane %v644_v4, 2  ;;  %s2365_s8 = sld [smem:[#allocation6 + $0x2]] }
  0xd9   : > { %360 = vrot.lane.b32.xlu0 %v356_v32, %s2021_s5  ;;  %348 = vrot.lane.b32.xlu1 %v343_v33, %s2021_s5  ;;  %v494_v32 = vrot.slane %v487_v24, 1  ;;  %v528_v33 = vmul.f32 %v526_v29, %v2143_v17  ;;  %v652_v23 = vsel %vm554_vm4, %v649_v7, %v651_v13  ;;  %v704_v24 = vstv %s1781_s6  ;;  %s2352_s6 = sld [smem:[#allocation6 + $0x1]] }
  0xda   : > { %v686_v29 = vmul.f32 %v683_v14, %v2191_v52 }
  0xdb   : > { %v534_v43 = vrot.slane %v528_v33, 1  ;;  %v879_v33 = vmul.f32 %v878_v25, %v2161_v30 }
  0xdd   : > { %748 = vrot.lane.b32.xlu0 %v744_v34, %s3113_s28  ;;  %362 = vrot.lane.b32.xlu1 %v357_v35, %s2021_s5  ;;  %v508_v34 = vmul.f32 %v505_v20, %v2191_v52  ;;  %v512_v35 = vrot.slane %v506_v26, 1  ;;  %v535_v50 = vsel %vm376_vm3, %v533_v46, %v534_v43  ;;  %v669_v20 = vrot.slane %v663_v9, 2 }
  0xe1   : > { %762 = vrot.lane.b32.xlu0 %v758_v38, %s3113_s28  ;;  %750 = vrot.lane.b32.xlu1 %v745_v39, %s3113_s28  ;;  %v599_v38 = vstv %s1776_s26  ;;  %s1807_s26 = sld [smem:[#allocation3 + $0x2c]] }
  0xe2   : > { %v601_v39 = vmul.f32 %v599_v38, %v2143_v17 }
  0xe5   : > { %776 = vrot.lane.b32.xlu0 %v772_v41, %s3113_s28  ;;  %764 = vrot.lane.b32.xlu1 %v759_v42, %s3113_s28  ;;  %v514_v41 = vsel %vm376_vm3, %v512_v35, %v513_v31  ;;  %v495_v42 = vsel %vm376_vm3, %v492_v18, %v494_v32  ;;  %v685_v18 = vmul.f32 %v683_v14, %v2143_v17 }
  0xe6   : > { %v705_v32 = vmul.f32 %v704_v24, %v2137_v12  ;;  %v707_v35 = vmul.f32 %v704_v24, %v2191_v52 }
  0xe7   : > { %v691_v26 = vrot.slane %v685_v18, 2  ;;  %v983_v18 = vstv %s1799_s17  ;;  %s2387_s17 = sld [smem:[#allocation3 + $0x6]] }
  0xe9   : > { %790 = vrot.lane.b32.xlu0 %v786_v44, %s2021_s5  ;;  %778 = vrot.lane.b32.xlu1 %v773_v45, %s3113_s28  ;;  %v515_v44 = vrot.slane %v508_v34, 1  ;;  %v600_v45 = vmul.f32 %v599_v38, %v2137_v12  ;;  %v880_v34 = vmul.f32 %v878_v25, %v2169_v36 }
  0xeb   : > { %v516_v51 = vsel %vm376_vm3, %v513_v31, %v515_v44  ;;  %v920_v44 = vstv %s1796_s9  ;;  %v886_v46 = vrot.slane %v880_v34, 1  ;;  %s2370_s9 = sld [smem:[#allocation3 + $0x3]] }
  0xed   : > { %804 = vrot.lane.b32.xlu0 %v800_v47, %s2021_s5  ;;  %792 = vrot.lane.b32.xlu1 %v787_v48, %s2021_s5  ;;  %v607_v47 = vrot.slane %v601_v39, 2  ;;  %v536_v48 = vrot.slane %v529_v40, 1 }
  0xef   : > { %v537_v58 = vsel %vm376_vm3, %v534_v43, %v536_v48  ;;  %v711_v43 = vrot.slane %v705_v32, 2  ;;  %v900_v48 = vmul.f32 %v899_v37, %v2161_v30 }
  0xf1   : > { %818 = vrot.lane.b32.xlu0 %v814_v54, %s2021_s5  ;;  %806 = vrot.lane.b32.xlu1 %v801_v55, %s2021_s5  ;;  %v602_v54 = vmul.f32 %v599_v38, %v2191_v52  ;;  %v606_v55 = vrot.slane %v600_v45, 2  ;;  %v885_v45 = vrot.slane %v879_v33, 1 }
  0xf3   : > { %v608_v57 = vsel %vm554_vm4, %v606_v55, %v607_v47  ;;  %v609_v61 = vrot.slane %v602_v54, 2  ;;  %v941_v54 = vstv %s1797_s10  ;;  %v887_v55 = vsel %vm376_vm3, %v885_v45, %v886_v46  ;;  %s2378_s10 = sld [smem:[#allocation3 + $0x1e]] }
  0xf5   : > { %433 = vrot.lane.b32.xlu0 %v430_v1, %s3113_s28  ;;  %820 = vrot.lane.b32.xlu1 %v815_v63, %s2021_s5  ;;  %v623_v63 = vmul.f32 %v620_v49, %v2191_v52  ;;  %v642_v1 = vmul.f32 %v641_v59, %v2137_v12  ;;  %v610_v6 = vsel %vm554_vm4, %v607_v47, %v609_v61  ;;  %v714_v47 = vrot.slane %v707_v35, 2 }
  0xf6   : > { %v922_v61 = vmul.f32 %v920_v44, %v2169_v36 }
  0xf7   : > { %v630_v8 = vrot.slane %v623_v63, 2  ;;  %v942_v63 = vmul.f32 %v941_v54, %v2161_v30 }
  0xf9   : > { %454 = vrot.lane.b32.xlu0 %v451_v10, %s3113_s28  ;;  %435 = vrot.lane.b32.xlu1 %v432_v11, %s3113_s28  ;;  %v648_v10 = vrot.slane %v642_v1, 2  ;;  %v670_v11 = vrot.slane %v664_v3, 2  ;;  %v631_v16 = vsel %vm554_vm4, %v628_v60, %v630_v8  ;;  %v943_v1 = vmul.f32 %v941_v54, %v2169_v36 }
  0xfa   : > { %v962_v3 = vstv %s1798_s11  ;;  %v948_v8 = vrot.slane %v942_v63, 1  ;;  %s2383_s11 = sld [smem:[#allocation3 + $0x39]] }
  0xfb   : > { %v650_v15 = vsel %vm554_vm4, %v648_v10, %v649_v7  ;;  %v949_v9 = vrot.slane %v943_v1, 1  ;;  %v963_v10 = vmul.f32 %v962_v3, %v2161_v30 }
  0xfd   : > { %475 = vrot.lane.b32.xlu0 %v472_v21, %s3113_s28  ;;  %456 = vrot.lane.b32.xlu1 %v453_v22, %s3113_s28  ;;  %v684_v21 = vmul.f32 %v683_v14, %v2137_v12  ;;  %v671_v22 = vsel %vm554_vm4, %v669_v20, %v670_v11  ;;  %v950_v20 = vsel %vm376_vm3, %v948_v8, %v949_v9 }
  0xff   : > { %v690_v31 = vrot.slane %v684_v21, 2  ;;  %v969_v21 = vrot.slane %v963_v10, 1 }
 0x101   : > { %496 = vrot.lane.b32.xlu0 %v493_v27, %s2021_s5  ;;  %477 = vrot.lane.b32.xlu1 %v474_v28, %s3113_s28  ;;  %v672_v27 = vrot.slane %v665_v19, 2  ;;  %v706_v28 = vmul.f32 %v704_v24, %v2143_v17  ;;  %v692_v38 = vsel %vm554_vm4, %v690_v31, %v691_v26  ;;  %v1055_v19 = vstv %s1803_s19  ;;  %s2389_s19 = sld [smem:[#allocation3 + $0x21]] }
 0x102   : > { %v1056_v32 = vmul.f32 %v1055_v19, %v2161_v30  ;;  %v1057_v33 = vmul.f32 %v1055_v19, %v2169_v36 }
 0x103   : > { %v673_v39 = vsel %vm554_vm4, %v670_v11, %v672_v27  ;;  %v712_v40 = vrot.slane %v706_v28, 2  ;;  %v964_v11 = vmul.f32 %v962_v3, %v2169_v36  ;;  %v1076_v28 = vstv %s1804_s20  ;;  %s2397_s20 = sld [smem:[#allocation3 + $0x3c]] }
 0x104   : > { %v1078_v45 = vmul.f32 %v1076_v28, %v2169_v36 }
 0x105   : > { %517 = vrot.lane.b32.xlu0 %v514_v41, %s2021_s5  ;;  %498 = vrot.lane.b32.xlu1 %v495_v42, %s2021_s5  ;;  %v693_v41 = vrot.slane %v686_v29, 2  ;;  %v2278_v42 = vld [vmem:[#allocation2 + $0x28] sm:$0x3]  ;;  %v713_v49 = vsel %vm554_vm4, %v711_v43, %v712_v40  ;;  %v715_v56 = vsel %vm554_vm4, %v712_v40, %v714_v47  ;;  %v1063_v43 = vrot.slane %v1057_v33, 2 }
 0x106   : > { %v881_v53 = vmul.f32 %v878_v25, %v2278_v42  ;;  %v902_v62 = vmul.f32 %v899_v37, %v2278_v42  ;;  %v923_v2 = vmul.f32 %v920_v44, %v2278_v42  ;;  %v944_v13 = vmul.f32 %v941_v54, %v2278_v42 }
 0x107   : > { %v984_v25 = vmul.f32 %v983_v18, %v2161_v30  ;;  %v965_v27 = vmul.f32 %v962_v3, %v2278_v42 }
 0x108   : > { %v888_v60 = vrot.slane %v881_v53, 1  ;;  %v909_v7 = vrot.slane %v902_v62, 1  ;;  %v1139_v62 = vstv %s1807_s26  ;;  %s2408_s26 = sld [smem:[#allocation3 + $0x24]] }
 0x109   : > { %538 = vrot.lane.b32.xlu0 %v535_v50, %s2021_s5  ;;  %519 = vrot.lane.b32.xlu1 %v516_v51, %s2021_s5  ;;  %v694_v50 = vsel %vm554_vm4, %v691_v26, %v693_v41  ;;  %v901_v51 = vmul.f32 %v899_v37, %v2169_v36  ;;  %v985_v26 = vmul.f32 %v983_v18, %v2169_v36  ;;  %v990_v34 = vrot.slane %v984_v25, 1 }
 0x10a   : > { %v972_v37 = vrot.slane %v965_v27, 1  ;;  %v1062_v41 = vrot.slane %v1056_v32, 2  ;;  %v1142_v32 = vmul.f32 %v1139_v62, %v2278_v42 }
 0x10b   : > { %v907_v59 = vrot.slane %v901_v51, 1  ;;  %v991_v35 = vrot.slane %v985_v26, 1 }
 0x10c   : > { %v1064_v54 = vsel %vm554_vm4, %v1062_v41, %v1063_v43  ;;  %v258_v41 = vstv %s2341_s29  ;;  %s2443_s29 = sld [smem:[#allocation3 + $0x14]] }
 0x10d   : > { %611 = vrot.lane.b32.xlu0 %v608_v57, %s3113_s28  ;;  %540 = vrot.lane.b32.xlu1 %v537_v58, %s2021_s5  ;;  %v906_v57 = vrot.slane %v900_v48, 1  ;;  %v921_v58 = vmul.f32 %v920_v44, %v2161_v30  ;;  %v1077_v44 = vmul.f32 %v1076_v28, %v2161_v30 }
 0x10f   : > { %v927_v0 = vrot.slane %v921_v58, 1  ;;  %v908_v4 = vsel %vm376_vm3, %v906_v57, %v907_v59 }
 0x111   : > { %632 = vrot.lane.b32.xlu0 %v629_v5, %s3113_s28  ;;  %613 = vrot.lane.b32.xlu1 %v610_v6, %s3113_s28  ;;  %v889_v5 = vsel %vm376_vm3, %v886_v46, %v888_v60  ;;  %v928_v6 = vrot.slane %v922_v61, 1  ;;  %v992_v46 = vsel %vm376_vm3, %v990_v34, %v991_v35  ;;  %v1079_v61 = vmul.f32 %v1076_v28, %v2278_v42 }
 0x113   : > { %v929_v14 = vsel %vm376_vm3, %v927_v0, %v928_v6 }
 0x115   : > { %653 = vrot.lane.b32.xlu0 %v650_v15, %s3113_s28  ;;  %634 = vrot.lane.b32.xlu1 %v631_v16, %s3113_s28  ;;  %v910_v15 = vsel %vm376_vm3, %v907_v59, %v909_v7  ;;  %v930_v16 = vrot.slane %v923_v2, 1  ;;  %v1086_v7 = vrot.slane %v1079_v61, 2  ;;  %v2460_v61 = vstv %s2387_s17  ;;  %s2701_s17 = sld [smem:[#allocation3 + $0x4f]] }
 0x117   : > { %v931_v24 = vsel %vm376_vm3, %v928_v6, %v930_v16  ;;  %v1141_v16 = vmul.f32 %v1139_v62, %v2169_v36 }
 0x119   : > { %674 = vrot.lane.b32.xlu0 %v671_v22, %s2021_s5  ;;  %655 = vrot.lane.b32.xlu1 %v652_v23, %s3113_s28  ;;  %v970_v22 = vrot.slane %v964_v11, 1  ;;  %v951_v23 = vrot.slane %v944_v13, 1  ;;  %v1147_v26 = vrot.slane %v1141_v16, 2  ;;  %v2485_v16 = vstv %s2397_s20  ;;  %s2727_s20 = sld [smem:[#allocation3 + $0x35]] }
 0x11b   : > { %v971_v29 = vsel %vm376_vm3, %v969_v21, %v970_v22  ;;  %v952_v31 = vsel %vm376_vm3, %v949_v9, %v951_v23  ;;  %v973_v47 = vsel %vm376_vm3, %v970_v22, %v972_v37  ;;  %v1160_v9 = vstv %s2333_s27  ;;  %s2415_s27 = sld [smem:[#allocation3 + $0x3f]] }
 0x11c   : > { %v1161_v27 = vmul.f32 %v1160_v9, %v2161_v30 }
 0x11d   : > { %695 = vrot.lane.b32.xlu0 %v692_v38, %s2021_s5  ;;  %676 = vrot.lane.b32.xlu1 %v673_v39, %s2021_s5  ;;  %v986_v38 = vmul.f32 %v983_v18, %v2278_v42  ;;  %v1097_v39 = vstv %s1805_s24  ;;  %s2402_s24 = sld [smem:[#allocation3 + $0x13]] }
 0x11e   : > { %v1098_v57 = vmul.f32 %v1097_v39, %v2161_v30  ;;  %v1099_v60 = vmul.f32 %v1097_v39, %v2169_v36  ;;  %v1100_v8 = vmul.f32 %v1097_v39, %v2278_v42  ;;  %v1167_v34 = vrot.slane %v1161_v27, 2 }
 0x11f   : > { %v993_v48 = vrot.slane %v986_v38, 1  ;;  %v1149_v38 = vrot.slane %v1142_v32, 2  ;;  %v1163_v39 = vmul.f32 %v1160_v9, %v2278_v42 }
 0x120   : > { %v1104_v2 = vrot.slane %v1098_v57, 2  ;;  %v1105_v6 = vrot.slane %v1099_v60, 2  ;;  %v264_v57 = vstv %s2365_s8  ;;  %v2457_v60 = vstv %s2383_s11  ;;  %s2488_s8 = sld [smem:[#allocation3 + $0x31]] }
 0x121   : > { %716 = vrot.lane.b32.xlu0 %v713_v49, %s2021_s5  ;;  %697 = vrot.lane.b32.xlu1 %v694_v50, %s2021_s5  ;;  %v1058_v49 = vmul.f32 %v1055_v19, %v2278_v42  ;;  %v1118_v50 = vstv %s1806_s25  ;;  %v994_v58 = vsel %vm376_vm3, %v991_v35, %v993_v48  ;;  %s2406_s25 = sld [smem:[#allocation3 + $0x9]] }
 0x122   : > { %v1119_v3 = vmul.f32 %v1118_v50, %v2161_v30  ;;  %v1106_v18 = vsel %vm554_vm4, %v1104_v2, %v1105_v6  ;;  %v1121_v21 = vmul.f32 %v1118_v50, %v2278_v42  ;;  %s2695_s11 = sld [smem:[#allocation3 + $0x42]] }
 0x123   : > { %v1065_v59 = vrot.slane %v1058_v49, 2  ;;  %v2438_v49 = vld [vmem:[#allocation2 + $0x30] sm:$0xff] }
 0x124   : > { %v1125_v13 = vrot.slane %v1119_v3, 2 }
 0x125   : > { %890 = vrot.lane.b32.xlu0 %v887_v55, %s3113_s28  ;;  %718 = vrot.lane.b32.xlu1 %v715_v56, %s2021_s5  ;;  %v1083_v55 = vrot.slane %v1077_v44, 2  ;;  %v1084_v56 = vrot.slane %v1078_v45, 2  ;;  %v261_v44 = vstv %s2352_s6  ;;  %v273_v45 = vstv %s2350_s4  ;;  %s2454_s4 = sld [smem:[#allocation3 + $0x16]] }
 0x126   : > { %v274_v3 = vmul.f32 %v273_v45, %v2137_v12  ;;  %s2473_s6 = sld [smem:[#allocation3 + $0x4a]] }
 0x127   : > { %v1085_v1 = vsel %vm554_vm4, %v1083_v55, %v1084_v56  ;;  %v1087_v19 = vsel %vm554_vm4, %v1084_v56, %v1086_v7  ;;  %v1170_v55 = vrot.slane %v1163_v39, 2  ;;  %v1199_v56 = vstv %s2402_s24  ;;  %v2475_v7 = vld [vmem:[#allocation2 + $0x38] sm:$0xff]  ;;  %s2752_s24 = sld [smem:[#allocation3 + $0x50]] }
 0x129   : > { %911 = vrot.lane.b32.xlu0 %v908_v4, %s3113_s28  ;;  %892 = vrot.lane.b32.xlu1 %v889_v5, %s3113_s28  ;;  %v1120_v4 = vmul.f32 %v1118_v50, %v2169_v36  ;;  %v1066_v5 = vsel %vm554_vm4, %v1063_v43, %v1065_v59  ;;  %v267_v43 = vstv %s2346_s30  ;;  %s2448_s30 = sld [smem:[#allocation3 + $0x2f]]  ;;  %v2452_v59 = vstv %s2378_s10 }
 0x12a   : > { %v269_v2 = vmul.f32 %v267_v43, %v2143_v17  ;;  %s2681_s10 = sld [smem:[#allocation3 + $0x34]] }
 0x12c   : > { %v2509_v32 = vadd.f32 %v269_v2, %v258_v41 }
 0x12d   : > { %932 = vrot.lane.b32.xlu0 %v929_v14, %s3113_s28  ;;  %913 = vrot.lane.b32.xlu1 %v910_v15, %s3113_s28  ;;  %v1126_v14 = vrot.slane %v1120_v4, 2  ;;  %v1140_v15 = vmul.f32 %v1139_v62, %v2161_v30  ;;  %v2463_v62 = vstv %s2389_s19  ;;  %s2724_s19 = sld [smem:[#allocation3 + $0x1a]] }
 0x12f   : > { %v1146_v25 = vrot.slane %v1140_v15, 2  ;;  %v1255_v39 = vstv %s2448_s30  ;;  %s1819_s30 = sld [smem:[#allocation3 + $0x30]] }
 0x131   : > { %953 = vrot.lane.b32.xlu0 %v950_v20, %s2021_s5  ;;  %934 = vrot.lane.b32.xlu1 %v931_v24, %s3113_s28  ;;  %v1107_v20 = vrot.slane %v1100_v8, 2  ;;  %v1127_v24 = vsel %vm554_vm4, %v1125_v13, %v1126_v14  ;;  %v275_v8 = vmul.f32 %v273_v45, %v2143_v17 }
 0x133   : > { %v1108_v28 = vsel %vm554_vm4, %v1105_v6, %v1107_v20  ;;  %v1200_v6 = vmul.f32 %v1199_v56, %v2438_v49 }
 0x135   : > { %974 = vrot.lane.b32.xlu0 %v971_v29, %s2021_s5  ;;  %955 = vrot.lane.b32.xlu1 %v952_v31, %s2021_s5  ;;  %v1128_v29 = vrot.slane %v1121_v21, 2  ;;  %v1162_v31 = vmul.f32 %v1160_v9, %v2169_v36  ;;  %v1148_v36 = vsel %vm554_vm4, %v1146_v25, %v1147_v26  ;;  %v2493_v21 = vstv %s2423_s0  ;;  %s2542_s0 = sld [smem:[#allocation3 + $0x17]] }
 0x137   : > { %v2324_v40 = vpop.permute.xlu0 %290  ;;  %v1129_v35 = vsel %vm554_vm4, %v1126_v14, %v1128_v29  ;;  %v1168_v37 = vrot.slane %v1162_v31, 2  ;;  %v1227_v31 = vstv %s2436_s2  ;;  %s2600_s2 = sld [smem:[#allocation3 + $0x4d]] }
 0x138   : > { %v1228_v45 = vmul.f32 %v1227_v31, %v2438_v49 }
 0x139   : > { %995 = vrot.lane.b32.xlu0 %v992_v46, %s2021_s5  ;;  %976 = vrot.lane.b32.xlu1 %v973_v47, %s2021_s5  ;;  %v279_v46 = vstv %s2361_s7  ;;  %v1169_v50 = vsel %vm554_vm4, %v1167_v34, %v1168_v37  ;;  %v1171_v13 = vsel %vm554_vm4, %v1168_v37, %v1170_v55  ;;  %s3132_s7 = smov 127   ;;  %v2513_v34 = vadd.f32 %v275_v8, %v261_v44 }
 0x13a   : > { %v280_v9 = vmul.f32 %v279_v46, %v2137_v12  ;;  %v281_v15 = vmul.f32 %v279_v46, %v2143_v17  ;;  %v1229_v55 = vmul.f32 %v1227_v31, %v2475_v7  ;;  %v388_v8 = vmul.f32 %v2452_v59, %v2137_v12 }
 0x13b   : > { %v2335_v51 = vpop.permute.xlu1 %292  ;;  %v2337_v53 = vpop.permute.xlu0 %304  ;;  %v390_v31 = vmul.f32 %v2452_v59, %v2191_v52 }
 0x13c   : > { %v2517_v37 = vadd.f32 %v281_v15, %v264_v57 }
 0x13d   : > { %1067 = vrot.lane.b32.xlu0 %v1064_v54, %s3113_s28  ;;  %997 = vrot.lane.b32.xlu1 %v994_v58, %s2021_s5  ;;  %v1150_v54 = vsel %vm554_vm4, %v1147_v26, %v1149_v38  ;;  %v369_v58 = vstv %s2370_s9  ;;  %v1241_v38 = vstv %s2443_s29  ;;  %s2633_s9 = sld [smem:[#allocation3 + $0x19]] }
 0x13e   : > { %v371_v46 = vmul.f32 %v369_v58, %v2143_v17  ;;  %v1242_v2 = vmul.f32 %v1241_v38, %v2438_v49  ;;  %s2909_s29 = sld [smem:[#allocation3 + $0x12]] }
 0x13f   : > { %v2354_v63 = vpop.permute.xlu1 %306  ;;  %v2356_v0 = vpop.permute.xlu0 %318 }
 0x141   : > { %1088 = vrot.lane.b32.xlu0 %v1085_v1, %s3113_s28  ;;  %1069 = vrot.lane.b32.xlu1 %v1066_v5, %s3113_s28  ;;  %v268_v1 = vmul.f32 %v267_v43, %v2137_v12  ;;  %v370_v43 = vmul.f32 %v369_v58, %v2137_v12 }
 0x143   : > { %v2372_v10 = vpop.permute.xlu1 %320  ;;  %v2374_v11 = vpop.permute.xlu0 %332  ;;  %v2498_v25 = vadd.f32 %v268_v1, %v258_v41  ;;  %v389_v1 = vmul.f32 %v2452_v59, %v2143_v17 }
 0x145   : > { %1109 = vrot.lane.b32.xlu0 %v1106_v18, %s3113_s28  ;;  %1090 = vrot.lane.b32.xlu1 %v1087_v19, %s3113_s28  ;;  %v394_v18 = vrot.slane %v388_v8, 1  ;;  %v397_v8 = vrot.slane %v390_v31, 1 }
 0x147   : > { %v2391_v22 = vpop.permute.xlu1 %334  ;;  %v2393_v23 = vpop.permute.xlu0 %346 }
 0x149   : > { %1130 = vrot.lane.b32.xlu0 %v1127_v24, %s2021_s5  ;;  %1111 = vrot.lane.b32.xlu1 %v1108_v28, %s3113_s28  ;;  %s2419_s28 = sld [smem:[#allocation3 + $0x2e]]  ;;  %v2496_v24 = vstv %s2426_s1  ;;  %v1201_v28 = vmul.f32 %v1199_v56, %v2475_v7  ;;  %v1269_v56 = vstv %s2473_s6 }
 0x14a   : > { %s2572_s1 = sld [smem:[#allocation3 + $0x32]] }
 0x14b   : > { %v2410_v30 = vpop.permute.xlu1 %348  ;;  %v2412_v33 = vpop.permute.xlu0 %360  ;;  %s1820_s6 = sld [smem:[#allocation3 + $0x4b]] }
 0x14d   : > { %1151 = vrot.lane.b32.xlu0 %v1148_v36, %s2021_s5  ;;  %1132 = vrot.lane.b32.xlu1 %v1129_v35, %s2021_s5  ;;  %v2511_v36 = vadd.f32 %v274_v3, %v261_v44  ;;  %v2515_v35 = vadd.f32 %v280_v9, %v264_v57  ;;  %v1334_v44 = vstv %s2454_s4  ;;  %v372_v57 = vmul.f32 %v369_v58, %v2191_v52  ;;  %v2544_v9 = vld [vmem:[#allocation2 + $0x40] sm:$0x3]  ;;  %s2913_s4 = sld [smem:[#allocation3 + $0x2d]] }
 0x14e   : > { %v1243_v3 = vmul.f32 %v1241_v38, %v2475_v7  ;;  %v377_v58 = vrot.slane %v370_v43, 1  ;;  %v1336_v15 = vmul.f32 %v1334_v44, %v2475_v7  ;;  %v1355_v38 = vstv %s2488_s8  ;;  %s1827_s8 = sld [smem:[#allocation3 + $0x18]] }
 0x14f   : > { %v2432_v47 = vpop.permute.xlu1 %362  ;;  %v2434_v48 = vpop.permute.xlu0 %748  ;;  %v1213_v14 = vstv %s2419_s28  ;;  %s2507_s28 = sld [smem:[#allocation3 + $0x4c]]  ;;  %v2560_v43 = vmul.f32 %v1269_v56, %v2475_v7  ;;  %v1337_v59 = vmul.f32 %v1334_v44, %v2544_v9 }
 0x150   : > { %v1214_v29 = vmul.f32 %v1213_v14, %v2438_v49  ;;  %v1215_v41 = vmul.f32 %v1213_v14, %v2475_v7  ;;  %v1335_v14 = vmul.f32 %v1334_v44, %v2438_v49 }
 0x151   : > { %1172 = vrot.lane.b32.xlu0 %v1169_v50, %s2021_s5  ;;  %1153 = vrot.lane.b32.xlu1 %v1150_v54, %s2021_s5 }
 0x153   : > { %v2468_v4 = vpop.permute.xlu1 %750  ;;  %v2470_v5 = vpop.permute.xlu0 %762 }
 0x154   : > { %3130 = vst [vmem:[#allocation12_spill] sm:$0xff] %v2468_v4  ;;  %3131 = vst [vmem:[#allocation13_spill] sm:$0xff] %v2470_v5 }
 0x155   : > { %1174 = vrot.lane.b32.xlu1 %v1171_v13, %s2021_s5  ;;  %1204 = vrot.lane.b32.xlu0 %v1200_v6, %s3132_s7  ;;  %v1256_v6 = vmul.f32 %v1255_v39, %v2438_v49  ;;  %v1257_v13 = vmul.f32 %v1255_v39, %v2475_v7  ;;  %v1376_v39 = vstv %s2507_s28  ;;  %s1828_s28 = sld [smem:[#allocation3 + $0x33]] }
 0x156   : > { %v1377_v44 = vmul.f32 %v1376_v39, %v2438_v49  ;;  %v1378_v31 = vmul.f32 %v1376_v39, %v2475_v7 }
 0x157   : > { %v2500_v26 = vpop.permute.xlu1 %764  ;;  %v2502_v27 = vpop.permute.xlu0 %776 }
 0x158   : > { %3133 = vst [vmem:[#allocation14_spill] sm:$0xff] %v2500_v26  ;;  %3134 = vst [vmem:[#allocation15_spill] sm:$0xff] %v2502_v27  ;;  %v1341_v27 = vrot.slane %v1335_v14, 1 }
 0x159   : > { %1206 = vrot.lane.b32.xlu1 %v1201_v28, %s3132_s7  ;;  %1218 = vrot.lane.b32.xlu0 %v1214_v29, %s3132_s7  ;;  %v378_v28 = vrot.slane %v371_v46, 1  ;;  %v1270_v29 = vmul.f32 %v1269_v56, %v2438_v49  ;;  %v405_v46 = vmul.f32 %v2457_v60, %v2137_v12  ;;  %v1357_v56 = vmul.f32 %v1355_v38, %v2475_v7 }
 0x15a   : > { %v407_v12 = vmul.f32 %v2457_v60, %v2191_v52 }
 0x15b   : > { %v2528_v50 = vpop.permute.xlu1 %778  ;;  %v2530_v54 = vpop.permute.xlu0 %790  ;;  %v2583_v14 = vsel %vm376_vm3, %v377_v58, %v378_v28 }
 0x15c   : > { %3135 = vst [vmem:[#allocation16_spill] sm:$0xff] %v2528_v50  ;;  %3136 = vst [vmem:[#allocation17_spill] sm:$0xff] %v2530_v54  ;;  %v406_v50 = vmul.f32 %v2457_v60, %v2143_v17  ;;  %v1358_v17 = vmul.f32 %v1355_v38, %v2544_v9  ;;  %v325_v54 = vadd.f32 %v2372_v10, %v2517_v37 }
 0x15d   : > { %1220 = vrot.lane.b32.xlu1 %v1215_v41, %s3132_s7  ;;  %1232 = vrot.lane.b32.xlu0 %v1228_v45, %s3132_s7  ;;  %v380_v41 = vrot.slane %v372_v57, 1  ;;  %v395_v45 = vrot.slane %v389_v1, 1  ;;  %v1342_v57 = vrot.slane %v1336_v15, 1  ;;  %v1356_v1 = vmul.f32 %v1355_v38, %v2438_v49 }
 0x15e   : > { %v412_v60 = vrot.slane %v406_v50, 1  ;;  %v1379_v38 = vmul.f32 %v1376_v39, %v2544_v9  ;;  %v1365_v5 = vrot.slane %v1358_v17, 1  ;;  %v1383_v50 = vrot.slane %v1377_v44, 1  ;;  %v2615_v44 = vld [vmem:[#allocation2] sm:$0xff] }
 0x15f   : > { %v2555_v20 = vpop.permute.xlu1 %792  ;;  %v2557_v19 = vpop.permute.xlu0 %804  ;;  %v2586_v15 = vsel %vm376_vm3, %v378_v28, %v380_v41  ;;  %v2589_v26 = vsel %vm376_vm3, %v394_v18, %v395_v45  ;;  %v1343_v58 = vsel %vm376_vm3, %v1341_v27, %v1342_v57  ;;  %v1363_v28 = vrot.slane %v1357_v56, 1 }
 0x160   : > { %3137 = vst [vmem:[#allocation18_spill] sm:$0xff] %v2555_v20  ;;  %3138 = vst [vmem:[#allocation19_spill] sm:$0xff] %v2557_v19  ;;  %v1344_v19 = vrot.slane %v1337_v59, 1  ;;  %v1397_v20 = vstv %s2542_s0  ;;  %v2598_v41 = vsel %vm376_vm3, %v395_v45, %v397_v8  ;;  %v414_v18 = vrot.slane %v407_v12, 1  ;;  %s1829_s0 = sld [smem:[#allocation3 + $0x4e]] }
 0x161   : > { %1234 = vrot.lane.b32.xlu1 %v1229_v55, %s3132_s7  ;;  %1246 = vrot.lane.b32.xlu0 %v1242_v2, %s2021_s5  ;;  %v1399_v27 = vmul.f32 %v1397_v20, %v2475_v7  ;;  %v324_v45 = vadd.f32 %v2356_v0, %v2515_v35  ;;  %v1386_v8 = vrot.slane %v1379_v38, 1  ;;  %v1418_v17 = vstv %s2572_s1  ;;  %s188_s1 = sand.u32 1, %s2006_s13  }
 0x162   : > { %v1345_v56 = vsel %vm376_vm3, %v1342_v57, %v1344_v19  ;;  %v296_v19 = vadd.f32 %v2324_v40, %v2498_v25  ;;  %v297_v25 = vadd.f32 %v2335_v51, %v2509_v32  ;;  %v310_v37 = vadd.f32 %v2337_v53, %v2511_v36 }
 0x163   : > { %v2578_v55 = vpop.permute.xlu1 %806  ;;  %v2580_v2 = vpop.permute.xlu0 %818  ;;  %v366_v35 = vadd.f32 %v2412_v33, %v324_v45 }
 0x164   : > { %3139 = vst [vmem:[#allocation20_spill] sm:$0xff] %v2578_v55  ;;  %3140 = vst [vmem:[#allocation21_spill] sm:$0xff] %v2580_v2  ;;  %v411_v2 = vrot.slane %v405_v46, 1  ;;  %v1362_v55 = vrot.slane %v1356_v1, 1  ;;  %v1400_v46 = vmul.f32 %v1397_v20, %v2544_v9  ;;  %v338_v40 = vadd.f32 %v2374_v11, %v296_v19 }
 0x165   : > { %1248 = vrot.lane.b32.xlu1 %v1243_v3, %s2021_s5  ;;  %1260 = vrot.lane.b32.xlu0 %v1256_v6, %s2021_s5  ;;  %v1384_v3 = vrot.slane %v1378_v31, 1  ;;  %v1398_v6 = vmul.f32 %v1397_v20, %v2438_v49  ;;  %v2619_v20 = vmul.f32 %v2615_v44, %v2460_v61  ;;  %v2621_v31 = vld [vmem:[#allocation2 + $0x8] sm:$0xff]  ;;  %v339_v51 = vadd.f32 %v2391_v22, %v297_v25 }
 0x166   : > { %v413_v1 = vsel %vm376_vm3, %v411_v2, %v412_v60  ;;  %v1364_v12 = vsel %vm376_vm3, %v1362_v55, %v1363_v28  ;;  %v2625_v0 = vmul.f32 %v2621_v31, %v2460_v61  ;;  %v1407_v4 = vrot.slane %v1400_v46, 1 }
 0x167   : > { %v2602_v39 = vpop.permute.xlu1 %820  ;;  %v434_v59 = vpop.permute.xlu0 %433  ;;  %v1385_v2 = vsel %vm376_vm3, %v1383_v50, %v1384_v3  ;;  %v1404_v38 = vrot.slane %v1398_v6, 1  ;;  %v2639_v33 = vsel %vm376_vm3, %v1384_v3, %v1386_v8  ;;  %v555_v10 = vrot.slane %v2619_v20, 2 }
 0x168   : > { %3141 = vst [vmem:[#allocation22_spill] sm:$0xff] %v2602_v39  ;;  %v1405_v39 = vrot.slane %v1399_v27, 1  ;;  %v556_v11 = vrot.slane %v2625_v0, 2  ;;  %v1439_v50 = vstv %s2600_s2  ;;  %v1421_v6 = vmul.f32 %v1418_v17, %v2544_v9  ;;  %s1839_s2 = smul.u32 48, %s188_s1 }
 0x169   : > { %1262 = vrot.lane.b32.xlu1 %v1257_v13, %s2021_s5  ;;  %1274 = vrot.lane.b32.xlu0 %v1270_v29, %s2021_s5  ;;  %v415_v13 = vsel %vm376_vm3, %v412_v60, %v414_v18  ;;  %v1366_v29 = vsel %vm376_vm3, %v1363_v28, %v1365_v5  ;;  %v1419_v5 = vmul.f32 %v1418_v17, %v2438_v49 }
 0x16a   : > { %v2648_v60 = vmul.f32 %v1418_v17, %v2475_v7  ;;  %v367_v28 = vadd.f32 %v2432_v47, %v325_v54  ;;  %v418_v18 = vadd.f32 %v413_v1, %v366_v35  ;;  %v2659_v3 = vsel %vm376_vm3, %v1405_v39, %v1407_v4 }
 0x16b   : > { %v436_v57 = vpop.permute.xlu1 %435  ;;  %v455_v55 = vpop.permute.xlu0 %454  ;;  %v352_v27 = vadd.f32 %v2393_v23, %v310_v37  ;;  %v384_v46 = vadd.f32 %v2583_v14, %v338_v40  ;;  %v1425_v47 = vrot.slane %v1419_v5, 1  ;;  %v1440_v36 = vmul.f32 %v1439_v50, %v2438_v49 }
 0x16c   : > { %v1426_v22 = vrot.slane %v2648_v60, 1  ;;  %v2671_v4 = vmul.f32 %v1439_v50, %v2475_v7  ;;  %v550_v23 = vmul.f32 %v2460_v61, %v2191_v52  ;;  %v311_v54 = vadd.f32 %v2354_v63, %v2513_v34  ;;  %v1910_v60 = vld [vmem:[#allocation2 + $0x10] sm:$0x3] }
 0x16d   : > { %1276 = vrot.lane.b32.xlu1 %v2560_v43, %s2021_s5  ;;  %1346 = vrot.lane.b32.xlu0 %v1343_v58, %s3132_s7  ;;  %v1406_v58 = vsel %vm376_vm3, %v1404_v38, %v1405_v39  ;;  %v439_v14 = vadd.f32 %v434_v59, %v384_v46  ;;  %v419_v39 = vadd.f32 %v415_v13, %v367_v28  ;;  %v1511_v52 = vstv %s2633_s9  ;;  %s190_s9 = scalar_lea.vmem [#allocation8], %s1839_s2 }
 0x16e   : > { %v2679_v45 = vmul.f32 %v2621_v31, %v2463_v62  ;;  %v385_v1 = vadd.f32 %v2586_v15, %v339_v51  ;;  %v566_v17 = vmul.f32 %v2615_v44, %v2463_v62  ;;  %v353_v61 = vadd.f32 %v2410_v30, %v311_v54 }
 0x16f   : > { %v457_v32 = vpop.permute.xlu1 %456  ;;  %v476_v43 = vpop.permute.xlu0 %475  ;;  %v401_v63 = vadd.f32 %v2589_v26, %v352_v27  ;;  %v1446_v20 = vrot.slane %v1440_v36, 1  ;;  %v1447_v15 = vrot.slane %v2671_v4, 1  ;;  %v558_v19 = vrot.slane %v550_v23, 2 }
 0x170   : > { %v2664_v53 = vadd.f32 %v476_v43, %v418_v18  ;;  %v1442_v35 = vmul.f32 %v1439_v50, %v2544_v9  ;;  %v440_v13 = vadd.f32 %v436_v57, %v385_v1  ;;  %v557_v30 = vsel %vm554_vm4, %v555_v10, %v556_v11 }
 0x171   : > { %1348 = vrot.lane.b32.xlu1 %v1345_v56, %s3132_s7  ;;  %1367 = vrot.lane.b32.xlu0 %v1364_v12, %s3132_s7  ;;  %v1428_v12 = vrot.slane %v1421_v6, 1  ;;  %v460_v38 = vadd.f32 %v455_v55, %v401_v63  ;;  %v573_v26 = vrot.slane %v2679_v45, 2  ;;  %v1427_v40 = vsel %vm376_vm3, %v1425_v47, %v1426_v22  ;;  %v2745_v63 = vld [vmem:[#allocation2 + $0x18] sm:$0xff] }
 0x172   : > { %v572_v5 = vrot.slane %v566_v17, 2  ;;  %v1512_v25 = vmul.f32 %v1511_v52, %v2438_v49  ;;  %v568_v57 = vmul.f32 %v1910_v60, %v2463_v62  ;;  %v402_v55 = vadd.f32 %v2598_v41, %v353_v61 }
 0x173   : > { %v478_v56 = vpop.permute.xlu1 %477  ;;  %v497_v8 = vpop.permute.xlu0 %496  ;;  %v1513_v10 = vmul.f32 %v1511_v52, %v2475_v7  ;;  %v1429_v18 = vsel %vm376_vm3, %v1426_v22, %v1428_v12  ;;  %v1448_v50 = vsel %vm376_vm3, %v1446_v20, %v1447_v15  ;;  %v559_v51 = vsel %vm554_vm4, %v556_v11, %v558_v19 }
 0x174   : > { %v2689_v34 = vadd.f32 %v478_v56, %v419_v39  ;;  %v502_v59 = vadd.f32 %v497_v8, %v439_v14  ;;  %v1449_v62 = vrot.slane %v1442_v35, 1  ;;  %v461_v43 = vadd.f32 %v457_v32, %v402_v55 }
 0x175   : > { %1369 = vrot.lane.b32.xlu1 %v1366_v29, %s3132_s7  ;;  %1388 = vrot.lane.b32.xlu0 %v1385_v2, %s3132_s7  ;;  %v574_v41 = vsel %vm554_vm4, %v572_v5, %v573_v26  ;;  %v584_v6 = vmul.f32 %v2621_v31, %v2485_v16  ;;  %v1532_v27 = vstv %s2681_s10  ;;  %v583_v47 = vmul.f32 %v2615_v44, %v2485_v16  ;;  %s1657_s10 = sshll.u32 %s190_s9, 4  ;;  %s3056_s10 = int_to_ptr.vmem [resolvable:$true] %s1657_s10 }
 0x176   : > { %v1514_v22 = vmul.f32 %v1511_v52, %v2544_v9  ;;  %v585_v0 = vmul.f32 %v1910_v60, %v2485_v16  ;;  %v1518_v36 = vrot.slane %v1512_v25, 2  ;;  %v1519_v31 = vrot.slane %v1513_v10, 2  ;;  %v2761_v25 = vld [vmem:[#allocation2 + $0x20] sm:$0xff] }
 0x177   : > { %v499_v29 = vpop.permute.xlu1 %498  ;;  %v518_v2 = vpop.permute.xlu0 %517  ;;  %v1533_v44 = vmul.f32 %v1532_v27, %v2438_v49  ;;  %v1534_v4 = vmul.f32 %v1532_v27, %v2475_v7  ;;  %v1535_v16 = vmul.f32 %v1532_v27, %v2544_v9  ;;  %v2736_v23 = vstv %s2695_s11  ;;  %s1841_s11 = smul.u32 768, %s2066_s16  ;;  %s3066_s16 = scalar_lea.sflag [#allocation4], %s188_s1 }
 0x178   : > { %v503_v37 = vadd.f32 %v499_v29, %v440_v13  ;;  %v523_v28 = vadd.f32 %v518_v2, %v460_v38  ;;  %v562_v54 = vadd.f32 %v557_v30, %v502_v59  ;;  %v590_v14 = vrot.slane %v584_v6, 2 }
 0x179   : > { %1390 = vrot.lane.b32.xlu1 %v2639_v33, %s3132_s7  ;;  %1409 = vrot.lane.b32.xlu0 %v1406_v58, %s2021_s5  ;;  %v575_v58 = vrot.slane %v568_v57, 2  ;;  %v1553_v39 = vstv %s2701_s17  ;;  %v589_v56 = vrot.slane %v583_v47, 2  ;;  %v1521_v8 = vrot.slane %v1514_v22, 2 }
 0x17a   : > { %v592_v12 = vrot.slane %v585_v0, 2  ;;  %v1520_v61 = vsel %vm554_vm4, %v1518_v36, %v1519_v31  ;;  %v3142_v59 = vstv %s2406_s25  ;;  %v1542_v19 = vrot.slane %v1535_v16, 2  ;;  %s1800_s25 = sld [smem:[#allocation3 + $0xf]] }
 0x17b   : > { %v520_v46 = vpop.permute.xlu1 %519  ;;  %v539_v33 = vpop.permute.xlu0 %538  ;;  %v2750_v20 = vmul.f32 %v2745_v63, %v3142_v59  ;;  %v1554_v35 = vmul.f32 %v1553_v39, %v2438_v49  ;;  %v563_v13 = vadd.f32 %v559_v51, %v503_v37  ;;  %v579_v38 = vadd.f32 %v574_v41, %v523_v28 }
 0x17c   : > { %v524_v11 = vadd.f32 %v520_v46, %v461_v43  ;;  %v544_v32 = vadd.f32 %v539_v33, %v2664_v53  ;;  %v1450_v53 = vsel %vm376_vm3, %v1447_v15, %v1449_v62  ;;  %v1539_v15 = vrot.slane %v1533_v44, 2 }
 0x17d   : > { %1411 = vrot.lane.b32.xlu1 %v2659_v3, %s2021_s5  ;;  %1430 = vrot.lane.b32.xlu0 %v1427_v40, %s2021_s5  ;;  %v576_v3 = vsel %vm554_vm4, %v573_v26, %v575_v58  ;;  %v591_v30 = vsel %vm554_vm4, %v589_v56, %v590_v14  ;;  %v1555_v26 = vmul.f32 %v1553_v39, %v2475_v7  ;;  %v1574_v55 = vstv %s2724_s19 }
 0x17e   : > { %v1522_v40 = vsel %vm554_vm4, %v1519_v31, %v1521_v8  ;;  %v593_v5 = vsel %vm554_vm4, %v590_v14, %v592_v12  ;;  %v3143_v60 = vmov %v3142_v59  ;;  %v3144_v28 = vstv %s2408_s26  ;;  %s1801_s26 = sld [smem:[#allocation3 + $0x2a]] }
 0x17f   : > { %v541_v45 = vpop.permute.xlu1 %540  ;;  %v612_v1 = vpop.permute.xlu0 %611  ;;  %v2766_v57 = vmul.f32 %v2761_v25, %v3143_v60  ;;  %v1560_v43 = vrot.slane %v1554_v35, 2  ;;  %v1556_v41 = vmul.f32 %v1553_v39, %v2544_v9  ;;  %v580_v6 = vadd.f32 %v576_v3, %v524_v11 }
 0x180   : > { %v545_v17 = vadd.f32 %v541_v45, %v2689_v34  ;;  %v2742_v52 = vadd.f32 %v612_v1, %v562_v54  ;;  %v1540_v34 = vrot.slane %v1534_v4, 2  ;;  %v596_v27 = vadd.f32 %v591_v30, %v544_v32 }
 0x181   : > { %1432 = vrot.lane.b32.xlu1 %v1429_v18, %s2021_s5  ;;  %1451 = vrot.lane.b32.xlu0 %v1448_v50, %s2021_s5  ;;  %v2772_v18 = vmul.f32 %v2745_v63, %v3144_v28  ;;  %v1595_v50 = vstv %s2727_s20  ;;  %v1561_v46 = vrot.slane %v1555_v26, 2  ;;  %v1575_v33 = vmul.f32 %v1574_v55, %v2438_v49  ;;  %s3061_s20 = scalar_lea.hbm %s3109_s3, %s1841_s11 }
 0x182   : > { %v1541_v51 = vsel %vm554_vm4, %v1539_v15, %v1540_v34  ;;  %v1543_v62 = vsel %vm554_vm4, %v1540_v34, %v1542_v19  ;;  %v1576_v22 = vmul.f32 %v1574_v55, %v2475_v7  ;;  %v3145_v0 = vmov %v3144_v28 }
 0x183   : > { %v614_v29 = vpop.permute.xlu1 %613  ;;  %v633_v2 = vpop.permute.xlu0 %632  ;;  %v2785_v36 = vmul.f32 %v2761_v25, %v3145_v0  ;;  %v1577_v31 = vmul.f32 %v1574_v55, %v2544_v9  ;;  %v1596_v44 = vmul.f32 %v1595_v50, %v2438_v49  ;;  %v1597_v32 = vmul.f32 %v1595_v50, %v2475_v7 }
 0x184   : > { %v618_v10 = vadd.f32 %v614_v29, %v563_v13  ;;  %v638_v37 = vadd.f32 %v633_v2, %v579_v38  ;;  %v1616_v16 = vstv %s2752_s24  ;;  %v1563_v54 = vrot.slane %v1556_v41, 2  ;;  %s1946_s24 = scalar_lea.vmem %s3056_s10, 768 }
 0x185   : > { %1453 = vrot.lane.b32.xlu1 %v1450_v53, %s2021_s5  ;;  %1523 = vrot.lane.b32.xlu0 %v1520_v61, %s3132_s7  ;;  %v828_v53 = vmul.f32 %v2745_v63, %v2493_v21  ;;  %v2801_v14 = vmul.f32 %v2761_v25, %v2493_v21  ;;  %v1598_v39 = vmul.f32 %v1595_v50, %v2544_v9  ;;  %v1581_v3 = vrot.slane %v1575_v33, 2  ;;  %p1947_p10 = scmp.ne.s32.totalorder %s3056_s10, %s1946_s24 }
 0x186   : > { %v597_v45 = vadd.f32 %v593_v5, %v545_v17  ;;  %v1562_v1 = vsel %vm554_vm4, %v1560_v43, %v1561_v46  ;;  %v3146_v56 = vstv %s2415_s27  ;;  %v1582_v59 = vrot.slane %v1576_v22, 2  ;;  %s1802_s27 = sld [smem:[#allocation3 + $0x45]] }
 0x187   : > { %v635_v58 = vpop.permute.xlu1 %634  ;;  %v654_v47 = vpop.permute.xlu0 %653  ;;  %v738_v8 = vmul.f32 %v2745_v63, %v3146_v56  ;;  %v1584_v15 = vrot.slane %v1577_v31, 2  ;;  %v1617_v34 = vmul.f32 %v1616_v16, %v2438_v49  ;;  %v2810_v19 = vmul.f32 %v1616_v16, %v2475_v7  ;;  %p1948_p0 = pnand %p1947_p10, %p3159_p12 }
 0x188   : > { %v2789_v4 = vadd.f32 %v635_v58, %v580_v6  ;;  %v2791_v11 = vadd.f32 %v654_v47, %v596_v27  ;;  %v1602_v17 = vrot.slane %v1596_v44, 2  ;;  %v1603_v38 = vrot.slane %v1597_v32, 2 }
 0x189   : > { %1525 = vrot.lane.b32.xlu1 %v1522_v40, %s3132_s7  ;;  %1544 = vrot.lane.b32.xlu0 %v1541_v51, %s3132_s7  ;;  %v834_v30 = vrot.slane %v828_v53, 1  ;;  %v835_v26 = vrot.slane %v2801_v14, 1  ;;  %v1605_v29 = vrot.slane %v1598_v39, 2  ;;  %v830_v2 = vmul.f32 %v2493_v21, %v2278_v42  ;;  %v3149_v53 = vld [vmem:[#allocation12_spill] sm:$0xff]  ;;  %v3150_v14 = vld [vmem:[#allocation13_spill] sm:$0xff]  ;;  %p1949_p7 = pneg %p1948_p0 }
 0x18a   : > { %v1564_v40 = vsel %vm554_vm4, %v1561_v46, %v1563_v54  ;;  %v3147_v5 = vmov %v3146_v56  ;;  %v845_v60 = vmul.f32 %v2745_v63, %v2496_v24  ;;  %v1583_v50 = vsel %vm554_vm4, %v1581_v3, %v1582_v59  ;;  %v2846_v54 = vld [vmem:[#allocation2 + $0x28] sm:$0x3] }
 0x18b   : > { %v656_v12 = vpop.permute.xlu1 %655  ;;  %v675_v61 = vpop.permute.xlu0 %674  ;;  %v1623_v51 = vrot.slane %v1617_v34, 2  ;;  %v2829_v42 = vmul.f32 %v2761_v25, %v2496_v24  ;;  %v1585_v41 = vsel %vm554_vm4, %v1582_v59, %v1584_v15  ;;  %v1604_v6 = vsel %vm554_vm4, %v1602_v17, %v1603_v38  ;;  %v3152_v15 = vld [vmem:[#allocation19_spill] sm:$0xff] }
 0x18c   : > { %v660_v35 = vadd.f32 %v656_v12, %v597_v45  ;;  %v680_v13 = vadd.f32 %v675_v61, %v2742_v52  ;;  %v739_v52 = vmul.f32 %v2761_v25, %v3147_v5  ;;  %v836_v27 = vsel %vm376_vm3, %v834_v30, %v835_v26  ;;  %v3151_v61 = vld [vmem:[#allocation18_spill] sm:$0xff] }
 0x18d   : > { %1546 = vrot.lane.b32.xlu1 %v1543_v62, %s3132_s7  ;;  %1565 = vrot.lane.b32.xlu0 %v1562_v1, %s3132_s7  ;;  %v1624_v62 = vrot.slane %v2810_v19, 2  ;;  %v1606_v46 = vsel %vm554_vm4, %v1603_v38, %v1605_v29  ;;  %v837_v33 = vrot.slane %v830_v2, 1  ;;  %v852_v44 = vrot.slane %v2829_v42, 1  ;;  %v3153_v29 = vld [vmem:[#allocation14_spill] sm:$0xff] }
 0x18e   : > { %v728_v49 = vadd.f32 %v2750_v20, %v680_v13  ;;  %v1619_v32 = vmul.f32 %v1616_v16, %v2544_v9  ;;  %v862_v16 = vmul.f32 %v2745_v63, %v2736_v23  ;;  %v863_v56 = vmul.f32 %v2761_v25, %v2736_v23 }
 0x18f   : > { %v677_v55 = vpop.permute.xlu1 %676  ;;  %v696_v28 = vpop.permute.xlu0 %695  ;;  %v1625_v31 = vsel %vm554_vm4, %v1623_v51, %v1624_v62  ;;  %v838_v13 = vsel %vm376_vm3, %v835_v26, %v837_v33  ;;  %v864_v30 = vmul.f32 %v2846_v54, %v2736_v23  ;;  %v3155_v51 = vld [vmem:[#allocation20_spill] sm:$0xff] }
 0x190   : > { %v754_v21 = vadd.f32 %v2434_v48, %v728_v49  ;;  %v681_v20 = vadd.f32 %v677_v55, %v618_v10  ;;  %v701_v43 = vadd.f32 %v696_v28, %v638_v37  ;;  %v3148_v48 = vld [vmem:[#allocation17_spill] sm:$0xff]  ;;  %v851_v37 = vrot.slane %v845_v60, 1  ;;  %v3154_v49 = vld [vmem:[#allocation15_spill] sm:$0xff] }
 0x191   : > { %1567 = vrot.lane.b32.xlu1 %v1564_v40, %s3132_s7  ;;  %1586 = vrot.lane.b32.xlu0 %v1583_v50, %s2021_s5  ;;  %v1626_v38 = vrot.slane %v1619_v32, 2  ;;  %v868_v55 = vrot.slane %v862_v16, 1  ;;  %v869_v26 = vrot.slane %v863_v56, 1  ;;  %s2920_s7 = sld [smem:[#allocation3 + $0x48]] }
 0x192   : > { %v729_v58 = vadd.f32 %v2766_v57, %v681_v20  ;;  %v734_v47 = vadd.f32 %v2772_v18, %v701_v43  ;;  %v796_v10 = vadd.f32 %v3148_v48, %v754_v21  ;;  %v847_v57 = vmul.f32 %v2846_v54, %v2496_v24  ;;  %v3156_v21 = vld [vmem:[#allocation21_spill] sm:$0xff] }
 0x193   : > { %v698_v22 = vpop.permute.xlu1 %697  ;;  %v717_v0 = vpop.permute.xlu0 %716  ;;  %v853_v17 = vsel %vm376_vm3, %v851_v37, %v852_v44  ;;  %v870_v33 = vsel %vm376_vm3, %v868_v55, %v869_v26 }
 0x194   : > { %v755_v18 = vadd.f32 %v3149_v53, %v729_v58  ;;  %v768_v39 = vadd.f32 %v3150_v14, %v734_v47  ;;  %v702_v45 = vadd.f32 %v698_v22, %v2789_v4  ;;  %v722_v1 = vadd.f32 %v717_v0, %v2791_v11 }
 0x195   : > { %1588 = vrot.lane.b32.xlu1 %v1585_v41, %s2021_s5  ;;  %1607 = vrot.lane.b32.xlu0 %v1604_v6, %s2021_s5  ;;  %v841_v3 = vadd.f32 %v836_v27, %v796_v10  ;;  %v854_v60 = vrot.slane %v847_v57, 1  ;;  %v3157_v41 = vld [vmem:[#allocation16_spill] sm:$0xff]  ;;  %v871_v58 = vrot.slane %v864_v30, 1  ;;  %v3158_v10 = vld [vmem:[#allocation22_spill] sm:$0xff] }
 0x196   : > { %v735_v24 = vadd.f32 %v2785_v36, %v702_v45  ;;  %v740_v12 = vadd.f32 %v738_v8, %v722_v1  ;;  %v797_v59 = vadd.f32 %v3151_v61, %v755_v18  ;;  %v810_v4 = vadd.f32 %v3152_v15, %v768_v39 }
 0x197   : > { %v719_v34 = vpop.permute.xlu1 %718  ;;  %v891_v11 = vpop.permute.xlu0 %890  ;;  %v872_v19 = vsel %vm376_vm3, %v869_v26, %v871_v58  ;;  %v1021_v1 = vstv %s1801_s26 }
 0x198   : > { %v769_v2 = vadd.f32 %v3153_v29, %v735_v24  ;;  %v782_v40 = vadd.f32 %v3154_v49, %v740_v12  ;;  %v723_v36 = vadd.f32 %v719_v34, %v660_v35  ;;  %v896_v8 = vadd.f32 %v891_v11, %v841_v3 }
 0x199   : > { %1609 = vrot.lane.b32.xlu1 %v1606_v46, %s2021_s5  ;;  %1628 = vrot.lane.b32.xlu0 %v1625_v31, %s2021_s5  ;;  %v842_v5 = vadd.f32 %v838_v13, %v797_v59  ;;  %v858_v50 = vadd.f32 %v853_v17, %v810_v4  ;;  %v1627_v46 = vsel %vm554_vm4, %v1624_v62, %v1626_v38  ;;  %v1004_v62 = vstv %s1800_s25  ;;  %s2022_s25 = smov [#allocation8]  }
 0x19a   : > { %v741_v28 = vadd.f32 %v739_v52, %v723_v36  ;;  %v811_v42 = vadd.f32 %v3155_v51, %v769_v2  ;;  %v824_v23 = vadd.f32 %v3156_v21, %v782_v40  ;;  %v855_v52 = vsel %vm376_vm3, %v852_v44, %v854_v60  ;;  %s1950_s26 = sshll.u32 %s2022_s25, 4  ;;  %s1951_s26 = int_to_ptr.vmem [resolvable:$false] %s1950_s26 }
 0x19b   : > { %v893_v20 = vpop.permute.xlu1 %892  ;;  %v912_v43 = vpop.permute.xlu0 %911  ;;  %v1005_v39 = vmul.f32 %v2745_v63, %v1004_v62  ;;  %v1006_v45 = vmul.f32 %v2761_v25, %v1004_v62  ;;  %v1007_v56 = vmul.f32 %v2846_v54, %v1004_v62  ;;  %v1022_v61 = vmul.f32 %v2745_v63, %v1021_v1  ;;  %p1953_p8 = scmp.lt.s32.totalorder %s3056_s10, %s1951_s26 }
 0x19c   : > { %v783_v35 = vadd.f32 %v3157_v41, %v741_v28  ;;  %v897_v6 = vadd.f32 %v893_v20, %v842_v5  ;;  %v917_v27 = vadd.f32 %v912_v43, %v858_v50  ;;  %v859_v47 = vadd.f32 %v855_v52, %v811_v42 }
 0x19d   : > { %1630 = vrot.lane.b32.xlu1 %v1627_v46, %s2021_s5  ;;  %v875_v48 = vadd.f32 %v870_v33, %v824_v23  ;;  %v1011_v59 = vrot.slane %v1005_v39, 2  ;;  %v1012_v15 = vrot.slane %v1006_v45, 2  ;;  %v1023_v4 = vmul.f32 %v2761_v25, %v1021_v1  ;;  %s1818_s5 = sld [smem:[#allocation3 + $0x15]] }
 0x19e   : > { %v825_v37 = vadd.f32 %v3158_v10, %v783_v35  ;;  %v1038_v34 = vstv %s1802_s27  ;;  %v1014_v17 = vrot.slane %v1007_v56, 2  ;;  %v1028_v29 = vrot.slane %v1022_v61, 2  ;;  %s1952_s27 = scalar_lea.vmem %s1951_s26, 1536 }
 0x19f   : > { %v914_v22 = vpop.permute.xlu1 %913  ;;  %v933_v0 = vpop.permute.xlu0 %932  ;;  %v1024_v2 = vmul.f32 %v2846_v54, %v1021_v1  ;;  %v1013_v49 = vsel %vm554_vm4, %v1011_v59, %v1012_v15  ;;  %v1029_v40 = vrot.slane %v1023_v4, 2  ;;  %v1039_v36 = vmul.f32 %v2745_v63, %v1038_v34  ;;  %p1954_p11 = scmp.lt.s32.totalorder %s1952_s27, %s1946_s24 }
 0x1a0   : > { %v918_v31 = vadd.f32 %v914_v22, %v859_v47  ;;  %v938_v32 = vadd.f32 %v933_v0, %v875_v48  ;;  %v876_v57 = vadd.f32 %v872_v19, %v825_v37  ;;  %v1015_v50 = vsel %vm554_vm4, %v1012_v15, %v1014_v17 }
 0x1a1   : > { %v1041_v51 = vmul.f32 %v2846_v54, %v1038_v34  ;;  %v1030_v42 = vsel %vm554_vm4, %v1028_v29, %v1029_v40  ;;  %v1031_v21 = vrot.slane %v1024_v2, 2  ;;  %v1045_v23 = vrot.slane %v1039_v36, 2  ;;  %p1955_p13 = por %p1954_p11, %p1953_p8 }
 0x1a2   : > { %v1181_v1 = vstv %s2909_s29  ;;  %v2930_v61 = vstv %s1819_s30  ;;  %v1187_v15 = vstv %s2913_s4  ;;  %v1193_v36 = vstv %s2920_s7 }
 0x1a3   : > { %v935_v53 = vpop.permute.xlu1 %934  ;;  %v954_v18 = vpop.permute.xlu0 %953  ;;  %v1048_v52 = vrot.slane %v1041_v51, 2  ;;  %v2917_v45 = vstv %s1818_s5  ;;  %v1183_v59 = vmul.f32 %v1181_v1, %v2475_v7  ;;  %v2940_v17 = vmul.f32 %v2930_v61, %v2475_v7  ;;  %p1956_p1 = pnand %p1955_p13, %p1949_p7 }
 0x1a4   : > { %v939_v44 = vadd.f32 %v935_v53, %v876_v57  ;;  %v959_v14 = vadd.f32 %v954_v18, %v896_v8  ;;  %v1040_v8 = vmul.f32 %v2761_v25, %v1038_v34  ;;  %v1303_v29 = vmul.f32 %v2930_v61, %v2544_v9 }
 0x1a6   : > { %v1018_v5 = vadd.f32 %v1013_v49, %v959_v14  ;;  %v1046_v20 = vrot.slane %v1040_v8, 2  ;;  %v1189_v49 = vmul.f32 %v1187_v15, %v2475_v7 }
 0x1a7   : > { %v956_v3 = vpop.permute.xlu1 %955  ;;  %v975_v16 = vpop.permute.xlu0 %974 }
 0x1a8   : > { %v960_v24 = vadd.f32 %v956_v3, %v897_v6  ;;  %v980_v12 = vadd.f32 %v975_v16, %v917_v27  ;;  %v1032_v27 = vsel %vm554_vm4, %v1029_v40, %v1031_v21  ;;  %v1047_v46 = vsel %vm554_vm4, %v1045_v23, %v1046_v20 }
 0x1a9   : > { %v1049_v37 = vsel %vm554_vm4, %v1046_v20, %v1048_v52  ;;  %v2948_v40 = vstv %s1820_s6 }
 0x1aa   : > { %v1019_v43 = vadd.f32 %v1015_v50, %v960_v24  ;;  %v1035_v41 = vadd.f32 %v1030_v42, %v980_v12  ;;  %v2926_v24 = vmul.f32 %v2917_v45, %v2475_v7  ;;  %v1286_v12 = vmul.f32 %v2917_v45, %v2544_v9 }
 0x1ab   : > { %v977_v11 = vpop.permute.xlu1 %976  ;;  %v996_v13 = vpop.permute.xlu0 %995  ;;  %v1308_v50 = vrot.slane %v2940_v17, 1  ;;  %v1310_v42 = vrot.slane %v1303_v29, 1  ;;  %v2959_v21 = vmul.f32 %v2948_v40, %v2475_v7  ;;  %v1320_v23 = vmul.f32 %v2948_v40, %v2544_v9 }
 0x1ac   : > { %v981_v38 = vadd.f32 %v977_v11, %v918_v31  ;;  %v1001_v30 = vadd.f32 %v996_v13, %v938_v32 }
 0x1ad   : > { %v1325_v52 = vrot.slane %v2959_v21, 1 }
 0x1ae   : > { %v1036_v33 = vadd.f32 %v1032_v27, %v981_v38  ;;  %v1052_v58 = vadd.f32 %v1047_v46, %v1001_v30  ;;  %v1291_v38 = vrot.slane %v2926_v24, 1  ;;  %v1293_v30 = vrot.slane %v1286_v12, 1 }
 0x1af   : > { %v998_v60 = vpop.permute.xlu1 %997  ;;  %v1068_v55 = vpop.permute.xlu0 %1067  ;;  %v1311_v46 = vsel %vm376_vm3, %v1308_v50, %v1310_v42  ;;  %v1477_v12 = vstv %s1828_s28 }
 0x1b0   : > { %v1002_v26 = vadd.f32 %v998_v60, %v939_v44  ;;  %v2891_v28 = vadd.f32 %v1068_v55, %v1018_v5  ;;  %v1294_v51 = vsel %vm376_vm3, %v1291_v38, %v1293_v30 }
 0x1b2   : > { %v1053_v22 = vadd.f32 %v1049_v37, %v1002_v26 }
 0x1b3   : > { %v1070_v63 = vpop.permute.xlu1 %1069  ;;  %v1089_v35 = vpop.permute.xlu0 %1088 }
 0x1b4   : > { %v1074_v25 = vadd.f32 %v1070_v63, %v1019_v43  ;;  %v2896_v6 = vadd.f32 %v1089_v35, %v1035_v41  ;;  %v1195_v43 = vmul.f32 %v1193_v36, %v2475_v7 }
 0x1b7   : > { %v1091_v54 = vpop.permute.xlu1 %1090  ;;  %v1110_v47 = vpop.permute.xlu0 %1109 }
 0x1b8   : > { %v1095_v48 = vadd.f32 %v1091_v54, %v1036_v33  ;;  %v2900_v10 = vadd.f32 %v1110_v47, %v1052_v58  ;;  %v1327_v33 = vrot.slane %v1320_v23, 1 }
 0x1ba   : > { %v1328_v37 = vsel %vm376_vm3, %v1325_v52, %v1327_v33 }
 0x1bb   : > { %v1112_v0 = vpop.permute.xlu1 %1111  ;;  %v2903_v31 = vpop.permute.xlu0 %1130 }
 0x1bc   : > { %v1116_v32 = vadd.f32 %v1112_v0, %v1053_v22 }
 0x1bf   : > { %v1133_v19 = vpop.permute.xlu1 %1132  ;;  %v2905_v57 = vpop.permute.xlu0 %1151 }
 0x1c0   : > { %v1137_v56 = vadd.f32 %v1133_v19, %v1074_v25  ;;  %v1460_v19 = vstv %s1827_s8 }
 0x1c2   : > { %v1185_v13 = vadd.f32 %v1183_v59, %v1137_v56  ;;  %v1463_v56 = vmul.f32 %v1460_v19, %v2544_v9 }
 0x1c3   : > { %v1154_v62 = vpop.permute.xlu1 %1153  ;;  %v2907_v53 = vpop.permute.xlu0 %1172 }
 0x1c4   : > { %v1158_v11 = vadd.f32 %v1154_v62, %v1095_v48  ;;  %v1470_v30 = vrot.slane %v1463_v56, 2 }
 0x1c6   : > { %v1191_v55 = vadd.f32 %v1189_v49, %v1158_v11  ;;  %v1136_v11 = vadd.f32 %v2903_v31, %v2891_v28  ;;  %v2990_v49 = vld [vmem:[#allocation2 + $0x30] sm:$0xff]  ;;  %v1157_v31 = vadd.f32 %v2905_v57, %v2896_v6 }
 0x1c7   : > { %v1175_v18 = vpop.permute.xlu1 %1174  ;;  %v2911_v44 = vpop.permute.xlu0 %1204 }
 0x1c8   : > { %v1179_v60 = vadd.f32 %v1175_v18, %v1116_v32 }
 0x1ca   : > { %v1197_v25 = vadd.f32 %v1195_v43, %v1179_v60 }
 0x1cb   : > { %v1207_v14 = vpop.permute.xlu1 %1206  ;;  %v2915_v39 = vpop.permute.xlu0 %1218 }
 0x1cc   : > { %v1211_v2 = vadd.f32 %v1207_v14, %v1185_v13  ;;  %v1914_v14 = vld [vmem:[#allocation2 + $0x38] sm:$0xff] }
 0x1cd   : > { %v2987_v29 = vmul.f32 %v1914_v14, %v1477_v12 }
 0x1cf   : > { %v1221_v3 = vpop.permute.xlu1 %1220  ;;  %v2922_v16 = vpop.permute.xlu0 %1232  ;;  %v1485_v43 = vrot.slane %v2987_v29, 2 }
 0x1d0   : > { %v1225_v20 = vadd.f32 %v1221_v3, %v1191_v55  ;;  %v2981_v3 = vmul.f32 %v1914_v14, %v1460_v19  ;;  %v1494_v55 = vstv %s1829_s0 }
 0x1d2   : > { %v1468_v13 = vrot.slane %v2981_v3, 2 }
 0x1d3   : > { %v1235_v4 = vpop.permute.xlu1 %1234  ;;  %v2936_v34 = vpop.permute.xlu0 %1246 }
 0x1d4   : > { %v1239_v58 = vadd.f32 %v1235_v4, %v1197_v25  ;;  %v1188_v25 = vmul.f32 %v2990_v49, %v1187_v15 }
 0x1d7   : > { %v1249_v8 = vpop.permute.xlu1 %1248  ;;  %v2951_v5 = vpop.permute.xlu0 %1260 }
 0x1d8   : > { %v1253_v26 = vadd.f32 %v1249_v8, %v1211_v2  ;;  %v1480_v2 = vmul.f32 %v1477_v12, %v2544_v9  ;;  %v1182_v8 = vmul.f32 %v2990_v49, %v1181_v1  ;;  %v3003_v1 = vmul.f32 %v1914_v14, %v1494_v55 }
 0x1da   : > { %v1298_v41 = vadd.f32 %v1294_v51, %v1253_v26  ;;  %v1284_v26 = vmul.f32 %v2990_v49, %v2917_v45  ;;  %v1184_v42 = vadd.f32 %v1182_v8, %v1136_v11  ;;  %v1461_v11 = vmul.f32 %v2990_v49, %v1460_v19 }
 0x1db   : > { %v1263_v63 = vpop.permute.xlu1 %1262  ;;  %v2966_v35 = vpop.permute.xlu0 %1274 }
 0x1dc   : > { %v1267_v27 = vadd.f32 %v1263_v63, %v1225_v20  ;;  %v1471_v20 = vsel %vm554_vm4, %v1468_v13, %v1470_v30  ;;  %v1487_v63 = vrot.slane %v1480_v2, 2  ;;  %v1210_v45 = vadd.f32 %v2911_v44, %v1184_v42 }
 0x1dd   : > { %v1467_v19 = vrot.slane %v1461_v11, 2 }
 0x1de   : > { %v1315_v54 = vadd.f32 %v1311_v46, %v1267_v27  ;;  %v1290_v27 = vrot.slane %v1284_v26, 1  ;;  %v1301_v46 = vmul.f32 %v2990_v49, %v2930_v61  ;;  %v1488_v44 = vsel %vm554_vm4, %v1485_v43, %v1487_v63 }
 0x1df   : > { %v1277_v47 = vpop.permute.xlu1 %1276  ;;  %v2972_v48 = vpop.permute.xlu0 %1346 }
 0x1e0   : > { %v1281_v7 = vadd.f32 %v1277_v47, %v1239_v58  ;;  %v1178_v47 = vadd.f32 %v2907_v53, %v2900_v10  ;;  %v1292_v10 = vsel %vm376_vm3, %v1290_v27, %v1291_v38  ;;  %v1307_v53 = vrot.slane %v1301_v46, 1 }
 0x1e2   : > { %v1332_v22 = vadd.f32 %v1328_v37, %v1281_v7  ;;  %v1190_v7 = vadd.f32 %v1188_v25, %v1157_v31 }
 0x1e3   : > { %v1349_v0 = vpop.permute.xlu1 %1348  ;;  %v2977_v32 = vpop.permute.xlu0 %1367 }
 0x1e4   : > { %v1353_v60 = vadd.f32 %v1349_v0, %v1298_v41  ;;  %v1497_v41 = vmul.f32 %v1494_v55, %v2544_v9  ;;  %v1252_v9 = vadd.f32 %v2936_v34, %v1210_v45  ;;  %v1502_v0 = vrot.slane %v3003_v1, 2 }
 0x1e5   : > { %v1318_v34 = vmul.f32 %v2990_v49, %v2948_v40  ;;  %v1309_v40 = vsel %vm376_vm3, %v1307_v53, %v1308_v50  ;;  %v1469_v50 = vsel %vm554_vm4, %v1467_v19, %v1468_v13 }
 0x1e6   : > { %v1504_v15 = vrot.slane %v1497_v41, 2  ;;  %v1297_v2 = vadd.f32 %v1292_v10, %v1252_v9 }
 0x1e7   : > { %v1370_v62 = vpop.permute.xlu1 %1369  ;;  %v2979_v18 = vpop.permute.xlu0 %1388  ;;  %v1324_v8 = vrot.slane %v1318_v34, 1 }
 0x1e8   : > { %v1374_v6 = vadd.f32 %v1370_v62, %v1315_v54  ;;  %v1224_v54 = vadd.f32 %v2915_v39, %v1190_v7  ;;  %v1194_v62 = vmul.f32 %v2990_v49, %v1193_v36  ;;  %v1352_v38 = vadd.f32 %v2972_v48, %v1297_v2 }
 0x1e9   : > { %v1326_v17 = vsel %vm376_vm3, %v1324_v8, %v1325_v52 }
 0x1ea   : > { %v1196_v29 = vadd.f32 %v1194_v62, %v1178_v47  ;;  %v1266_v39 = vadd.f32 %v2951_v5, %v1224_v54  ;;  %v1478_v5 = vmul.f32 %v2990_v49, %v1477_v12  ;;  %v1495_v12 = vmul.f32 %v2990_v49, %v1494_v55 }
 0x1eb   : > { %v1391_v59 = vpop.permute.xlu1 %1390  ;;  %v1410_v4 = vpop.permute.xlu0 %1409 }
 0x1ec   : > { %v1395_v61 = vadd.f32 %v1391_v59, %v1332_v22  ;;  %v1505_v22 = vsel %vm554_vm4, %v1502_v0, %v1504_v15  ;;  %v1238_v24 = vadd.f32 %v2922_v16, %v1196_v29  ;;  %v1314_v31 = vadd.f32 %v1309_v40, %v1266_v39 }
 0x1ed   : > { %v1415_v42 = vadd.f32 %v1410_v4, %v1352_v38  ;;  %v1484_v48 = vrot.slane %v1478_v5, 2  ;;  %v1501_v52 = vrot.slane %v1495_v12, 2 }
 0x1ee   : > { %v1373_v16 = vadd.f32 %v2977_v32, %v1314_v31 }
 0x1ef   : > { %v1412_v51 = vpop.permute.xlu1 %1411  ;;  %v1431_v28 = vpop.permute.xlu0 %1430  ;;  %v1474_v63 = vadd.f32 %v1469_v50, %v1415_v42  ;;  %v1486_v21 = vsel %vm554_vm4, %v1484_v48, %v1485_v43  ;;  %v1503_v55 = vsel %vm554_vm4, %v1501_v52, %v1502_v0 }
 0x1f0   : > { %v1416_v23 = vadd.f32 %v1412_v51, %v1353_v60  ;;  %v1280_v51 = vadd.f32 %v2966_v35, %v1238_v24  ;;  %v1436_v4 = vadd.f32 %v1431_v28, %v1373_v16 }
 0x1f2   : > { %v1475_v57 = vadd.f32 %v1471_v20, %v1416_v23  ;;  %v1331_v35 = vadd.f32 %v1326_v17, %v1280_v51  ;;  %v1491_v45 = vadd.f32 %v1486_v21, %v1436_v4 }
 0x1f3   : > { %v1433_v33 = vpop.permute.xlu1 %1432  ;;  %v1452_v58 = vpop.permute.xlu0 %1451 }
 0x1f4   : > { %v1437_v37 = vadd.f32 %v1433_v33, %v1374_v6  ;;  %v1394_v32 = vadd.f32 %v2979_v18, %v1331_v35 }
 0x1f6   : > { %v1492_v14 = vadd.f32 %v1488_v44, %v1437_v37  ;;  %v1457_v13 = vadd.f32 %v1452_v58, %v1394_v32 }
 0x1f7   : > { %v1454_v56 = vpop.permute.xlu1 %1453  ;;  %v1524_v30 = vpop.permute.xlu0 %1523 }
 0x1f8   : > { %v1458_v36 = vadd.f32 %v1454_v56, %v1395_v61  ;;  %v1529_v1 = vadd.f32 %v1524_v30, %v1474_v63  ;;  %v1508_v27 = vadd.f32 %v1503_v55, %v1457_v13 }
 0x1fa   : > { %v1509_v59 = vadd.f32 %v1505_v22, %v1458_v36 }
 0x1fb   : > { %v1526_v60 = vpop.permute.xlu1 %1525  ;;  %v1545_v26 = vpop.permute.xlu0 %1544 }
 0x1fc   : > { %v1530_v6 = vadd.f32 %v1526_v60, %v1475_v57  ;;  %v1550_v49 = vadd.f32 %v1545_v26, %v1491_v45 }
 0x1ff   : > { %v1547_v23 = vpop.permute.xlu1 %1546  ;;  %v1566_v20 = vpop.permute.xlu0 %1565 }
 0x200   : > { %v1551_v33 = vadd.f32 %v1547_v23, %v1492_v14  ;;  %v1571_v47 = vadd.f32 %v1566_v20, %v1508_v27 }
 0x203   : > { %v1568_v41 = vpop.permute.xlu1 %1567  ;;  %v1587_v3 = vpop.permute.xlu0 %1586 }
 0x204   : > { %v1592_v25 = vadd.f32 %v1587_v3, %v1529_v1  ;;  %v1572_v37 = vadd.f32 %v1568_v41, %v1509_v59 }
 0x206   : > { %1637 = vst.msk [vmem:[%s190_s9] sm:$0xff] %vm1636_vm5, %v1592_v25 }
 0x207   : > { %v1589_v28 = vpop.permute.xlu1 %1588  ;;  %v1608_v18 = vpop.permute.xlu0 %1607 }
 0x208   : > { %v1593_v46 = vadd.f32 %v1589_v28, %v1530_v6  ;;  %v1613_v43 = vadd.f32 %v1608_v18, %v1550_v49 }
 0x20a   : > { %1638 = vst.msk [vmem:[%s190_s9 + $0x8] sm:$0xff] %vm1636_vm5, %v1593_v46  ;;  %1639 = vst.msk [vmem:[%s190_s9 + $0x10] sm:$0xff] %vm1636_vm5, %v1613_v43 }
 0x20b   : > { %v1610_v57 = vpop.permute.xlu1 %1609  ;;  %v1629_v58 = vpop.permute.xlu0 %1628 }
 0x20c   : > { %v1614_v7 = vadd.f32 %v1610_v57, %v1551_v33  ;;  %v1634_v9 = vadd.f32 %v1629_v58, %v1571_v47 }
 0x20e   : > { %1640 = vst.msk [vmem:[%s190_s9 + $0x18] sm:$0xff] %vm1636_vm5, %v1614_v7  ;;  %1641 = vst.msk [vmem:[%s190_s9 + $0x20] sm:$0xff] %vm1636_vm5, %v1634_v9 }
 0x20f   : > { %v1631_v44 = vpop.permute.xlu1 %1630 }
 0x210   : > { %v1635_v0 = vadd.f32 %v1631_v44, %v1572_v37 }
 0x212   : > { %1642 = vst.msk [vmem:[%s190_s9 + $0x28] sm:$0xff] %vm1636_vm5, %v1635_v0 }
 0x213   : > { %1959 = shalt.err (!%p1956_p1)
}
 0x214   : > { %s1960_s5 = scalar_lea.hbm %s3061_s20, 768  ;;  %s1964_s4 = scalar_lea.hbm %s3109_s3, 1536 }
 0x215   : > { %p1961_p2 = scmp.ne.s32.totalorder %s3061_s20, %s1960_s5  ;;  %p1965_p9 = scmp.lt.s32.totalorder %s3061_s20, %s3109_s3 }
 0x216   : > { %p1966_p5 = scmp.lt.s32.totalorder %s1964_s4, %s1960_s5 }
 0x217   : > { %p1962_p3 = pnand %p1961_p2, %p3159_p12 }
 0x218   : > { %p1967_p6 = por %p1966_p5, %p1965_p9 }
 0x219   : > { %p1963_p4 = pneg %p1962_p3 }
 0x21b   : > { %p1968_p10 = pnand %p1967_p6, %p1963_p4 }
 0x21d   : > { %1971 = shalt.err (!%p1968_p10)
}
 0x21e   : > { %s2023_s8 = smov 128   ;;  %s2024_s28 = smov 8  }
 0x21f   : > { %1850 = dma.vmem_to_hbm [thread:$0]  (%p3159_p12), %s3056_s10, 768, %s3061_s20, %s3066_s16, %s2023_s8, %s2023_s8, %s2024_s28  }
 0x220 PF: > { %p1867_p0 = scmp.ge.s32.totalorder %s2014_s15, 2  ;;  %s1672_s0 = sand.u32 1, %s2002_s12  }
 0x221   : > { %p3160_p7 = scmp.ne.s32.totalorder %s3119_s23, 0  ;;  %s1673_s1 = scalar_lea.sflag [#allocation4], %s1672_s0 }
 0x223   : > { %p1860_p8 = pnand %p1867_p0, %p3160_p7 }
 0x225   : > { %p1861_p11 = pneg %p1860_p8 }
 0x227   : > { %1997 = dma.done.wait (%p1861_p11), %s1673_s1, 768  }
 0x228   : > { %1999 = vsyncadd (%p1861_p11), %s1673_s1, 4294966528  ;;  %p15_p13 = scmp.ge.s32.totalorder %s2070_s18, 4   ;;  %s3161_s12 = smov %s2006_s13 }
 0x229   : > { %s3162_s13 = smov %s2010_s14  ;;  %s3163_s14 = smov %s2081_s21 }
 0x22a   : > { %s3164_s15 = smov %s2070_s18  ;;  %17 = sbr.rel (!%p15_p13) target bundleno = 9 (0x9), region = 80 }
 0x22f   :  { %1678 = vsyncpa [#allocation4], 1 }
 0x230   :  { %1680 = vsyncpa [#allocation4 + $0x1], 1 }
 0x231   :  { %1681 = vsyncpa [#allocation5], 1 }
 0x232   :  { %1683 = vsyncpa [#allocation5 + $0x1], 1 }
 0x233   :  { %1684 = vsyncpa [#allocation7], 1 }

// kernel: decoder_forward.2
= control target key start
LH: loop header
LB: loop body
LE: loop exit
PB: predicated region body
PF: predicated region fallthrough
CT: control target
= control target key end

     0   :  { %14 = vsyncpa [#allocation3], 0  ;;  %s7274_s0 = inlined_call_operand.hbm [shape: f32[2,8,16], index: 0, kind: input, shape index: {}]   ;;  %s7275_s1 = inlined_call_operand.hbm [shape: f32[24,128], index: 1, kind: input, shape index: {}]   ;;  %s7276_s2 = inlined_call_operand.hbm [shape: f32[16,512], index: 2, kind: input, shape index: {}]   ;;  %s7277_s3 = inlined_call_operand.vmem [shape: bf16[16,128], index: 3, kind: input, shape index: {}]   ;;  %s7278_s4 = inlined_call_operand.hbm [shape: bf16[128,384], index: 4, kind: input, shape index: {}]   ;;  %s7279_s5 = inlined_call_operand.hbm [shape: bf16[128,128], index: 5, kind: input, shape index: {}]   ;;  %s7280_s6 = inlined_call_operand.hbm [shape: bf16[128,512], index: 6, kind: input, shape index: {}]   ;;  %s7281_s7 = inlined_call_operand.hbm [shape: bf16[512,128], index: 7, kind: input, shape index: {}]   ;;  %s7282_s8 = inlined_call_operand.hbm [shape: bf16[128,128], index: 8, kind: input, shape index: {}]   ;;  %s7283_s9 = inlined_call_operand.vmem [shape: f32[2,16,128], index: 9, kind: output, shape index: {}]  }
   0x1   :  { %16 = vsyncpa [#allocation3 + $0x1], 0 }
   0x2   :  { %17 = vsyncpa [#allocation5], 0 }
   0x3   :  { %18 = vsyncpa [#allocation8], 0 }
   0x4   :  { %19 = vsyncpa [#allocation11], 0 }
   0x5   :  { %20 = vsyncpa [#allocation14], 0  ;;  %s6384_s30 = smov 0   ;;  %s6386_s10 = smov 0  }
   0x6   :  { %s6388_s11 = smov 0   ;;  %s6390_s12 = smov 0  }
   0x7 LB: > { %s6313_s13 = smov [#allocation4]   ;;  %s6405_s15 = sadd.s32 4294967295, %s6311_s12   ;;  %s6311_s12 = sphi %s6390_s12, %s7321_s12   ;;  %s6307_s11 = sphi %s6388_s11, %s7320_s11   ;;  %s6303_s10 = sphi %s6386_s10, %s7319_s10   ;;  %s6299_s30 = sphi %s6384_s30, %s7318_s30  }
   0x8   : > { %s263_s14 = sshll.u32 %s6313_s13, 4  ;;  %p4701_p0 = scmp.ge.s32.totalorder %s6311_s12, 1  ;;  %s264_s14 = int_to_ptr.vmem [resolvable:$true] %s263_s14 }
   0x9   : > { %p7284_p1 = scmp.eq.s32.totalorder %s6405_s15, 0  ;;  %p251_p2 = scmp.lt.s32.totalorder %s6311_s12, 3 }
   0xa   : > { %s6314_s17 = smov [#allocation7]   ;;  %s6315_s20 = smov [#allocation10]  }
   0xb   : > { %p6410_p3 = pnand %p4701_p0, %p251_p2  ;;  %s292_s18 = sshll.u32 %s6314_s17, 4  ;;  %s6422_s18 = int_to_ptr.vmem [resolvable:$true] %s292_s18 }
   0xc   : > { %s6424_s21 = sshll.u32 %s6315_s20, 4  ;;  %s6062_s23 = scalar_lea.vmem %s264_s14, 384  ;;  %s319_s21 = int_to_ptr.vmem [resolvable:$true] %s6424_s21 }
   0xd   : > { %s7296_s16 = scalar_select %p6410_p3, 1, 0 }
   0xe   : > { %p5287_p4 = pneg %p6410_p3  ;;  %p6063_p7 = scmp.ne.s32.totalorder %s264_s14, %s6062_s23 }
   0xf   : > { %p6070_p10 = scmp.lt.s32.totalorder %s264_s14, %s264_s14  ;;  %p6071_p11 = scmp.lt.s32.totalorder %s6062_s23, %s6062_s23 }
  0x10   : > { %p6418_p5 = pnand %p5287_p4, %p7284_p1 }
  0x11   : > { %p6072_p12 = por %p6071_p11, %p6070_p10 }
  0x12   : > { %p6428_p6 = pneg %p6418_p5 }
  0x14   : > { %p6065_p8 = pnand %p6063_p7, %p6428_p6 }
  0x16   : > { %p6066_p9 = pneg %p6065_p8 }
  0x18   : > { %p6073_p13 = pnand %p6072_p12, %p6066_p9 }
  0x1a   : > { %6076 = shalt.err (!%p6073_p13)
}
  0x1b   : > { %s6316_s24 = smov 128   ;;  %s6317_s25 = smov 8  }
  0x1c   : > { %5290 = dma.hbm_to_vmem [thread:$0]  (!%p6418_p5), %s7275_s1, 384, %s264_s14, [#allocation5], %s6316_s24, %s6316_s24, %s6317_s25  }
  0x1d   : > { %s6088_s28 = scalar_lea.vmem %s6422_s18, 3072  ;;  %p6096_p7 = scmp.lt.s32.totalorder %s6422_s18, %s6422_s18 }
  0x1e   : > { %p6089_p0 = scmp.ne.s32.totalorder %s6422_s18, %s6088_s28  ;;  %p6097_p8 = scmp.lt.s32.totalorder %s6088_s28, %s6088_s28 }
  0x20   : > { %p6091_p2 = pnand %p6089_p0, %p6428_p6  ;;  %p6098_p9 = por %p6097_p8, %p6096_p7 }
  0x22   : > { %p6092_p4 = pneg %p6091_p2 }
  0x24   : > { %p6099_p10 = pnand %p6098_p9, %p6092_p4 }
  0x26   : > { %6102 = shalt.err (!%p6099_p10)
}
  0x27   : > { %s6318_s29 = smov 192   ;;  %s6319_s13 = smov 12  }
  0x28   : > { %5296 = dma.hbm_to_vmem [thread:$0]  (!%p6418_p5), %s7278_s4, 3072, %s6422_s18, [#allocation8], %s6318_s29, %s6318_s29, %s6319_s13  }
  0x29   : > { %s6114_s20 = scalar_lea.vmem %s319_s21, 4096  ;;  %p6122_p0 = scmp.lt.s32.totalorder %s319_s21, %s319_s21 }
  0x2a   : > { %p6115_p11 = scmp.ne.s32.totalorder %s319_s21, %s6114_s20  ;;  %p6123_p2 = scmp.lt.s32.totalorder %s6114_s20, %s6114_s20 }
  0x2c   : > { %p6117_p12 = pnand %p6115_p11, %p6428_p6  ;;  %p6124_p4 = por %p6123_p2, %p6122_p0 }
  0x2e   : > { %p6118_p13 = pneg %p6117_p12 }
  0x30   : > { %p6125_p7 = pnand %p6124_p4, %p6118_p13 }
  0x32   : > { %6128 = shalt.err (!%p6125_p7)
}
  0x33   : > { %s6320_s23 = smov 256   ;;  %s6321_s24 = smov 16  }
  0x34   : > { %5302 = dma.hbm_to_vmem [thread:$0]  (!%p6418_p5), %s7280_s6, 4096, %s319_s21, [#allocation11], %s6320_s23, %s6320_s23, %s6321_s24  }
  0x35   : > { %s6322_s18 = smov [#allocation6]  }
  0x36   : > { %s276_s27 = sshll.u32 %s6322_s18, 4  ;;  %s277_s27 = int_to_ptr.vmem [resolvable:$true] %s276_s27 }
  0x37   : > { %s6140_s28 = scalar_lea.vmem %s277_s27, 1024  ;;  %p6148_p11 = scmp.lt.s32.totalorder %s277_s27, %s277_s27 }
  0x38   : > { %p6141_p8 = scmp.ne.s32.totalorder %s277_s27, %s6140_s28  ;;  %p6149_p12 = scmp.lt.s32.totalorder %s6140_s28, %s6140_s28 }
  0x3a   : > { %p6143_p9 = pnand %p6141_p8, %p6428_p6  ;;  %p6150_p13 = por %p6149_p12, %p6148_p11 }
  0x3c   : > { %p6144_p10 = pneg %p6143_p9 }
  0x3e   : > { %p6151_p0 = pnand %p6150_p13, %p6144_p10 }
  0x40   : > { %6154 = shalt.err (!%p6151_p0)
}
  0x41   : > { %s6323_s29 = smov 512   ;;  %s6324_s13 = smov 32  }
  0x42   : > { %5293 = dma.hbm_to_vmem [thread:$0]  (!%p6418_p5), %s7276_s2, 1024, %s277_s27, [#allocation5], %s6323_s29, %s6323_s29, %s6324_s13  }
  0x43   : > { %s6325_s14 = smov [#allocation9]  }
  0x44   : > { %s305_s20 = sshll.u32 %s6325_s14, 4  ;;  %s306_s20 = int_to_ptr.vmem [resolvable:$true] %s305_s20 }
  0x45   : > { %s6166_s23 = scalar_lea.vmem %s306_s20, 1024  ;;  %p6174_p8 = scmp.lt.s32.totalorder %s306_s20, %s306_s20 }
  0x46   : > { %p6167_p2 = scmp.ne.s32.totalorder %s306_s20, %s6166_s23  ;;  %p6175_p9 = scmp.lt.s32.totalorder %s6166_s23, %s6166_s23 }
  0x48   : > { %p6169_p4 = pnand %p6167_p2, %p6428_p6  ;;  %p6176_p10 = por %p6175_p9, %p6174_p8 }
  0x4a   : > { %p6170_p7 = pneg %p6169_p4 }
  0x4c   : > { %p6177_p11 = pnand %p6176_p10, %p6170_p7 }
  0x4e   : > { %6180 = shalt.err (!%p6177_p11)
}
  0x4f   : > { %s6326_s24 = smov 64   ;;  %s6327_s25 = smov 4  }
  0x50   : > { %5299 = dma.hbm_to_vmem [thread:$0]  (!%p6418_p5), %s7279_s5, 1024, %s306_s20, [#allocation8], %s6326_s24, %s6326_s24, %s6327_s25  }
  0x51   : > { %s6328_s27 = smov [#allocation12]   ;;  %s6329_s29 = smov [#allocation13]  }
  0x52   : > { %s331_s28 = sshll.u32 %s6328_s27, 4  ;;  %s344_s13 = sshll.u32 %s6329_s29, 4  ;;  %s332_s28 = int_to_ptr.vmem [resolvable:$true] %s331_s28  ;;  %s345_s13 = int_to_ptr.vmem [resolvable:$true] %s344_s13 }
  0x53   : > { %s6192_s17 = scalar_lea.vmem %s332_s28, 4096  ;;  %p6200_p2 = scmp.lt.s32.totalorder %s332_s28, %s332_s28 }
  0x54   : > { %p6193_p12 = scmp.ne.s32.totalorder %s332_s28, %s6192_s17  ;;  %p6201_p4 = scmp.lt.s32.totalorder %s6192_s17, %s6192_s17 }
  0x56   : > { %p6195_p13 = pnand %p6193_p12, %p6428_p6  ;;  %p6202_p7 = por %p6201_p4, %p6200_p2 }
  0x58   : > { %p6196_p0 = pneg %p6195_p13 }
  0x5a   : > { %p6203_p8 = pnand %p6202_p7, %p6196_p0 }
  0x5c   : > { %6206 = shalt.err (!%p6203_p8)
}
  0x5d   : > { %5305 = dma.hbm_to_vmem [thread:$0]  (!%p6418_p5), %s7281_s7, 4096, %s332_s28, [#allocation11], %s6326_s24, %s6326_s24, %s6327_s25  }
  0x5e   : > { %s6218_s20 = scalar_lea.vmem %s345_s13, 1024  ;;  %p6226_p12 = scmp.lt.s32.totalorder %s345_s13, %s345_s13 }
  0x5f   : > { %p6219_p9 = scmp.ne.s32.totalorder %s345_s13, %s6218_s20  ;;  %p6227_p13 = scmp.lt.s32.totalorder %s6218_s20, %s6218_s20 }
  0x61   : > { %p6221_p10 = pnand %p6219_p9, %p6428_p6  ;;  %p6228_p0 = por %p6227_p13, %p6226_p12 }
  0x63   : > { %p6222_p11 = pneg %p6221_p10 }
  0x65   : > { %p6229_p2 = pnand %p6228_p0, %p6222_p11 }
  0x67   : > { %6232 = shalt.err (!%p6229_p2)
}
  0x68   : > { %5308 = dma.hbm_to_vmem [thread:$0]  (!%p6418_p5), %s7282_s8, 1024, %s345_s13, [#allocation14], %s6326_s24, %s6326_s24, %s6327_s25  }
  0x69   : > { %s6497_s19 = sadd.s32 1, %s6311_s12   ;;  %s33_s18 = sadd.s32 1, %s6307_s11 }
  0x6a   : > { %s30_s22 = ssub.s32 %s6311_s12, %s6497_s19  ;;  %p40_p4 = scmp.ne.s32.totalorder %s6307_s11, %s6303_s10 }
  0x6b   : > { %p31_p6 = scmp.eq.s32.totalorder %s30_s22, 0  ;;  %p41_p7 = scmp.eq.s32.totalorder %s6311_s12, 0 }
  0x6c   : > { %p46_p8 = scmp.ne.s32.totalorder %s6303_s10, %s6299_s30  ;;  %p5320_p11 = scmp.lt.s32.totalorder %s6311_s12, 2 }
  0x6d   : > { %s6508_s27 = scalar_select %p31_p6, %s6307_s11, %s33_s18  }
  0x6e   : > { %p42_p9 = por %p41_p7, %p40_p4  ;;  %p6512_p10 = por %p7284_p1, %p46_p8 }
  0x6f   : > { %s358_s29 = sand.u32 1, %s6307_s11   ;;  %s4711_s25 = sshll.u32 %s6311_s12, 7 }
  0x70   : > { %s7299_s28 = scalar_select %p6512_p10, 1, 0 }
  0x71   : > { %s4710_s24 = sshll.u32 %s358_s29, 3  ;;  %s6522_s21 = scalar_lea.hbm %s7274_s0, %s4711_s25 }
  0x72   : > { %s362_s30 = scalar_lea.vmem [#allocation2], %s4710_s24  ;;  %p6524_p5 = pnand %p5320_p11, %p42_p9 }
  0x73   : > { %s369_s14 = sshll.u32 %s362_s30, 4  ;;  %s359_s23 = scalar_lea.sflag [#allocation3], %s358_s29  ;;  %s370_s14 = int_to_ptr.vmem [resolvable:$true] %s369_s14 }
  0x74   : > { %s6233_s26 = scalar_lea.hbm %s6522_s21, 128  ;;  %p6235_p13 = pneg %p6524_p5 }
  0x75   : > { %p6234_p12 = scmp.ne.s32.totalorder %s6522_s21, %s6233_s26  ;;  %s6238_s18 = scalar_lea.hbm %s7274_s0, 256 }
  0x76   : > { %p6239_p6 = scmp.lt.s32.totalorder %s6522_s21, %s7274_s0  ;;  %p6240_p4 = scmp.lt.s32.totalorder %s6238_s18, %s6233_s26 }
  0x77   : > { %p6236_p0 = pnand %p6235_p13, %p6234_p12 }
  0x78   : > { %p6241_p7 = por %p6240_p4, %p6239_p6 }
  0x79   : > { %p6237_p2 = pneg %p6236_p0 }
  0x7b   : > { %p6242_p8 = pnand %p6241_p7, %p6237_p2 }
  0x7d   : > { %6245 = shalt.err (!%p6242_p8)
}
  0x7e   : > { %s6246_s13 = scalar_lea.vmem %s370_s14, 128  ;;  %s6330_s29 = smov [#allocation2]  }
  0x7f   : > { %p6247_p9 = scmp.ne.s32.totalorder %s370_s14, %s6246_s13  ;;  %s6251_s17 = sshll.u32 %s6330_s29, 4  ;;  %s6252_s17 = int_to_ptr.vmem [resolvable:$false] %s6251_s17 }
  0x80   : > { %s6253_s30 = scalar_lea.vmem %s6252_s17, 256  ;;  %p6254_p12 = scmp.lt.s32.totalorder %s370_s14, %s6252_s17 }
  0x81   : > { %p6249_p11 = pnand %p6247_p9, %p6235_p13  ;;  %p6255_p0 = scmp.lt.s32.totalorder %s6253_s30, %s6246_s13 }
  0x83   : > { %p6250_p1 = pneg %p6249_p11  ;;  %p6256_p10 = por %p6255_p0, %p6254_p12 }
  0x85   : > { %p6257_p3 = pnand %p6256_p10, %p6250_p1 }
  0x87   : > { %6260 = shalt.err (!%p6257_p3)
}
  0x88   : > { %5312 = dma.hbm_to_vmem [thread:$0]  (!%p6524_p5), %s6522_s21, 128, %s370_s14, %s359_s23  }
  0x89   : > { %p7301_p2 = scmp.ne.s32.totalorder %s7296_s16, 0 }
  0x8b   : > { %378 = sbr.rel (%p7301_p2) target bundleno = 4341 (0x10f5), region = 56 }
  0x90   : > { %s380_s26 = sand.u32 1, %s6303_s10   ;;  %p7302_p13 = scmp.ne.s32.totalorder %s7299_s28, 0 }
  0x91   : > { %s4713_s12 = sshll.u32 %s380_s26, 3  ;;  %s381_s22 = scalar_lea.sflag [#allocation3], %s380_s26 }
  0x92   : > { %s384_s18 = scalar_lea.vmem [#allocation2], %s4713_s12 }
  0x93   : > { %6278 = dma.done.wait (%p7302_p13), %s381_s22, 128  }
  0x94   : > { %6280 = vsyncadd (%p7302_p13), %s381_s22, 4294967168  ;;  %p7303_p1 = scmp.eq.s32.totalorder %s6405_s15, 0 }
  0x96   : > { %6282 = dma.done.wait (%p7303_p1), [#allocation5], 1408   ;;  %p7304_p3 = pmov %p7303_p1 }
  0x97   : > { %p7305_p10 = pmov %p7303_p1 }
  0x98   : > { %6284 = vsyncadd (%p7304_p3), [#allocation5], 4294965888 }
  0x99   : > { %6286 = dma.done.wait (%p7305_p10), [#allocation8], 4096   ;;  %p7306_p5 = pmov %p7303_p1 }
  0x9a   : > { %p7307_p6 = pmov %p7303_p1 }
  0x9b   : > { %6288 = vsyncadd (%p7306_p5), [#allocation8], 4294963200 }
  0x9c   : > { %6290 = dma.done.wait (%p7307_p6), [#allocation11], 8192   ;;  %p7308_p4 = pmov %p7303_p1 }
  0x9d   : > { %p7309_p7 = pmov %p7303_p1 }
  0x9e   : > { %6292 = vsyncadd (%p7308_p4), [#allocation11], 4294959104 }
  0x9f   : > { %6294 = dma.done.wait (%p7309_p7), [#allocation14], 1024   ;;  %p7310_p8 = pmov %p7303_p1 }
  0xa0   : > { %v7290_v0 = vmov 0.0   ;;  %vm6332_vm0 = vmmov 0   ;;  %v5758_v1 = vld [vmem:[%s7277_s3] sm:$0xff]   ;;  %vm465_vm1 = vcmask 130048   ;;  %v526_v4 = vld [vmem:[#allocation4] sm:$0xff]  ;;  %v527_v13 = vld [vmem:[#allocation4 + $0x8] sm:$0xff] }
  0xa1   : > { %6296 = vsyncadd (%p7310_p8), [#allocation14], 4294966272  ;;  %5039 = vmatprep.subr.bf16.mxu0 %v7290_v0  ;;  %5041 = vmatprep.mubr.msk.bf16.mxu0 %vm6332_vm0, %v7290_v0  ;;  %v453_v2 = vld [vmem:[%s384_s18] sm:$0xff]  ;;  %v5761_v23 = vld [vmem:[#allocation7 + $0xa8] ss:$12 sps:$4 sm:$0xff]   ;;  %v7292_v46 = vmov 0  }
  0xa2   : > { %5040 = vmatpush3.bf16.msra.mxu0 %v5758_v1  ;;  %v455_v3 = vpack.c.bf16 %v453_v2, %v453_v2  ;;  %528 = vadd.xlane.f32.xlu1 %v526_v4  ;;  %v458_v5 = vld [vmem:[#allocation6] ss:$0 sm:$0xff]  ;;  %v454_v7 = vld [vmem:[#allocation4 + $0x10] sm:$0xff]  ;;  %v522_v30 = vld [vmem:[#allocation6 + $0x1] ss:$0 sm:$0xff]  ;;  %vm2224_vm2 = vcmask 195584  }
  0xa3   : > { %v5759_v22 = vld [vmem:[#allocation7 + $0xac] ss:$12 sps:$4 sm:$0xff]   ;;  %v524_v32 = vld [vmem:[#allocation6 + $0x2] ss:$0 sm:$0xff]  ;;  %v5764_v38 = vld [vmem:[#allocation7 + $0x90] ss:$12 sps:$4 sm:$0xff]   ;;  %781 = vmatprep.mubr.bf16.mxu1 %v7292_v46 }
  0xa4   : > { %749 = vmatprep.subr.bf16.mxu1 %v5759_v22  ;;  %v5762_v37 = vld [vmem:[#allocation7 + $0x94] ss:$12 sps:$4 sm:$0xff]   ;;  %v5765_v39 = vld [vmem:[#allocation7 + $0x7c] ss:$12 sps:$4 sm:$0xff]   ;;  %v5767_v40 = vld [vmem:[#allocation7 + $0x78] ss:$12 sps:$4 sm:$0xff]  }
  0xa5   : > { %5042 = vmatmul.mubr.msk.bf16.vlgmr.msra.gmra.mxu0 %vm465_vm1, %v455_v3  ;;  %750 = vmatpush1.bf16.msra.mxu1 %v5761_v23  ;;  %v5768_v41 = vld [vmem:[#allocation7 + $0x64] ss:$12 sps:$4 sm:$0xff]   ;;  %v5770_v42 = vld [vmem:[#allocation7 + $0x60] ss:$12 sps:$4 sm:$0xff]   ;;  %v5773_v44 = vld [vmem:[#allocation7 + $0x48] ss:$12 sps:$4 sm:$0xff]  }
  0xa6   : > { %530 = vadd.xlane.f32.xlu1 %v527_v13  ;;  %751 = vmatprep.subr.bf16.mxu1 %v5762_v37  ;;  %v5771_v43 = vld [vmem:[#allocation7 + $0x4c] ss:$12 sps:$4 sm:$0xff]   ;;  %v5774_v45 = vld [vmem:[#allocation7 + $0x34] ss:$12 sps:$4 sm:$0xff]   ;;  %v5776_v47 = vld [vmem:[#allocation7 + $0x30] ss:$12 sps:$4 sm:$0xff]  }
  0xa7   : > { %v5777_v48 = vld [vmem:[#allocation7 + $0x1c] ss:$12 sps:$4 sm:$0xff]   ;;  %v5779_v49 = vld [vmem:[#allocation7 + $0x18] ss:$12 sps:$4 sm:$0xff]   ;;  %v5782_v51 = vld [vmem:[#allocation7] ss:$12 sps:$4 sm:$0xff]  }
  0xa8   : > { %v5780_v50 = vld [vmem:[#allocation7 + $0x4] ss:$12 sps:$4 sm:$0xff]   ;;  %v5785_v2 = vld [vmem:[#allocation7 + $0x80] ss:$12 sps:$4 sm:$0xff]   ;;  %vm2527_vm3 = vcmask 1043456   ;;  %p447_p9 = scmp.lt.s32.totalorder %s6405_s15, 1 }
  0xa9   : > { %752 = vmatpush1.bf16.msra.mxu1 %v5764_v38  ;;  %v5783_v52 = vld [vmem:[#allocation7 + $0xb0] ss:$12 sps:$4 sm:$0xff]   ;;  %v5784_v53 = vld [vmem:[#allocation7 + $0x98] ss:$12 sps:$4 sm:$0xff]  }
  0xaa   : > { %753 = vmatprep.subr.bf16.mxu1 %v5765_v39  ;;  %5045 = vmatprep.subr.bf16.mxu0 %v5783_v52  ;;  %s7323_s15 = smov (!%p447_p9, %s6405_s15), 1 }
  0xab   : > { %5046 = vmatpush3.bf16.msra.mxu0 %v5783_v52  ;;  %s4887_s21 = sshll.u32 %s7323_s15, 4 }
  0xac   : > { %5047 = vmatprep.subr.bf16.mxu0 %v5784_v53  ;;  %s451_s23 = scalar_lea.vmem %s7283_s9, %s4887_s21 }
  0xad   : > { %754 = vmatpush1.bf16.msra.mxu1 %v5767_v40 }
  0xae   : > { %755 = vmatprep.subr.bf16.mxu1 %v5768_v41 }
  0xaf   : > { %5048 = vmatpush3.bf16.msra.mxu0 %v5784_v53 }
  0xb0   : > { %5049 = vmatprep.subr.bf16.mxu0 %v5785_v2 }
  0xb1   : > { %756 = vmatpush1.bf16.msra.mxu1 %v5770_v42 }
  0xb2   : > { %757 = vmatprep.subr.bf16.mxu1 %v5771_v43 }
  0xb3   : > { %5050 = vmatpush3.bf16.msra.mxu0 %v5785_v2 }
  0xb5   : > { %758 = vmatpush1.bf16.msra.mxu1 %v5773_v44 }
  0xb6   : > { %759 = vmatprep.subr.bf16.mxu1 %v5774_v45 }
  0xb9   : > { %760 = vmatpush1.bf16.msra.mxu1 %v5776_v47 }
  0xba   : > { %761 = vmatprep.subr.bf16.mxu1 %v5777_v48 }
  0xbd   : > { %762 = vmatpush1.bf16.msra.mxu1 %v5779_v49 }
  0xbe   : > { %763 = vmatprep.subr.bf16.mxu1 %v5780_v50 }
  0xc1   : > { %764 = vmatpush1.bf16.msra.mxu1 %v5782_v51 }
 0x12b   : > { %v529_v14 = vpop.xlane.xlu1 %528 }
 0x12c   : > { %v534_v15 = vmul.f32 0.0078125, %v529_v14 }
 0x12e   : > { %v6572_v16 = vsub.f32 %v526_v4, %v534_v15  ;;  %v561_v4 = vld [vmem:[#allocation6 + $0x3] ss:$0 sm:$0xff] }
 0x12f   : > { %v531_v27 = vpop.xlane.xlu1 %530 }
 0x130   : > { %v540_v17 = vmul.f32 %v6572_v16, %v6572_v16  ;;  %v535_v28 = vmul.f32 0.0078125, %v531_v27 }
 0x132   : > { %543 = vadd.xlane.f32.xlu1 %v540_v17  ;;  %v6576_v34 = vsub.f32 %v527_v13, %v535_v28  ;;  %v5790_v17 = vld [vmem:[#allocation7 + $0x8] ss:$12 sps:$4 sm:$0xff]  }
 0x134   : > { %v541_v36 = vmul.f32 %v6576_v34, %v6576_v34 }
 0x165   : > { %v503_v6 = vpop.f32.mrf.mxu0 }
 0x166   : > { %v504_v8 = vadd.f32 %v503_v6, %v458_v5  ;;  %v5786_v5 = vld [vmem:[#allocation7 + $0x68] ss:$12 sps:$4 sm:$0xff]   ;;  %v5787_v6 = vld [vmem:[#allocation7 + $0x50] ss:$12 sps:$4 sm:$0xff]  }
 0x167   : > { %v5043_v9 = vpop.f32.mrf.mxu0  ;;  %5051 = vmatprep.subr.bf16.mxu0 %v5786_v5 }
 0x168   : > { %v509_v10 = vadd.f32 %v504_v8, %v454_v7  ;;  %5052 = vmatpush3.bf16.msra.mxu0 %v5786_v5 }
 0x169   : > { %v506_v11 = vpop.f32.mrf.mxu0  ;;  %5053 = vmatprep.subr.bf16.mxu0 %v5787_v6 }
 0x16a   : > { %510 = vadd.xlane.f32.xlu0 %v509_v10 }
 0x16b   : > { %v5044_v12 = vpop.f32.mrf.mxu0 }
 0x16c   : > { %v5788_v12 = vld [vmem:[#allocation7 + $0x38] ss:$12 sps:$4 sm:$0xff]   ;;  %5054 = vmatpush3.bf16.msra.mxu0 %v5787_v6 }
 0x16d   : > { %5055 = vmatprep.subr.bf16.mxu0 %v5788_v12 }
 0x170   : > { %5056 = vmatpush3.bf16.msra.mxu0 %v5788_v12 }
 0x1bb   : > { %v544_v54 = vpop.xlane.xlu1 %543 }
 0x1bc   : > { %v549_v55 = vmul.f32 0.0078125, %v544_v54 }
 0x1be   : > { %v552_v56 = vadd.f32 1e-05, %v549_v55 }
 0x1f3   : > { %v511_v18 = vpop.xlane.xlu0 %510 }
 0x1f4   : > { %v513_v19 = vmul.f32 0.0078125, %v511_v18 }
 0x1f6   : > { %v514_v20 = vsub.f32 %v509_v10, %v513_v19  ;;  %v565_v10 = vld [vmem:[#allocation6 + $0x4] ss:$0 sm:$0xff] }
 0x1f8   : > { %v515_v21 = vmul.f32 %v514_v20, %v514_v20 }
 0x1fa   : > { %516 = vadd.xlane.f32.xlu0 %v515_v21 }
 0x283   : > { %v517_v24 = vpop.xlane.xlu0 %516 }
 0x284   : > { %v518_v25 = vmul.f32 0.0078125, %v517_v24 }
 0x286   : > { %v519_v26 = vadd.f32 1e-05, %v518_v25 }
 0x288   : > { %5887 = vrsqrt.f32 %v519_v26  ;;  %v606_v26 = vlaneseq }
 0x289   : > { %5889 = vrsqrt.f32 %v552_v56 }
 0x28a   : > { %v6588_v27 = vshrl.u32 %v606_v26, 7 }
 0x28c   : > { %7311 = vst [vmem:[#allocation20_spill] sm:$0xff] %v6588_v27  ;;  %v7289_v28 = vsub.s32 0, %v6588_v27 }
 0x295   : > { %v5888_v29 = vpop.eup %5887 }
 0x296   : > { %v521_v31 = vmul.f32 %v5888_v29, %v514_v20  ;;  %v5890_v1 = vpop.eup %5889  ;;  %v7287_v29 = vsub.s32 1, %v6588_v27 }
 0x297   : > { %v558_v3 = vmul.f32 %v5890_v1, %v6572_v16  ;;  %v5789_v16 = vld [vmem:[#allocation7 + $0x20] ss:$12 sps:$4 sm:$0xff]  }
 0x298   : > { %v523_v33 = vmul.f32 %v522_v30, %v521_v31  ;;  %5057 = vmatprep.subr.bf16.mxu0 %v5789_v16  ;;  %v6592_v30 = vld [vmem:[#allocation6 + $0x5] ss:$8 sm:$0x7] }
 0x299   : > { %v562_v9 = vmul.f32 %v561_v4, %v558_v3  ;;  %5058 = vmatpush3.bf16.msra.mxu0 %v5789_v16  ;;  %v609_v31 = vrot.slane %v6592_v30, %v7289_v28 }
 0x29a   : > { %v6578_v35 = vadd.f32 %v524_v32, %v523_v33  ;;  %5059 = vmatprep.subr.bf16.mxu0 %v5790_v17  ;;  %v613_v32 = vrot.slane %v6592_v30, %v7287_v29 }
 0x29b   : > { %v566_v13 = vadd.f32 %v565_v10, %v562_v9 }
 0x29c   : > { %532 = vadd.xlane.f32.xlu0 %v6578_v35 }
 0x29d   : > { %5060 = vmatpush3.bf16.msra.mxu0 %v5790_v17 }
 0x2a0   : > { %545 = vadd.xlane.f32.xlu0 %v541_v36 }
 0x325   : > { %v533_v57 = vpop.xlane.xlu0 %532 }
 0x326   : > { %v536_v58 = vmul.f32 0.0078125, %v533_v57 }
 0x328   : > { %v539_v59 = vsub.f32 %v6578_v35, %v536_v58 }
 0x329   : > { %v546_v60 = vpop.xlane.xlu0 %545 }
 0x32a   : > { %v550_v61 = vmul.f32 0.0078125, %v546_v60  ;;  %v542_v62 = vmul.f32 %v539_v59, %v539_v59 }
 0x32c   : > { %v553_v63 = vadd.f32 1e-05, %v550_v61  ;;  %547 = vadd.xlane.f32.xlu1 %v542_v62 }
 0x32e   : > { %5891 = vrsqrt.f32 %v553_v63 }
 0x33b   : > { %v5892_v7 = vpop.eup %5891 }
 0x33c   : > { %v559_v8 = vmul.f32 %v5892_v7, %v6576_v34 }
 0x33e   : > { %v563_v11 = vmul.f32 %v561_v4, %v559_v8 }
 0x340   : > { %v567_v14 = vadd.f32 %v565_v10, %v563_v11 }
 0x342   : > { %v569_v15 = vpack.c.bf16 %v567_v14, %v566_v13 }
 0x344   : > { %782 = vmatmul.mubr.bf16.vlgmr.msra.gmra.mxu1 %v569_v15  ;;  %5061 = vmatprep.mubr.bf16.mxu0 %v569_v15 }
 0x345   : > { %791 = vmatprep.mubr.bf16.mxu1 %v7292_v46 }
 0x3b5   : > { %v548_v18 = vpop.xlane.xlu1 %547 }
 0x3b6   : > { %v551_v19 = vmul.f32 0.0078125, %v548_v18 }
 0x3b8   : > { %v554_v20 = vadd.f32 1e-05, %v551_v19 }
 0x3ba   : > { %5893 = vrsqrt.f32 %v554_v20 }
 0x3c7   : > { %v5894_v21 = vpop.eup %5893 }
 0x3c8   : > { %v560_v22 = vmul.f32 %v5894_v21, %v539_v59 }
 0x3ca   : > { %v564_v23 = vmul.f32 %v561_v4, %v560_v22 }
 0x3cc   : > { %v568_v24 = vadd.f32 %v565_v10, %v564_v23 }
 0x3ce   : > { %v570_v25 = vpack.c.bf16 %v568_v24, %v568_v24 }
 0x3d0   : > { %792 = vmatmul.mubr.bf16.gmra.mxu1 %v570_v25  ;;  %5062 = vmatmul.mubr.bf16.vlgmr.msra.gmra.mxu0 %v570_v25 }
 0x404   : > { %v783_v33 = vpop.f32.mrf.mxu1 }
 0x405   : > { %v784_v36 = vadd.f32 %v783_v33, %v609_v31 }
 0x406   : > { %v785_v34 = vpop.f32.mrf.mxu1 }
 0x407   : > { %v786_v37 = vadd.f32 %v785_v34, %v613_v32 }
 0x408   : > { %v787_v38 = vpop.f32.mrf.mxu1 }
 0x409   : > { %v5380_v39 = vpack.i.bf16 %v784_v36, %v786_v37  ;;  %v788_v41 = vadd.f32 %v787_v38, %v609_v31 }
 0x40a   : > { %v789_v40 = vpop.f32.mrf.mxu1 }
 0x40b   : > { %v790_v42 = vadd.f32 %v789_v40, %v613_v32  ;;  %5381 = vxpose.xlu0.b32.start [1/3] (short) %v5380_v39, 128 }
 0x40d   : > { %v5382_v43 = vpack.i.bf16 %v788_v41, %v790_v42 }
 0x40f   : > { %5383 = vxpose.xlu0.b32.cont [2/3] (short) %v5382_v43, 128 }
 0x490   : > { %v793_v44 = vpop.f32.mrf.mxu1  ;;  %v6600_v45 = vpop.f32.mrf.mxu0 }
 0x491   : > { %v794_v49 = vadd.f32 %v793_v44, %v609_v31 }
 0x492   : > { %v795_v47 = vpop.f32.mrf.mxu1  ;;  %v6602_v48 = vpop.f32.mrf.mxu0 }
 0x493   : > { %v796_v50 = vadd.f32 %v795_v47, %v613_v32 }
 0x494   : > { %v797_v51 = vpop.f32.mrf.mxu1  ;;  %v5064_v52 = vpop.f32.mrf.mxu0 }
 0x495   : > { %v5384_v53 = vpack.i.bf16 %v794_v49, %v796_v50 }
 0x496   : > { %v798_v54 = vpop.f32.mrf.mxu1 }
 0x497   : > { %5385 = vxpose.xlu0.b32.end [3/3] (short) %v5384_v53, 128 }
 0x50b   : > { %v5386_v55 = vpop.trf.xlu0 }
 0x50c   : > { %v5387_v59 = vunpack.i.l.bf16 %v5386_v55  ;;  %v5390_v4 = vunpack.i.h.bf16 %v5386_v55 }
 0x50f   : > { %v5391_v56 = vpop.trf.xlu0 }
 0x510   : > { %v5392_v62 = vunpack.i.l.bf16 %v5391_v56  ;;  %v5395_v7 = vunpack.i.h.bf16 %v5391_v56 }
 0x513   : > { %v5396_v57 = vpop.trf.xlu0 }
 0x514   : > { %v5397_v58 = vunpack.i.l.bf16 %v5396_v57  ;;  %v5400_v12 = vunpack.i.h.bf16 %v5396_v57 }
 0x516   : > { %v5466_v60 = vpack.i.bf16 %v5397_v58, %v5387_v59 }
 0x517   : > { %v5401_v61 = vpop.trf.xlu0 }
 0x518   : > { %5467 = vxpose.xlu1.b32.start [1/2] (short) (narrow) %v5466_v60, 24  ;;  %v5402_v63 = vunpack.i.l.bf16 %v5401_v61  ;;  %v5405_v16 = vunpack.i.h.bf16 %v5401_v61 }
 0x51a   : > { %v5468_v1 = vpack.i.bf16 %v5402_v63, %v5392_v62 }
 0x51b   : > { %v5406_v2 = vpop.trf.xlu0 }
 0x51c   : > { %5469 = vxpose.xlu1.b32.end [2/2] (short) (narrow) %v5468_v1, 24  ;;  %v5407_v3 = vunpack.i.l.bf16 %v5406_v2  ;;  %v5410_v20 = vunpack.i.h.bf16 %v5406_v2 }
 0x51e   : > { %v5485_v5 = vpack.i.bf16 %v5390_v4, %v5407_v3 }
 0x51f   : > { %v5411_v6 = vpop.trf.xlu0 }
 0x520   : > { %5486 = vxpose.xlu0.b32.start [1/2] (short) (narrow) %v5485_v5, 24  ;;  %v5412_v8 = vunpack.i.l.bf16 %v5411_v6  ;;  %v5415_v24 = vunpack.i.h.bf16 %v5411_v6 }
 0x522   : > { %v5487_v9 = vpack.i.bf16 %v5395_v7, %v5412_v8 }
 0x523   : > { %v5416_v10 = vpop.trf.xlu0 }
 0x524   : > { %5488 = vxpose.xlu0.b32.end [2/2] (short) (narrow) %v5487_v9, 24  ;;  %v5417_v11 = vunpack.i.l.bf16 %v5416_v10  ;;  %v5420_v32 = vunpack.i.h.bf16 %v5416_v10 }
 0x526   : > { %v5504_v13 = vpack.i.bf16 %v5400_v12, %v5417_v11 }
 0x527   : > { %v5421_v14 = vpop.trf.xlu0 }
 0x528   : > { %5505 = vxpose.xlu1.b32.start [1/2] (short) (narrow) %v5504_v13, 24  ;;  %v5422_v15 = vunpack.i.l.bf16 %v5421_v14  ;;  %v5425_v37 = vunpack.i.h.bf16 %v5421_v14 }
 0x52a   : > { %v5506_v17 = vpack.i.bf16 %v5405_v16, %v5422_v15 }
 0x52b   : > { %v5426_v18 = vpop.trf.xlu0 }
 0x52c   : > { %5507 = vxpose.xlu1.b32.end [2/2] (short) (narrow) %v5506_v17, 24  ;;  %v5427_v19 = vunpack.i.l.bf16 %v5426_v18  ;;  %v5430_v39 = vunpack.i.h.bf16 %v5426_v18 }
 0x52e   : > { %v5523_v21 = vpack.i.bf16 %v5410_v20, %v5427_v19 }
 0x52f   : > { %v5431_v22 = vpop.trf.xlu0 }
 0x530   : > { %v5432_v23 = vunpack.i.l.bf16 %v5431_v22  ;;  %v5435_v44 = vunpack.i.h.bf16 %v5431_v22 }
 0x531   : > { %5524 = vxpose.xlu1.b32.start [1/2] (short) (narrow) %v5523_v21, 24 }
 0x532   : > { %v5525_v25 = vpack.i.bf16 %v5415_v24, %v5432_v23 }
 0x533   : > { %v5436_v26 = vpop.trf.xlu0 }
 0x534   : > { %v5437_v31 = vunpack.i.l.bf16 %v5436_v26  ;;  %v5440_v52 = vunpack.i.h.bf16 %v5436_v26 }
 0x535   : > { %5526 = vxpose.xlu1.b32.end [2/2] (short) (narrow) %v5525_v25, 24 }
 0x536   : > { %v5542_v34 = vpack.i.bf16 %v5420_v32, %v5437_v31 }
 0x537   : > { %v5441_v33 = vpop.trf.xlu0 }
 0x538   : > { %v5442_v36 = vunpack.i.l.bf16 %v5441_v33  ;;  %v5445_v54 = vunpack.i.h.bf16 %v5441_v33 }
 0x53a   : > { %5543 = vxpose.xlu1.b32.start [1/2] (short) (narrow) %v5542_v34, 24  ;;  %v5544_v40 = vpack.i.bf16 %v5425_v37, %v5442_v36 }
 0x53b   : > { %v5446_v38 = vpop.trf.xlu0 }
 0x53c   : > { %v5447_v41 = vunpack.i.l.bf16 %v5446_v38  ;;  %v5450_v59 = vunpack.i.h.bf16 %v5446_v38 }
 0x53e   : > { %5545 = vxpose.xlu1.b32.end [2/2] (short) (narrow) %v5544_v40, 24  ;;  %v5561_v43 = vpack.i.bf16 %v5430_v39, %v5447_v41 }
 0x53f   : > { %v5451_v42 = vpop.trf.xlu0 }
 0x540   : > { %v5452_v47 = vunpack.i.l.bf16 %v5451_v42  ;;  %v5455_v60 = vunpack.i.h.bf16 %v5451_v42 }
 0x542   : > { %v5563_v49 = vpack.i.bf16 %v5435_v44, %v5452_v47 }
 0x543   : > { %5562 = vxpose.xlu1.b32.start [1/2] (short) (narrow) %v5561_v43, 24  ;;  %v5456_v50 = vpop.trf.xlu0 }
 0x544   : > { %v5457_v51 = vunpack.i.l.bf16 %v5456_v50  ;;  %v5460_v58 = vunpack.i.h.bf16 %v5456_v50 }
 0x546   : > { %v5580_v56 = vpack.i.bf16 %v5440_v52, %v5457_v51  ;;  %v5599_v62 = vpack.i.bf16 %v5460_v58, %v5450_v59 }
 0x547   : > { %5564 = vxpose.xlu1.b32.end [2/2] (short) (narrow) %v5563_v49, 24  ;;  %v5461_v53 = vpop.trf.xlu0 }
 0x548   : > { %v5462_v55 = vunpack.i.l.bf16 %v5461_v53  ;;  %v5465_v61 = vunpack.i.h.bf16 %v5461_v53 }
 0x54a   : > { %v5582_v57 = vpack.i.bf16 %v5445_v54, %v5462_v55  ;;  %v5601_v63 = vpack.i.bf16 %v5465_v61, %v5455_v60 }
 0x54c   : > { %5581 = vxpose.xlu1.b32.start [1/2] (short) (narrow) %v5580_v56, 24 }
 0x550   : > { %5583 = vxpose.xlu1.b32.end [2/2] (short) (narrow) %v5582_v57, 24 }
 0x555   : > { %5600 = vxpose.xlu1.b32.start [1/2] (short) (narrow) %v5599_v62, 24 }
 0x559   : > { %5602 = vxpose.xlu1.b32.end [2/2] (short) (narrow) %v5601_v63, 24 }
 0x594   : > { %v5470_v1 = vpop.trf.xlu1 }
 0x595   : > { %v5474_v10 = vunpack.i.h.bf16 %v5470_v1  ;;  %v5471_v11 = vunpack.i.l.bf16 %v5470_v1 }
 0x598   : > { %v5475_v2 = vpop.trf.xlu1 }
 0x599   : > { %v5479_v5 = vunpack.i.h.bf16 %v5475_v2  ;;  %v5476_v6 = vunpack.i.l.bf16 %v5475_v2 }
 0x59b   : > { %v1728_v18 = vpack.c.bf16 %v5476_v6, %v5471_v11  ;;  %v1730_v19 = vpack.c.bf16 %v5479_v5, %v5474_v10 }
 0x59c   : > { %v5480_v3 = vpop.trf.xlu1  ;;  %v5489_v4 = vpop.trf.xlu0 }
 0x59d   : > { %v5481_v7 = vunpack.i.l.bf16 %v5480_v3  ;;  %v5484_v8 = vunpack.i.h.bf16 %v5480_v3  ;;  %v5493_v9 = vunpack.i.h.bf16 %v5489_v4  ;;  %v1751_v32 = vsel %vm465_vm1, %v1728_v18, 0 }
 0x59e   : > { %v1811_v33 = vsel %vm465_vm1, %v1730_v19, 0  ;;  %v5490_v37 = vunpack.i.l.bf16 %v5489_v4 }
 0x59f   : > { %v1729_v12 = vpack.c.bf16 %v5481_v7, %v5481_v7  ;;  %v1731_v13 = vpack.c.bf16 %v5484_v8, %v5484_v8 }
 0x5a0   : > { %v5494_v14 = vpop.trf.xlu0 }
 0x5a1   : > { %v5498_v15 = vunpack.i.h.bf16 %v5494_v14  ;;  %5233 = vmatprep.subr.msk.bf16.mxu1 %vm465_vm1, %v1729_v12  ;;  %5235 = vmatprep.subr.msk.bf16.mxu0 %vm465_vm1, %v1731_v13  ;;  %v1754_v16 = vsel %vm465_vm1, %v1729_v12, 0  ;;  %v1814_v17 = vsel %vm465_vm1, %v1731_v13, 0  ;;  %v5495_v41 = vunpack.i.l.bf16 %v5494_v14 }
 0x5a2   : > { %5066 = vmatpush3.bf16.xpose.msra.mxu1 %v1754_v16  ;;  %5074 = vmatpush3.bf16.xpose.msra.mxu0 %v1814_v17 }
 0x5a3   : > { %v1712_v20 = vpack.c.bf16 %v5498_v15, %v5493_v9  ;;  %5234 = vmatprep.subr.msk.bf16.mxu1 %vm465_vm1, %v1728_v18  ;;  %5236 = vmatprep.subr.msk.bf16.mxu0 %vm465_vm1, %v1730_v19  ;;  %v1732_v53 = vpack.c.bf16 %v5495_v41, %v5490_v37 }
 0x5a4   : > { %v5508_v21 = vpop.trf.xlu1  ;;  %v5499_v22 = vpop.trf.xlu0 }
 0x5a5   : > { %5069 = vmatprep.mubr.msk.bf16.mxu1 %vm465_vm1, %v1712_v20  ;;  %v5500_v23 = vunpack.i.l.bf16 %v5499_v22  ;;  %v5512_v24 = vunpack.i.h.bf16 %v5508_v21  ;;  %v5503_v34 = vunpack.i.h.bf16 %v5499_v22  ;;  %v5509_v42 = vunpack.i.l.bf16 %v5508_v21 }
 0x5a6   : > { %v1871_v62 = vsel %vm465_vm1, %v1732_v53, 0 }
 0x5a7   : > { %v1733_v26 = vpack.c.bf16 %v5500_v23, %v5500_v23  ;;  %v1713_v44 = vpack.c.bf16 %v5503_v34, %v5503_v34 }
 0x5a8   : > { %v5513_v25 = vpop.trf.xlu1 }
 0x5a9   : > { %v5517_v31 = vunpack.i.h.bf16 %v5513_v25  ;;  %v5514_v43 = vunpack.i.l.bf16 %v5513_v25  ;;  %v1874_v51 = vsel %vm465_vm1, %v1733_v26, 0 }
 0x5aa   : > { %5068 = vmatpush3.bf16.xpose.msra.mxu1 %v1751_v32  ;;  %5076 = vmatpush3.bf16.xpose.msra.mxu0 %v1811_v33 }
 0x5ab   : > { %v1714_v36 = vpack.c.bf16 %v5517_v31, %v5512_v24  ;;  %5237 = vmatprep.subr.msk.bf16.mxu1 %vm465_vm1, %v1733_v26  ;;  %v1734_v54 = vpack.c.bf16 %v5514_v43, %v5509_v42 }
 0x5ac   : > { %v5518_v38 = vpop.trf.xlu1 }
 0x5ad   : > { %v5522_v39 = vunpack.i.h.bf16 %v5518_v38  ;;  %5077 = vmatprep.mubr.msk.bf16.mxu0 %vm465_vm1, %v1714_v36  ;;  %v5519_v40 = vunpack.i.l.bf16 %v5518_v38  ;;  %v1931_v63 = vsel %vm465_vm1, %v1734_v54, 0 }
 0x5af   : > { %v1715_v47 = vpack.c.bf16 %v5522_v39, %v5522_v39  ;;  %v1735_v49 = vpack.c.bf16 %v5519_v40, %v5519_v40 }
 0x5b0   : > { %v5527_v50 = vpop.trf.xlu1 }
 0x5b1   : > { %5239 = vmatprep.subr.msk.bf16.mxu0 %vm465_vm1, %v1735_v49  ;;  %5070 = vmatmul.mubr.msk.bf16.vlgmr.msra.gmra.mxu1 %vm465_vm1, %v1713_v44  ;;  %v1934_v52 = vsel %vm465_vm1, %v1735_v49, 0  ;;  %v5531_v55 = vunpack.i.h.bf16 %v5527_v50  ;;  %v5528_v2 = vunpack.i.l.bf16 %v5527_v50 }
 0x5b2   : > { %5078 = vmatmul.mubr.msk.bf16.vlgmr.msra.gmra.mxu0 %vm465_vm1, %v1715_v47  ;;  %5082 = vmatpush3.bf16.xpose.msra.mxu1 %v1874_v51 }
 0x5b3   : > { %5090 = vmatpush3.bf16.xpose.msra.mxu0 %v1934_v52  ;;  %5238 = vmatprep.subr.msk.bf16.mxu1 %vm465_vm1, %v1732_v53 }
 0x5b4   : > { %5240 = vmatprep.subr.msk.bf16.mxu0 %vm465_vm1, %v1734_v54  ;;  %v5532_v56 = vpop.trf.xlu1 }
 0x5b5   : > { %v5536_v57 = vunpack.i.h.bf16 %v5532_v56  ;;  %v5533_v3 = vunpack.i.l.bf16 %v5532_v56 }
 0x5b7   : > { %v1716_v58 = vpack.c.bf16 %v5536_v57, %v5531_v55  ;;  %v1736_v9 = vpack.c.bf16 %v5533_v3, %v5528_v2 }
 0x5b8   : > { %v5537_v59 = vpop.trf.xlu1 }
 0x5b9   : > { %5085 = vmatprep.mubr.msk.bf16.mxu1 %vm465_vm1, %v1716_v58  ;;  %v5538_v60 = vunpack.i.l.bf16 %v5537_v59  ;;  %v5541_v61 = vunpack.i.h.bf16 %v5537_v59  ;;  %v1991_v20 = vsel %vm465_vm1, %v1736_v9, 0 }
 0x5ba   : > { %5084 = vmatpush3.bf16.xpose.msra.mxu1 %v1871_v62 }
 0x5bb   : > { %5092 = vmatpush3.bf16.xpose.msra.mxu0 %v1931_v63  ;;  %v1737_v1 = vpack.c.bf16 %v5538_v60, %v5538_v60  ;;  %v1717_v5 = vpack.c.bf16 %v5541_v61, %v5541_v61 }
 0x5bc   : > { %v5546_v4 = vpop.trf.xlu1 }
 0x5bd   : > { %5241 = vmatprep.subr.msk.bf16.mxu1 %vm465_vm1, %v1737_v1  ;;  %v5550_v6 = vunpack.i.h.bf16 %v5546_v4  ;;  %v1994_v8 = vsel %vm465_vm1, %v1737_v1, 0  ;;  %v5547_v12 = vunpack.i.l.bf16 %v5546_v4 }
 0x5c0   : > { %v5551_v7 = vpop.trf.xlu1 }
 0x5c1   : > { %v5555_v10 = vunpack.i.h.bf16 %v5551_v7  ;;  %5086 = vmatmul.mubr.msk.bf16.vlgmr.msra.gmra.mxu1 %vm465_vm1, %v1717_v5  ;;  %v5552_v13 = vunpack.i.l.bf16 %v5551_v7 }
 0x5c2   : > { %5098 = vmatpush3.bf16.xpose.msra.mxu1 %v1994_v8 }
 0x5c3   : > { %v1718_v11 = vpack.c.bf16 %v5555_v10, %v5550_v6  ;;  %5242 = vmatprep.subr.msk.bf16.mxu1 %vm465_vm1, %v1736_v9  ;;  %v1738_v21 = vpack.c.bf16 %v5552_v13, %v5547_v12 }
 0x5c4   : > { %v5556_v14 = vpop.trf.xlu1 }
 0x5c5   : > { %v5560_v15 = vunpack.i.h.bf16 %v5556_v14  ;;  %5093 = vmatprep.mubr.msk.bf16.mxu0 %vm465_vm1, %v1718_v11  ;;  %v5557_v16 = vunpack.i.l.bf16 %v5556_v14  ;;  %v2051_v34 = vsel %vm465_vm1, %v1738_v21, 0  ;;  %v6652_v11 = vpop.f32.mrf.mxu0 }
 0x5c7   : > { %v1719_v17 = vpack.c.bf16 %v5560_v15, %v5560_v15  ;;  %v1739_v18 = vpack.c.bf16 %v5557_v16, %v5557_v16 }
 0x5c8   : > { %v5565_v19 = vpop.trf.xlu1 }
 0x5c9   : > { %5094 = vmatmul.mubr.msk.bf16.vlgmr.msra.gmra.mxu0 %vm465_vm1, %v1719_v17  ;;  %5243 = vmatprep.subr.msk.bf16.mxu0 %vm465_vm1, %v1739_v18  ;;  %v2054_v22 = vsel %vm465_vm1, %v1739_v18, 0  ;;  %v5569_v23 = vunpack.i.h.bf16 %v5565_v19  ;;  %v5566_v31 = vunpack.i.l.bf16 %v5565_v19 }
 0x5ca   : > { %5100 = vmatpush3.bf16.xpose.msra.mxu1 %v1991_v20  ;;  %5106 = vmatpush3.bf16.xpose.msra.mxu0 %v2054_v22 }
 0x5cb   : > { %5244 = vmatprep.subr.msk.bf16.mxu0 %vm465_vm1, %v1738_v21 }
 0x5cc   : > { %v5570_v24 = vpop.trf.xlu1 }
 0x5cd   : > { %v5574_v25 = vunpack.i.h.bf16 %v5570_v24  ;;  %v5571_v32 = vunpack.i.l.bf16 %v5570_v24 }
 0x5cf   : > { %v1720_v26 = vpack.c.bf16 %v5574_v25, %v5569_v23  ;;  %v1740_v41 = vpack.c.bf16 %v5571_v32, %v5566_v31 }
 0x5d0   : > { %v5575_v33 = vpop.trf.xlu1 }
 0x5d1   : > { %v5579_v36 = vunpack.i.h.bf16 %v5575_v33  ;;  %v5576_v37 = vunpack.i.l.bf16 %v5575_v33  ;;  %5101 = vmatprep.mubr.msk.bf16.mxu1 %vm465_vm1, %v1720_v26  ;;  %v2111_v53 = vsel %vm465_vm1, %v1740_v41, 0 }
 0x5d2   : > { %5108 = vmatpush3.bf16.xpose.msra.mxu0 %v2051_v34 }
 0x5d3   : > { %v1721_v38 = vpack.c.bf16 %v5579_v36, %v5579_v36  ;;  %v1741_v39 = vpack.c.bf16 %v5576_v37, %v5576_v37 }
 0x5d4   : > { %v5584_v40 = vpop.trf.xlu1 }
 0x5d5   : > { %5102 = vmatmul.mubr.msk.bf16.vlgmr.msra.gmra.mxu1 %vm465_vm1, %v1721_v38  ;;  %5245 = vmatprep.subr.msk.bf16.mxu1 %vm465_vm1, %v1741_v39  ;;  %v2114_v42 = vsel %vm465_vm1, %v1741_v39, 0  ;;  %v5588_v43 = vunpack.i.h.bf16 %v5584_v40  ;;  %v5585_v50 = vunpack.i.l.bf16 %v5584_v40 }
 0x5d6   : > { %5114 = vmatpush3.bf16.xpose.msra.mxu1 %v2114_v42 }
 0x5d7   : > { %5246 = vmatprep.subr.msk.bf16.mxu1 %vm465_vm1, %v1740_v41 }
 0x5d8   : > { %v5589_v44 = vpop.trf.xlu1 }
 0x5d9   : > { %v5593_v47 = vunpack.i.h.bf16 %v5589_v44  ;;  %v5590_v51 = vunpack.i.l.bf16 %v5589_v44 }
 0x5db   : > { %v1722_v49 = vpack.c.bf16 %v5593_v47, %v5588_v43  ;;  %v1742_v59 = vpack.c.bf16 %v5590_v51, %v5585_v50 }
 0x5dc   : > { %v5594_v52 = vpop.trf.xlu1 }
 0x5dd   : > { %v5598_v54 = vunpack.i.h.bf16 %v5594_v52  ;;  %v5595_v55 = vunpack.i.l.bf16 %v5594_v52  ;;  %5109 = vmatprep.mubr.msk.bf16.mxu0 %vm465_vm1, %v1722_v49  ;;  %v2171_v6 = vsel %vm465_vm1, %v1742_v59, 0 }
 0x5de   : > { %5116 = vmatpush3.bf16.xpose.msra.mxu1 %v2111_v53 }
 0x5df   : > { %v1723_v56 = vpack.c.bf16 %v5598_v54, %v5598_v54  ;;  %v1743_v57 = vpack.c.bf16 %v5595_v55, %v5595_v55 }
 0x5e0   : > { %v5603_v58 = vpop.trf.xlu1 }
 0x5e1   : > { %5110 = vmatmul.mubr.msk.bf16.vlgmr.msra.gmra.mxu0 %vm465_vm1, %v1723_v56  ;;  %5247 = vmatprep.subr.msk.bf16.mxu0 %vm465_vm1, %v1743_v57  ;;  %v2174_v60 = vsel %vm465_vm1, %v1743_v57, 0  ;;  %v5607_v61 = vunpack.i.h.bf16 %v5603_v58  ;;  %v5604_v62 = vunpack.i.l.bf16 %v5603_v58 }
 0x5e2   : > { %5122 = vmatpush3.bf16.xpose.msra.mxu0 %v2174_v60 }
 0x5e3   : > { %5248 = vmatprep.subr.msk.bf16.mxu0 %vm465_vm1, %v1742_v59 }
 0x5e4   : > { %v5608_v63 = vpop.trf.xlu1 }
 0x5e5   : > { %v5612_v1 = vunpack.i.h.bf16 %v5608_v63  ;;  %v5609_v2 = vunpack.i.l.bf16 %v5608_v63 }
 0x5e7   : > { %v1724_v3 = vpack.c.bf16 %v5609_v2, %v5604_v62  ;;  %v1726_v4 = vpack.c.bf16 %v5612_v1, %v5607_v61 }
 0x5e8   : > { %v5613_v5 = vpop.trf.xlu1 }
 0x5e9   : > { %v5614_v7 = vunpack.i.l.bf16 %v5613_v5  ;;  %5117 = vmatprep.mubr.msk.bf16.mxu1 %vm465_vm1, %v1724_v3  ;;  %5125 = vmatprep.mubr.msk.bf16.mxu0 %vm465_vm1, %v1726_v4  ;;  %v5617_v8 = vunpack.i.h.bf16 %v5613_v5 }
 0x5ea   : > { %5124 = vmatpush3.bf16.xpose.msra.mxu0 %v2171_v6 }
 0x5eb   : > { %v1725_v9 = vpack.c.bf16 %v5614_v7, %v5614_v7  ;;  %v1727_v10 = vpack.c.bf16 %v5617_v8, %v5617_v8 }
 0x5ed   : > { %5118 = vmatmul.mubr.msk.bf16.vlgmr.msra.gmra.mxu1 %vm465_vm1, %v1725_v9 }
 0x5f1   : > { %5126 = vmatmul.mubr.msk.bf16.vlgmr.msra.gmra.mxu0 %vm465_vm1, %v1727_v10 }
 0x671   : > { %v6654_v12 = vpop.f32.mrf.mxu1 }
 0x672   : > { %v6656_v13 = vpop.f32.mrf.mxu0  ;;  %v2231_v14 = vsel %vm2224_vm2, %v6654_v12, -inf }
 0x673   : > { %2232 = vmax.xlane.f32.xlu1 %v2231_v14  ;;  %v6660_v15 = vpop.f32.mrf.mxu1  ;;  %v2240_v23 = vsel %vm2224_vm2, %v6656_v13, -inf }
 0x674   : > { %v6662_v16 = vpop.f32.mrf.mxu0  ;;  %v2225_v19 = vsel %vm2224_vm2, %v6660_v15, -inf }
 0x675   : > { %v5072_v17 = vpop.f32.mrf.mxu1  ;;  %v2234_v25 = vsel %vm2224_vm2, %v6662_v16, -inf }
 0x676   : > { %v5080_v18 = vpop.f32.mrf.mxu0 }
 0x677   : > { %2226 = vmax.xlane.f32.xlu1 %v2225_v19  ;;  %v6666_v20 = vpop.f32.mrf.mxu1 }
 0x678   : > { %v2228_v21 = vsel %vm2224_vm2, %v6666_v20, -inf  ;;  %v6670_v22 = vpop.f32.mrf.mxu0 }
 0x679   : > { %2229 = vmax.xlane.f32.xlu0 %v2228_v21  ;;  %v2237_v24 = vsel %vm2224_vm2, %v6670_v22, -inf }
 0x67b   : > { %2241 = vmax.xlane.f32.xlu1 %v2240_v23 }
 0x67d   : > { %2238 = vmax.xlane.f32.xlu0 %v2237_v24 }
 0x67f   : > { %2235 = vmax.xlane.f32.xlu1 %v2234_v25 }
 0x681   : > { %v6678_v26 = vpop.f32.mrf.mxu1 }
 0x682   : > { %v2249_v31 = vsel %vm2224_vm2, %v6678_v26, -inf }
 0x683   : > { %v6682_v32 = vpop.f32.mrf.mxu1  ;;  %2250 = vmax.xlane.f32.xlu0 %v2249_v31 }
 0x684   : > { %v2243_v33 = vsel %vm2224_vm2, %v6682_v32, -inf }
 0x685   : > { %v5088_v34 = vpop.f32.mrf.mxu1 }
 0x687   : > { %v6686_v36 = vpop.f32.mrf.mxu1  ;;  %2244 = vmax.xlane.f32.xlu0 %v2243_v33 }
 0x688   : > { %v2246_v37 = vsel %vm2224_vm2, %v6686_v36, -inf }
 0x689   : > { %v6690_v38 = vpop.f32.mrf.mxu0  ;;  %2247 = vmax.xlane.f32.xlu1 %v2246_v37 }
 0x68a   : > { %v2258_v40 = vsel %vm2224_vm2, %v6690_v38, -inf }
 0x68b   : > { %v6692_v39 = vpop.f32.mrf.mxu0 }
 0x68c   : > { %v2252_v43 = vsel %vm2224_vm2, %v6692_v39, -inf }
 0x68d   : > { %v5096_v41 = vpop.f32.mrf.mxu0  ;;  %2259 = vmax.xlane.f32.xlu1 %v2258_v40 }
 0x68f   : > { %v6696_v42 = vpop.f32.mrf.mxu0 }
 0x690   : > { %v2255_v44 = vsel %vm2224_vm2, %v6696_v42, -inf }
 0x691   : > { %2256 = vmax.xlane.f32.xlu0 %v2255_v44  ;;  %2253 = vmax.xlane.f32.xlu1 %v2252_v43 }
 0x695   : > { %v6702_v47 = vpop.f32.mrf.mxu1 }
 0x696   : > { %v2267_v49 = vsel %vm2224_vm2, %v6702_v47, -inf }
 0x697   : > { %v6706_v50 = vpop.f32.mrf.mxu1  ;;  %2268 = vmax.xlane.f32.xlu0 %v2267_v49 }
 0x698   : > { %v2261_v51 = vsel %vm2224_vm2, %v6706_v50, -inf }
 0x699   : > { %v5104_v52 = vpop.f32.mrf.mxu1 }
 0x69b   : > { %v6710_v53 = vpop.f32.mrf.mxu1  ;;  %2262 = vmax.xlane.f32.xlu0 %v2261_v51 }
 0x69c   : > { %v2264_v54 = vsel %vm2224_vm2, %v6710_v53, -inf }
 0x69d   : > { %2265 = vmax.xlane.f32.xlu1 %v2264_v54 }
 0x6a1   : > { %v6714_v55 = vpop.f32.mrf.mxu0 }
 0x6a2   : > { %v2276_v56 = vsel %vm2224_vm2, %v6714_v55, -inf }
 0x6a3   : > { %2277 = vmax.xlane.f32.xlu1 %v2276_v56  ;;  %v6718_v57 = vpop.f32.mrf.mxu0 }
 0x6a4   : > { %v2270_v58 = vsel %vm2224_vm2, %v6718_v57, -inf }
 0x6a5   : > { %v5112_v59 = vpop.f32.mrf.mxu0 }
 0x6a7   : > { %2271 = vmax.xlane.f32.xlu1 %v2270_v58  ;;  %v6722_v60 = vpop.f32.mrf.mxu0 }
 0x6a8   : > { %v2273_v61 = vsel %vm2224_vm2, %v6722_v60, -inf }
 0x6a9   : > { %2274 = vmax.xlane.f32.xlu0 %v2273_v61 }
 0x6ad   : > { %v6726_v62 = vpop.f32.mrf.mxu1 }
 0x6ae   : > { %v2285_v63 = vsel %vm2224_vm2, %v6726_v62, -inf }
 0x6af   : > { %v6730_v1 = vpop.f32.mrf.mxu1  ;;  %2286 = vmax.xlane.f32.xlu0 %v2285_v63 }
 0x6b0   : > { %v2279_v2 = vsel %vm2224_vm2, %v6730_v1, -inf }
 0x6b1   : > { %v5120_v3 = vpop.f32.mrf.mxu1  ;;  %v6734_v4 = vpop.f32.mrf.mxu0 }
 0x6b3   : > { %v2153_v5 = vpop.f32.mrf.mxu1  ;;  %2280 = vmax.xlane.f32.xlu0 %v2279_v2  ;;  %v6736_v6 = vpop.f32.mrf.mxu0 }
 0x6b4   : > { %v2282_v7 = vsel %vm2224_vm2, %v2153_v5, -inf }
 0x6b5   : > { %2283 = vmax.xlane.f32.xlu1 %v2282_v7  ;;  %v5128_v8 = vpop.f32.mrf.mxu0 }
 0x6b7   : > { %v6739_v9 = vpop.f32.mrf.mxu0 }
 0x6b8   : > { %v2291_v10 = vsel %vm2224_vm2, %v6739_v9, -inf }
 0x6b9   : > { %2292 = vmax.xlane.f32.xlu0 %v2291_v10 }
 0x6fc   : > { %v2233_v14 = vpop.xlane.xlu1 %2232 }
 0x6fd   : > { %v2299_v17 = vsub.f32 %v6654_v12, %v2233_v14 }
 0x6ff   : > { %v2325_v18 = vmul.f32 1.442695, %v2299_v17 }
 0x700   : > { %v2227_v19 = vpop.xlane.xlu1 %2226 }
 0x701   : > { %5895 = vpow2.f32 %v2325_v18  ;;  %v2297_v21 = vsub.f32 %v6660_v15, %v2227_v19 }
 0x702   : > { %v6745_v23 = vpop.xlane.xlu0 %2229 }
 0x703   : > { %v2321_v24 = vmul.f32 1.442695, %v2297_v21 }
 0x704   : > { %v2242_v52 = vpop.xlane.xlu1 %2241 }
 0x705   : > { %5897 = vpow2.f32 %v2321_v24 }
 0x706   : > { %v2239_v25 = vpop.xlane.xlu0 %2238 }
 0x707   : > { %v2301_v31 = vsub.f32 %v6670_v22, %v2239_v25  ;;  %v7288_v22 = vsub.s32 2, %v6588_v27 }
 0x708   : > { %v2236_v54 = vpop.xlane.xlu1 %2235 }
 0x709   : > { %v2329_v33 = vmul.f32 1.442695, %v2301_v31  ;;  %v617_v43 = vrot.slane %v6592_v30, %v7288_v22 }
 0x70b   : > { %5899 = vpow2.f32 %v2329_v33  ;;  %v835_v44 = vadd.f32 %v6602_v48, %v617_v43  ;;  %v838_v49 = vadd.f32 %v6652_v11, %v617_v43  ;;  %v843_v51 = vadd.f32 %v6600_v45, %v617_v43 }
 0x70c   : > { %v6777_v48 = vpop.xlane.xlu0 %2250 }
 0x70e   : > { %v6748_v34 = vpop.eup %5895 }
 0x70f   : > { %v2375_v37 = vsel %vm2224_vm2, %v6748_v34, 0.0 }
 0x710   : > { %2376 = vadd.xlane.f32.xlu0 %v2375_v37  ;;  %v2245_v11 = vpop.xlane.xlu0 %2244 }
 0x712   : > { %v6752_v12 = vpop.eup %5897  ;;  %v6767_v56 = vpop.xlane.xlu1 %2247 }
 0x713   : > { %v2369_v15 = vsel %vm2224_vm2, %v6752_v12, 0.0 }
 0x714   : > { %2370 = vadd.xlane.f32.xlu0 %v2369_v15 }
 0x716   : > { %v6769_v58 = vpop.xlane.xlu1 %2259 }
 0x718   : > { %v6756_v40 = vpop.eup %5899 }
 0x719   : > { %v2381_v41 = vsel %vm2224_vm2, %v6756_v40, 0.0 }
 0x71a   : > { %2382 = vadd.xlane.f32.xlu0 %v2381_v41  ;;  %v6771_v59 = vpop.xlane.xlu1 %2253  ;;  %v6781_v45 = vpop.xlane.xlu0 %2256 }
 0x720   : > { %v6783_v7 = vpop.xlane.xlu0 %2268 }
 0x724   : > { %v6785_v10 = vpop.xlane.xlu0 %2262 }
 0x726   : > { %v6773_v61 = vpop.xlane.xlu1 %2265 }
 0x72c   : > { %v6775_v30 = vpop.xlane.xlu1 %2277 }
 0x730   : > { %v6779_v63 = vpop.xlane.xlu1 %2271 }
 0x732   : > { %v6787_v14 = vpop.xlane.xlu0 %2274 }
 0x738   : > { %v6789_v17 = vpop.xlane.xlu0 %2286 }
 0x73c   : > { %v6793_v19 = vpop.xlane.xlu0 %2280 }
 0x73e   : > { %v2284_v2 = vpop.xlane.xlu1 %2283 }
 0x73f   : > { %v2316_v3 = vsub.f32 %v2153_v5, %v2284_v2 }
 0x741   : > { %v2359_v8 = vmul.f32 1.442695, %v2316_v3 }
 0x742   : > { %v6797_v24 = vpop.xlane.xlu0 %2292 }
 0x743   : > { %5901 = vpow2.f32 %v2359_v8 }
 0x747   : > { %912 = vxpose.xlu0.b32.start [1/3] (short) %v835_v44, 128 }
 0x74b   : > { %913 = vxpose.xlu0.b32.cont [2/3] (short) %v838_v49, 128 }
 0x74f   : > { %914 = vxpose.xlu0.b32.end [3/3] (short) %v843_v51, 128 }
 0x750   : > { %v6791_v18 = vpop.eup %5901 }
 0x751   : > { %v2426_v21 = vsel %vm2224_vm2, %v6791_v18, 0.0 }
 0x799   : > { %v6799_v5 = vpop.xlane.xlu0 %2376 }
 0x79d   : > { %v6801_v25 = vpop.xlane.xlu0 %2370 }
 0x7a3   : > { %v6803_v31 = vpop.xlane.xlu0 %2382 }
 0x7b0   : > { %2427 = vadd.xlane.f32.xlu0 %v2426_v21 }
 0x7c3   : > { %v928_v33 = vpop.trf.xlu0 }
 0x7c7   : > { %v929_v37 = vpop.trf.xlu0 }
 0x7cb   : > { %v930_v15 = vpop.trf.xlu0 }
 0x7cc   : > { %v5618_v41 = vpack.i.bf16 %v930_v15, %v928_v33  ;;  %v2298_v33 = vsub.f32 %v6666_v20, %v6745_v23  ;;  %v2300_v15 = vsub.f32 %v6662_v16, %v2236_v54 }
 0x7ce   : > { %5619 = vxpose.xlu1.b32.start [1/2] (short) (narrow) %v5618_v41, 24  ;;  %v2302_v41 = vsub.f32 %v6656_v13, %v2242_v52  ;;  %v2294_v13 = vsel %vm2224_vm2, %v6734_v4, -inf }
 0x7cf   : > { %v931_v43 = vpop.trf.xlu0 }
 0x7d0   : > { %v5620_v44 = vpack.i.bf16 %v931_v43, %v929_v37  ;;  %v2323_v37 = vmul.f32 1.442695, %v2298_v33  ;;  %v2327_v43 = vmul.f32 1.442695, %v2300_v15 }
 0x7d2   : > { %5621 = vxpose.xlu1.b32.end [2/2] (short) (narrow) %v5620_v44, 24  ;;  %5903 = vpow2.f32 %v2323_v37  ;;  %v2331_v44 = vmul.f32 1.442695, %v2302_v41 }
 0x7d3   : > { %v932_v49 = vpop.trf.xlu0  ;;  %5905 = vpow2.f32 %v2327_v43 }
 0x7d4   : > { %5907 = vpow2.f32 %v2331_v44 }
 0x7d7   : > { %v933_v51 = vpop.trf.xlu0 }
 0x7db   : > { %v934_v2 = vpop.trf.xlu0 }
 0x7dc   : > { %v5637_v3 = vpack.i.bf16 %v934_v2, %v932_v49  ;;  %v2303_v49 = vsub.f32 %v6682_v32, %v2245_v11  ;;  %v2306_v32 = vsub.f32 %v6692_v39, %v6771_v59  ;;  %v2308_v39 = vsub.f32 %v6690_v38, %v6769_v58 }
 0x7dd   : > { %v2310_v58 = vsub.f32 %v6710_v53, %v6773_v61  ;;  %v2312_v53 = vsub.f32 %v6718_v57, %v6779_v63  ;;  %v2314_v57 = vsub.f32 %v6714_v55, %v6775_v30  ;;  %v2317_v30 = vsub.f32 %v6726_v62, %v6789_v17 }
 0x7de   : > { %5638 = vxpose.xlu1.b32.start [1/2] (short) (narrow) %v5637_v3, 24  ;;  %v2343_v11 = vmul.f32 1.442695, %v2308_v39 }
 0x7df   : > { %v935_v8 = vpop.trf.xlu0  ;;  %v6818_v16 = vpop.eup %5903 }
 0x7e0   : > { %v5639_v21 = vpack.i.bf16 %v935_v8, %v933_v51  ;;  %v6824_v23 = vpop.eup %5905 }
 0x7e1   : > { %v2378_v52 = vsel %vm2224_vm2, %v6824_v23, 0.0  ;;  %v6830_v54 = vpop.eup %5907 }
 0x7e2   : > { %5640 = vxpose.xlu1.b32.end [2/2] (short) (narrow) %v5639_v21, 24  ;;  %v2384_v59 = vsel %vm2224_vm2, %v6830_v54, 0.0 }
 0x7e3   : > { %v936_v29 = vpop.trf.xlu0 }
 0x7e7   : > { %v937_v22 = vpop.trf.xlu0 }
 0x7eb   : > { %v938_v28 = vpop.trf.xlu0 }
 0x7ec   : > { %v5656_v0 = vpack.i.bf16 %v938_v28, %v936_v29  ;;  %v2333_v28 = vmul.f32 1.442695, %v2303_v49  ;;  %v2355_v49 = vmul.f32 1.442695, %v2314_v57 }
 0x7ee   : > { %5657 = vxpose.xlu1.b32.start [1/2] (short) (narrow) %v5656_v0, 24  ;;  %v2304_v0 = vsub.f32 %v6686_v36, %v6767_v56  ;;  %5909 = vpow2.f32 %v2333_v28  ;;  %v2372_v36 = vsel %vm2224_vm2, %v6818_v16, 0.0 }
 0x7ef   : > { %v939_v46 = vpop.trf.xlu0 }
 0x7f0   : > { %v5658_v27 = vpack.i.bf16 %v939_v46, %v937_v22  ;;  %v2288_v46 = vsel %vm2224_vm2, %v6736_v6, -inf  ;;  %v2335_v29 = vmul.f32 1.442695, %v2304_v0  ;;  %v2307_v22 = vsub.f32 %v6696_v42, %v6781_v45 }
 0x7f1   : > { %v2309_v42 = vsub.f32 %v6706_v50, %v6785_v10  ;;  %v2311_v50 = vsub.f32 %v6702_v47, %v6783_v7  ;;  %v2347_v10 = vmul.f32 1.442695, %v2310_v58  ;;  %v2351_v47 = vmul.f32 1.442695, %v2312_v53 }
 0x7f2   : > { %5659 = vxpose.xlu1.b32.end [2/2] (short) (narrow) %v5658_v27, 24  ;;  %v2305_v27 = vsub.f32 %v6678_v26, %v6777_v48  ;;  %5911 = vpow2.f32 %v2335_v29  ;;  %v2339_v26 = vmul.f32 1.442695, %v2306_v32  ;;  %v2341_v56 = vmul.f32 1.442695, %v2307_v22 }
 0x7f3   : > { %v2345_v38 = vmul.f32 1.442695, %v2309_v42  ;;  %v2349_v33 = vmul.f32 1.442695, %v2311_v50  ;;  %v2313_v7 = vsub.f32 %v6722_v60, %v6787_v14  ;;  %v2315_v60 = vsub.f32 %v6730_v1, %v6793_v19 }
 0x7f4   : > { %v2337_v20 = vmul.f32 1.442695, %v2305_v27  ;;  %v2361_v1 = vmul.f32 1.442695, %v2317_v30 }
 0x7f5   : > { %v2353_v63 = vmul.f32 1.442695, %v2313_v7  ;;  %v2357_v0 = vmul.f32 1.442695, %v2315_v60 }
 0x7f6   : > { %5913 = vpow2.f32 %v2337_v20 }
 0x7f7   : > { %5915 = vpow2.f32 %v2339_v26 }
 0x7f8   : > { %5917 = vpow2.f32 %v2341_v56 }
 0x7f9   : > { %5919 = vpow2.f32 %v2343_v11 }
 0x7fa   : > { %5921 = vpow2.f32 %v2345_v38 }
 0x7fb   : > { %v6836_v48 = vpop.eup %5909  ;;  %5923 = vpow2.f32 %v2347_v10 }
 0x7fc   : > { %v2387_v45 = vsel %vm2224_vm2, %v6836_v48, 0.0  ;;  %5925 = vpow2.f32 %v2349_v33 }
 0x7fd   : > { %5927 = vpow2.f32 %v2351_v47 }
 0x7fe   : > { %5929 = vpow2.f32 %v2353_v63 }
 0x7ff   : > { %v6842_v51 = vpop.eup %5911  ;;  %5931 = vpow2.f32 %v2355_v49 }
 0x800   : > { %v2390_v2 = vsel %vm2224_vm2, %v6842_v51, 0.0  ;;  %5933 = vpow2.f32 %v2357_v0 }
 0x801   : > { %5935 = vpow2.f32 %v2361_v1 }
 0x802   : > { %5937 = vrcp.f32 %v6799_v5 }
 0x803   : > { %v6848_v3 = vpop.eup %5913  ;;  %5939 = vrcp.f32 %v6801_v25 }
 0x804   : > { %v2393_v8 = vsel %vm2224_vm2, %v6848_v3, 0.0  ;;  %v6854_v21 = vpop.eup %5915  ;;  %5941 = vrcp.f32 %v6803_v31 }
 0x805   : > { %v2396_v61 = vsel %vm2224_vm2, %v6854_v21, 0.0  ;;  %v6860_v37 = vpop.eup %5917 }
 0x806   : > { %v2399_v15 = vsel %vm2224_vm2, %v6860_v37, 0.0  ;;  %v6866_v41 = vpop.eup %5919 }
 0x807   : > { %v2402_v43 = vsel %vm2224_vm2, %v6866_v41, 0.0  ;;  %v6872_v44 = vpop.eup %5921 }
 0x808   : > { %v2405_v14 = vsel %vm2224_vm2, %v6872_v44, 0.0  ;;  %v6878_v28 = vpop.eup %5923 }
 0x809   : > { %v6884_v27 = vpop.eup %5925 }
 0x80a   : > { %v2411_v19 = vsel %vm2224_vm2, %v6884_v27, 0.0 }
 0x81d   : > { %2289 = vmax.xlane.f32.xlu1 %v2288_v46  ;;  %v2408_v46 = vsel %vm2224_vm2, %v6878_v28, 0.0 }
 0x821   : > { %2295 = vmax.xlane.f32.xlu1 %v2294_v13  ;;  %v6888_v13 = vpop.eup %5927 }
 0x822   : > { %v6892_v39 = vpop.eup %5929 }
 0x823   : > { %v2417_v58 = vsel %vm2224_vm2, %v6892_v39, 0.0 }
 0x825   : > { %2373 = vadd.xlane.f32.xlu1 %v2372_v36 }
 0x829   : > { %2379 = vadd.xlane.f32.xlu1 %v2378_v52  ;;  %v2414_v52 = vsel %vm2224_vm2, %v6888_v13, 0.0 }
 0x82d   : > { %2385 = vadd.xlane.f32.xlu1 %v2384_v59 }
 0x831   : > { %2388 = vadd.xlane.f32.xlu1 %v2387_v45 }
 0x835   : > { %2391 = vadd.xlane.f32.xlu1 %v2390_v2  ;;  %v6900_v2 = vpop.eup %5931 }
 0x836   : > { %v2420_v10 = vsel %vm2224_vm2, %v6900_v2, 0.0 }
 0x839   : > { %2394 = vadd.xlane.f32.xlu1 %v2393_v8  ;;  %v6904_v8 = vpop.eup %5933 }
 0x83a   : > { %v6908_v57 = vpop.eup %5935 }
 0x83b   : > { %v5938_v5 = vpop.eup %5937 }
 0x83d   : > { %2397 = vadd.xlane.f32.xlu1 %v2396_v61 }
 0x841   : > { %2400 = vadd.xlane.f32.xlu1 %v2399_v15  ;;  %v2423_v15 = vsel %vm2224_vm2, %v6904_v8, 0.0 }
 0x845   : > { %2403 = vadd.xlane.f32.xlu1 %v2402_v43 }
 0x849   : > { %2406 = vadd.xlane.f32.xlu1 %v2405_v14 }
 0x84a   : > { %v5622_v55 = vpop.trf.xlu1 }
 0x84b   : > { %v5623_v20 = vunpack.i.l.bf16 %v5622_v55  ;;  %v5626_v36 = vunpack.i.h.bf16 %v5622_v55  ;;  %v2429_v55 = vsel %vm2224_vm2, %v6908_v57, 0.0 }
 0x84d   : > { %2409 = vadd.xlane.f32.xlu1 %v2408_v46 }
 0x84e   : > { %v5627_v29 = vpop.trf.xlu1 }
 0x84f   : > { %v5628_v32 = vunpack.i.l.bf16 %v5627_v29  ;;  %v5631_v62 = vunpack.i.h.bf16 %v5627_v29 }
 0x851   : > { %2412 = vadd.xlane.f32.xlu1 %v2411_v19  ;;  %v2505_v11 = vpack.c.bf16 %v5628_v32, %v5623_v20  ;;  %v2507_v42 = vpack.c.bf16 %v5631_v62, %v5626_v36 }
 0x852   : > { %v5632_v17 = vpop.trf.xlu1 }
 0x853   : > { %v5636_v26 = vunpack.i.h.bf16 %v5632_v17  ;;  %v5633_v22 = vunpack.i.l.bf16 %v5632_v17 }
 0x855   : > { %2415 = vadd.xlane.f32.xlu1 %v2414_v52  ;;  %v2508_v56 = vpack.c.bf16 %v5636_v26, %v5636_v26  ;;  %v2506_v59 = vpack.c.bf16 %v5633_v22, %v5633_v22 }
 0x857   : > { %5249 = vmatprep.subr.msk.bf16.mxu1 %vm2527_vm3, %v2506_v59  ;;  %5250 = vmatprep.subr.msk.bf16.mxu0 %vm2527_vm3, %v2508_v56  ;;  %v2529_v45 = vsel %vm2527_vm3, %v2506_v59, 0  ;;  %v2586_v38 = vsel %vm2527_vm3, %v2508_v56, 0  ;;  %v2319_v59 = vsub.f32 %v6739_v9, %v6797_v24 }
 0x858   : > { %5130 = vmatpush3.bf16.msra.mxu1 %v2529_v45  ;;  %5138 = vmatpush3.bf16.msra.mxu0 %v2586_v38 }
 0x859   : > { %2418 = vadd.xlane.f32.xlu1 %v2417_v58  ;;  %5131 = vmatprep.subr.bf16.mxu1 %v2505_v11  ;;  %v2365_v38 = vmul.f32 1.442695, %v2319_v59  ;;  %v5940_v58 = vpop.eup %5939  ;;  %v6967_v59 = vpop.trf.xlu0 }
 0x85a   : > { %5139 = vmatprep.subr.bf16.mxu0 %v2507_v42  ;;  %v5641_v50 = vpop.trf.xlu1  ;;  %v5942_v9 = vpop.eup %5941 }
 0x85b   : > { %v5645_v33 = vunpack.i.h.bf16 %v5641_v50  ;;  %v5642_v53 = vunpack.i.l.bf16 %v5641_v50 }
 0x85c   : > { %5132 = vmatpush3.bf16.msra.mxu1 %v2505_v11  ;;  %5140 = vmatpush3.bf16.msra.mxu0 %v2507_v42 }
 0x85d   : > { %2421 = vadd.xlane.f32.xlu1 %v2420_v10  ;;  %v2467_v10 = vmul.f32 %v5938_v5, %v6748_v34 }
 0x85e   : > { %v5646_v61 = vpop.trf.xlu1 }
 0x85f   : > { %v5650_v47 = vunpack.i.h.bf16 %v5646_v61  ;;  %v5647_v7 = vunpack.i.l.bf16 %v5646_v61  ;;  %v2465_v61 = vmul.f32 %v5940_v58, %v6752_v12 }
 0x861   : > { %2424 = vadd.xlane.f32.xlu1 %v2423_v15  ;;  %v6910_v63 = vpack.c.bf16 %v5647_v7, %v5642_v53  ;;  %v6912_v43 = vpack.c.bf16 %v5650_v47, %v5645_v33 }
 0x862   : > { %v5651_v49 = vpop.trf.xlu1 }
 0x863   : > { %v5655_v60 = vunpack.i.h.bf16 %v5651_v49  ;;  %v5652_v14 = vunpack.i.l.bf16 %v5651_v49 }
 0x865   : > { %2430 = vadd.xlane.f32.xlu1 %v2429_v55  ;;  %v6916_v30 = vpack.c.bf16 %v5655_v60, %v5655_v60  ;;  %v2510_v0 = vpack.c.bf16 %v5652_v14, %v5652_v14  ;;  %v2490_v60 = vpack.c.bf16 %v2467_v10, %v2467_v10  ;;  %v2469_v55 = vmul.f32 %v5942_v9, %v6756_v40 }
 0x867   : > { %5251 = vmatprep.subr.msk.bf16.mxu1 %vm2527_vm3, %v2510_v0  ;;  %5252 = vmatprep.subr.msk.bf16.mxu0 %vm2527_vm3, %v6916_v30 }
 0x86a   : > { %v5660_v46 = vpop.trf.xlu1 }
 0x86b   : > { %v5664_v29 = vunpack.i.h.bf16 %v5660_v46  ;;  %v5661_v1 = vunpack.i.l.bf16 %v5660_v46 }
 0x86e   : > { %v5665_v19 = vpop.trf.xlu1 }
 0x86f   : > { %v5669_v20 = vunpack.i.h.bf16 %v5665_v19  ;;  %v5666_v32 = vunpack.i.l.bf16 %v5665_v19 }
 0x871   : > { %v6921_v36 = vpack.c.bf16 %v5666_v32, %v5661_v1  ;;  %v6923_v62 = vpack.c.bf16 %v5669_v20, %v5664_v29 }
 0x872   : > { %v6925_v17 = vpop.trf.xlu1 }
 0x873   : > { %v5671_v12 = vunpack.i.l.bf16 %v6925_v17 }
 0x875   : > { %v2514_v20 = vpack.c.bf16 %v5671_v12, %v5671_v12 }
 0x8a6   : > { %v2290_v26 = vpop.xlane.xlu1 %2289 }
 0x8a7   : > { %v2318_v22 = vsub.f32 %v6736_v6, %v2290_v26  ;;  %v2700_v26 = vsel %vm2527_vm3, %v6916_v30, 0 }
 0x8a9   : > { %v2363_v11 = vmul.f32 1.442695, %v2318_v22 }
 0x8aa   : > { %v2296_v52 = vpop.xlane.xlu1 %2295 }
 0x8ab   : > { %v2320_v56 = vsub.f32 %v6734_v4, %v2296_v52 }
 0x8ad   : > { %v2367_v42 = vmul.f32 1.442695, %v2320_v56 }
 0x8ae   : > { %v2374_v45 = vpop.xlane.xlu1 %2373 }
 0x8af   : > { %5943 = vpow2.f32 %v2367_v42 }
 0x8b0   : > { %5945 = vrcp.f32 %v2374_v45 }
 0x8b1   : > { %5947 = vpow2.f32 %v2363_v11 }
 0x8b2   : > { %v2380_v6 = vpop.xlane.xlu1 %2379 }
 0x8b3   : > { %5949 = vrcp.f32 %v2380_v6 }
 0x8b4   : > { %5951 = vpow2.f32 %v2365_v38 }
 0x8b6   : > { %v2386_v4 = vpop.xlane.xlu1 %2385 }
 0x8b7   : > { %5953 = vrcp.f32 %v2386_v4  ;;  %v6973_v4 = vpop.trf.xlu0 }
 0x8ba   : > { %v2389_v50 = vpop.xlane.xlu1 %2388 }
 0x8bb   : > { %5955 = vrcp.f32 %v2389_v50  ;;  %v942_v50 = vpop.trf.xlu0 }
 0x8bc   : > { %v6934_v24 = vpop.eup %5943 }
 0x8bd   : > { %v5946_v25 = vpop.eup %5945  ;;  %v2438_v31 = vsel %vm2224_vm2, %v6934_v24, 0.0 }
 0x8be   : > { %v6939_v33 = vpop.eup %5947  ;;  %2439 = vadd.xlane.f32.xlu1 %v2438_v31  ;;  %v2392_v53 = vpop.xlane.xlu1 %2391  ;;  %v2466_v47 = vmul.f32 %v5946_v25, %v6818_v16  ;;  %v2643_v16 = vsel %vm2527_vm3, %v2510_v0, 0  ;;  %v5674_v0 = vunpack.i.h.bf16 %v6925_v17 }
 0x8bf   : > { %5957 = vrcp.f32 %v2392_v53  ;;  %v2432_v49 = vsel %vm2224_vm2, %v6939_v33, 0.0 }
 0x8c0   : > { %v5950_v7 = vpop.eup %5949  ;;  %v2489_v15 = vpack.c.bf16 %v2466_v47, %v2465_v61  ;;  %v2516_v56 = vpack.c.bf16 %v5674_v0, %v5674_v0  ;;  %v943_v47 = vpop.trf.xlu0 }
 0x8c1   : > { %v2468_v14 = vmul.f32 %v5950_v7, %v6824_v23  ;;  %v6947_v34 = vpop.eup %5951 }
 0x8c2   : > { %5133 = vmatprep.mubr.msk.bf16.mxu1 %vm2224_vm2, %v2489_v15  ;;  %2433 = vadd.xlane.f32.xlu1 %v2432_v49  ;;  %v2395_v46 = vpop.xlane.xlu1 %2394  ;;  %v2435_v40 = vsel %vm2224_vm2, %v6947_v34, 0.0 }
 0x8c3   : > { %5134 = vmatmul.mubr.msk.bf16.vlgmr.msra.gmra.mxu1 %vm2224_vm2, %v2490_v60  ;;  %5959 = vrcp.f32 %v2395_v46  ;;  %v2491_v29 = vpack.c.bf16 %v2469_v55, %v2468_v14 }
 0x8c4   : > { %v5954_v1 = vpop.eup %5953  ;;  %5146 = vmatpush3.bf16.msra.mxu1 %v2643_v16 }
 0x8c5   : > { %5147 = vmatprep.subr.bf16.mxu1 %v6910_v63  ;;  %5141 = vmatprep.mubr.msk.bf16.mxu0 %vm2224_vm2, %v2491_v29  ;;  %v2470_v23 = vmul.f32 %v5954_v1, %v6830_v54 }
 0x8c6   : > { %2436 = vadd.xlane.f32.xlu1 %v2435_v40  ;;  %v2398_v19 = vpop.xlane.xlu1 %2397 }
 0x8c7   : > { %v2492_v32 = vpack.c.bf16 %v2470_v23, %v2470_v23  ;;  %5961 = vrcp.f32 %v2398_v19 }
 0x8c8   : > { %5148 = vmatpush3.bf16.msra.mxu1 %v6910_v63  ;;  %v5956_v22 = vpop.eup %5955 }
 0x8c9   : > { %5253 = vmatprep.subr.msk.bf16.mxu1 %vm2527_vm3, %v2514_v20  ;;  %5142 = vmatmul.mubr.msk.bf16.vlgmr.msra.gmra.mxu0 %vm2224_vm2, %v2492_v32  ;;  %v2471_v63 = vmul.f32 %v5956_v22, %v6836_v48  ;;  %v2757_v48 = vsel %vm2527_vm3, %v2514_v20, 0 }
 0x8ca   : > { %5154 = vmatpush3.bf16.msra.mxu0 %v2700_v26  ;;  %v2401_v52 = vpop.xlane.xlu1 %2400 }
 0x8cb   : > { %5155 = vmatprep.subr.bf16.mxu0 %v6912_v43  ;;  %5963 = vrcp.f32 %v2401_v52 }
 0x8cc   : > { %v5958_v54 = vpop.eup %5957 }
 0x8cd   : > { %v2472_v17 = vmul.f32 %v5958_v54, %v6842_v51 }
 0x8ce   : > { %5156 = vmatpush3.bf16.msra.mxu0 %v6912_v43  ;;  %v2404_v11 = vpop.xlane.xlu1 %2403 }
 0x8cf   : > { %5965 = vrcp.f32 %v2404_v11  ;;  %5254 = vmatprep.subr.msk.bf16.mxu0 %vm2527_vm3, %v2516_v56  ;;  %v2493_v30 = vpack.c.bf16 %v2472_v17, %v2471_v63 }
 0x8d0   : > { %v5960_v42 = vpop.eup %5959 }
 0x8d1   : > { %5149 = vmatprep.mubr.msk.bf16.mxu1 %vm2224_vm2, %v2493_v30  ;;  %v2473_v45 = vmul.f32 %v5960_v42, %v6848_v3 }
 0x8d2   : > { %v2407_v38 = vpop.xlane.xlu1 %2406 }
 0x8d3   : > { %v2494_v6 = vpack.c.bf16 %v2473_v45, %v2473_v45  ;;  %5967 = vrcp.f32 %v2407_v38 }
 0x8d4   : > { %v5962_v51 = vpop.eup %5961 }
 0x8d5   : > { %5150 = vmatmul.mubr.msk.bf16.vlgmr.msra.gmra.mxu1 %vm2224_vm2, %v2494_v6  ;;  %v2474_v58 = vmul.f32 %v5962_v51, %v6854_v21  ;;  %v2814_v21 = vsel %vm2527_vm3, %v2516_v56, 0 }
 0x8d6   : > { %5162 = vmatpush3.bf16.msra.mxu1 %v2757_v48  ;;  %v2410_v43 = vpop.xlane.xlu1 %2409 }
 0x8d7   : > { %5969 = vrcp.f32 %v2410_v43  ;;  %5163 = vmatprep.subr.bf16.mxu1 %v6921_v36 }
 0x8d8   : > { %v5964_v5 = vpop.eup %5963 }
 0x8d9   : > { %v2475_v3 = vmul.f32 %v5964_v5, %v6860_v37 }
 0x8da   : > { %5164 = vmatpush3.bf16.msra.mxu1 %v6921_v36  ;;  %v2413_v9 = vpop.xlane.xlu1 %2412 }
 0x8db   : > { %5971 = vrcp.f32 %v2413_v9  ;;  %v2495_v25 = vpack.c.bf16 %v2475_v3, %v2474_v58 }
 0x8dc   : > { %v5966_v31 = vpop.eup %5965 }
 0x8dd   : > { %5157 = vmatprep.mubr.msk.bf16.mxu0 %vm2224_vm2, %v2495_v25  ;;  %v2476_v10 = vmul.f32 %v5966_v31, %v6866_v41  ;;  %v2428_v41 = vpop.xlane.xlu0 %2427 }
 0x8de   : > { %v2416_v53 = vpop.xlane.xlu1 %2415 }
 0x8df   : > { %v2496_v61 = vpack.c.bf16 %v2476_v10, %v2476_v10  ;;  %5973 = vrcp.f32 %v2416_v53 }
 0x8e0   : > { %v5968_v37 = vpop.eup %5967 }
 0x8e1   : > { %5158 = vmatmul.mubr.msk.bf16.vlgmr.msra.gmra.mxu0 %vm2224_vm2, %v2496_v61  ;;  %v2477_v15 = vmul.f32 %v5968_v37, %v6872_v44 }
 0x8e2   : > { %5170 = vmatpush3.bf16.msra.mxu0 %v2814_v21  ;;  %v2419_v7 = vpop.xlane.xlu1 %2418 }
 0x8e3   : > { %5975 = vrcp.f32 %v2419_v7  ;;  %5171 = vmatprep.subr.bf16.mxu0 %v6923_v62  ;;  %v7312_v7 = vmov 0  }
 0x8e4   : > { %v5970_v36 = vpop.eup %5969 }
 0x8e5   : > { %v2478_v49 = vmul.f32 %v5970_v36, %v6878_v28 }
 0x8e6   : > { %5172 = vmatpush3.bf16.msra.mxu0 %v6923_v62  ;;  %v2422_v60 = vpop.xlane.xlu1 %2421 }
 0x8e7   : > { %5977 = vrcp.f32 %v2422_v60  ;;  %v2497_v14 = vpack.c.bf16 %v2478_v49, %v2477_v15 }
 0x8e8   : > { %v5972_v55 = vpop.eup %5971  ;;  %5979 = vrcp.f32 %v2428_v41 }
 0x8e9   : > { %5165 = vmatprep.mubr.msk.bf16.mxu1 %vm2224_vm2, %v2497_v14  ;;  %v2479_v46 = vmul.f32 %v5972_v55, %v6884_v27  ;;  %v5675_v27 = vpack.i.bf16 %v942_v50, %v6967_v59 }
 0x8ea   : > { %v2425_v12 = vpop.xlane.xlu1 %2424 }
 0x8eb   : > { %5981 = vrcp.f32 %v2425_v12  ;;  %v2498_v16 = vpack.c.bf16 %v2479_v46, %v2479_v46 }
 0x8ec   : > { %v5974_v44 = vpop.eup %5973 }
 0x8ed   : > { %5166 = vmatmul.mubr.msk.bf16.vlgmr.msra.gmra.mxu1 %vm2224_vm2, %v2498_v16  ;;  %v2480_v28 = vmul.f32 %v5974_v44, %v6888_v13 }
 0x8ee   : > { %v2431_v22 = vpop.xlane.xlu1 %2430 }
 0x8f0   : > { %v5976_v29 = vpop.eup %5975 }
 0x8f1   : > { %v2481_v62 = vmul.f32 %v5976_v29, %v6892_v39  ;;  %v5677_v39 = vpack.i.bf16 %v943_v47, %v6973_v4 }
 0x8f3   : > { %v2499_v1 = vpack.c.bf16 %v2481_v62, %v2480_v28 }
 0x8f4   : > { %v5978_v40 = vpop.eup %5977 }
 0x8f5   : > { %5173 = vmatprep.mubr.msk.bf16.mxu0 %vm2224_vm2, %v2499_v1  ;;  %v2482_v23 = vmul.f32 %v5978_v40, %v6900_v2  ;;  %v5980_v19 = vpop.eup %5979 }
 0x8f6   : > { %v2484_v13 = vmul.f32 %v5980_v19, %v6791_v18 }
 0x8f7   : > { %v2500_v20 = vpack.c.bf16 %v2482_v23, %v2482_v23 }
 0x8f8   : > { %v5982_v32 = vpop.eup %5981 }
 0x8f9   : > { %5174 = vmatmul.mubr.msk.bf16.vlgmr.msra.gmra.mxu0 %vm2224_vm2, %v2500_v20  ;;  %5676 = vxpose.xlu1.b32.start [1/2] (short) (narrow) %v5675_v27, 24  ;;  %v2483_v0 = vmul.f32 %v5982_v32, %v6904_v8 }
 0x8fb   : > { %v2501_v26 = vpack.c.bf16 %v2484_v13, %v2483_v0 }
 0x8fd   : > { %5678 = vxpose.xlu1.b32.end [2/2] (short) (narrow) %v5677_v39, 24  ;;  %5181 = vmatprep.mubr.msk.bf16.mxu1 %vm2224_vm2, %v2501_v26 }
 0x947   : > { %v2440_v2 = vpop.xlane.xlu1 %2439 }
 0x94b   : > { %v2434_v52 = vpop.xlane.xlu1 %2433 }
 0x94c   : > { %5983 = vrcp.f32 %v2434_v52 }
 0x94f   : > { %v2437_v54 = vpop.xlane.xlu1 %2436 }
 0x950   : > { %5985 = vrcp.f32 %v2437_v54 }
 0x951   : > { %5987 = vrcp.f32 %v2431_v22 }
 0x952   : > { %5989 = vrcp.f32 %v2440_v2 }
 0x959   : > { %v5984_v56 = vpop.eup %5983 }
 0x95a   : > { %v2486_v17 = vmul.f32 %v5984_v56, %v6939_v33 }
 0x95d   : > { %v5986_v63 = vpop.eup %5985 }
 0x95e   : > { %v2487_v8 = vmul.f32 %v5986_v63, %v6947_v34  ;;  %v5988_v4 = vpop.eup %5987 }
 0x95f   : > { %v5990_v33 = vpop.eup %5989  ;;  %v2485_v25 = vmul.f32 %v5988_v4, %v6908_v57 }
 0x960   : > { %v2503_v59 = vpack.c.bf16 %v2487_v8, %v2486_v17  ;;  %v2488_v31 = vmul.f32 %v5990_v33, %v6934_v24 }
 0x961   : > { %v2502_v61 = vpack.c.bf16 %v2485_v25, %v2485_v25 }
 0x962   : > { %5189 = vmatprep.mubr.msk.bf16.mxu0 %vm2224_vm2, %v2503_v59  ;;  %v2504_v47 = vpack.c.bf16 %v2488_v31, %v2488_v31  ;;  %v5796_v31 = vld [vmem:[#allocation9 + $0x10] sm:$0xff]  }
 0x975   : > { %v5679_v18 = vpop.trf.xlu1 }
 0x976   : > { %v5683_v48 = vunpack.i.h.bf16 %v5679_v18  ;;  %v5680_v51 = vunpack.i.l.bf16 %v5679_v18 }
 0x979   : > { %v5684_v11 = vpop.trf.xlu1 }
 0x97a   : > { %v5688_v30 = vunpack.i.h.bf16 %v5684_v11  ;;  %v5685_v42 = vunpack.i.l.bf16 %v5684_v11 }
 0x97c   : > { %v2517_v3 = vpack.c.bf16 %v5685_v42, %v5680_v51  ;;  %v2519_v50 = vpack.c.bf16 %v5688_v30, %v5683_v48 }
 0x97d   : > { %v5689_v45 = vpop.trf.xlu1 }
 0x97e   : > { %v5693_v38 = vunpack.i.h.bf16 %v5689_v45  ;;  %v5690_v6 = vunpack.i.l.bf16 %v5689_v45 }
 0x980   : > { %v2520_v43 = vpack.c.bf16 %v5693_v38, %v5693_v38  ;;  %v2518_v5 = vpack.c.bf16 %v5690_v6, %v5690_v6 }
 0x982   : > { %5255 = vmatprep.subr.msk.bf16.mxu1 %vm2527_vm3, %v2518_v5  ;;  %5256 = vmatprep.subr.msk.bf16.mxu0 %vm2527_vm3, %v2520_v43  ;;  %v2871_v34 = vsel %vm2527_vm3, %v2518_v5, 0  ;;  %v2928_v58 = vsel %vm2527_vm3, %v2520_v43, 0  ;;  %v5791_v43 = vld [vmem:[#allocation9 + $0x38] sm:$0xff]   ;;  %v5792_v5 = vld [vmem:[#allocation9 + $0x30] sm:$0xff]  }
 0x983   : > { %v5135_v9 = vpop.f32.mrf.mxu1  ;;  %5178 = vmatpush3.bf16.msra.mxu1 %v2871_v34  ;;  %5186 = vmatpush3.bf16.msra.mxu0 %v2928_v58  ;;  %v5793_v34 = vld [vmem:[#allocation9 + $0x28] sm:$0xff]  }
 0x984   : > { %5179 = vmatprep.subr.bf16.mxu1 %v2517_v3  ;;  %5187 = vmatprep.subr.bf16.mxu0 %v2519_v50 }
 0x985   : > { %v2565_v10 = vpop.f32.mrf.mxu1 }
 0x987   : > { %v5136_v53 = vpop.f32.mrf.mxu1  ;;  %5180 = vmatpush3.bf16.msra.mxu1 %v2517_v3  ;;  %5188 = vmatpush3.bf16.msra.mxu0 %v2519_v50  ;;  %v5794_v3 = vld [vmem:[#allocation9 + $0x20] sm:$0xff]  }
 0x988   : > { %5193 = vmatprep.subr.bf16.mxu1 %v5791_v43 }
 0x989   : > { %v5143_v21 = vpop.f32.mrf.mxu0  ;;  %v2568_v57 = vpop.f32.mrf.mxu1 }
 0x98a   : > { %5182 = vmatmul.mubr.msk.bf16.vlgmr.msra.gmra.mxu1 %vm2224_vm2, %v2502_v61  ;;  %5190 = vmatmul.mubr.msk.bf16.vlgmr.msra.gmra.mxu0 %vm2224_vm2, %v2504_v47  ;;  %v5698_v41 = vpack.i.bf16 %v5143_v21, %v5135_v9  ;;  %v5795_v9 = vld [vmem:[#allocation9 + $0x18] sm:$0xff]  }
 0x98b   : > { %v2622_v37 = vpop.f32.mrf.mxu0  ;;  %3674 = vmatprep.mubr.bf16.mxu0 %v7312_v7  ;;  %5194 = vmatpush3.bf16.msra.mxu1 %v5791_v43  ;;  %v5814_v43 = vld [vmem:[#allocation10 + $0xa8] ss:$16 sps:$4 sm:$0xff]  }
 0x98c   : > { %v5694_v36 = vpack.i.bf16 %v2622_v37, %v2565_v10  ;;  %5195 = vmatprep.subr.bf16.mxu1 %v5792_v5 }
 0x98d   : > { %v5144_v15 = vpop.f32.mrf.mxu0 }
 0x98e   : > { %5695 = vxpose.xlu0.b32.start [1/3] (short) (narrow) %v5694_v36, 16  ;;  %v5797_v15 = vld [vmem:[#allocation9 + $0x8] sm:$0xff]  }
 0x98f   : > { %v2625_v49 = vpop.f32.mrf.mxu0  ;;  %5196 = vmatpush3.bf16.msra.mxu1 %v5792_v5  ;;  %v5817_v5 = vld [vmem:[#allocation10 + $0x80] ss:$16 sps:$4 sm:$0xff]  }
 0x990   : > { %v5696_v24 = vpack.i.bf16 %v2625_v49, %v2568_v57  ;;  %5197 = vmatprep.subr.bf16.mxu1 %v5793_v34  ;;  %v5798_v57 = vld [vmem:[#allocation9] sm:$0xff]  }
 0x992   : > { %5697 = vxpose.xlu0.b32.cont [2/3] (short) (narrow) %v5696_v24, 16 }
 0x993   : > { %5198 = vmatpush3.bf16.msra.mxu1 %v5793_v34  ;;  %v5822_v34 = vld [vmem:[#allocation10 + $0x8c] ss:$16 sps:$4 sm:$0xff]  }
 0x994   : > { %5199 = vmatprep.subr.bf16.mxu1 %v5794_v3 }
 0x995   : > { %v5151_v60 = vpop.f32.mrf.mxu1 }
 0x996   : > { %5699 = vxpose.xlu0.b32.end [3/3] (short) (narrow) %v5698_v41, 16 }
 0x997   : > { %v2679_v14 = vpop.f32.mrf.mxu1  ;;  %5200 = vmatpush3.bf16.msra.mxu1 %v5794_v3  ;;  %v5828_v3 = vld [vmem:[#allocation10 + $0x6c] ss:$16 sps:$4 sm:$0xff]  }
 0x998   : > { %5201 = vmatprep.subr.bf16.mxu1 %v5795_v9 }
 0x999   : > { %v5152_v55 = vpop.f32.mrf.mxu1 }
 0x99b   : > { %v2682_v29 = vpop.f32.mrf.mxu1  ;;  %5202 = vmatpush3.bf16.msra.mxu1 %v5795_v9  ;;  %v5826_v9 = vld [vmem:[#allocation10 + $0x68] ss:$16 sps:$4 sm:$0xff]  }
 0x99c   : > { %5203 = vmatprep.subr.bf16.mxu1 %v5796_v31 }
 0x99f   : > { %5204 = vmatpush3.bf16.msra.mxu1 %v5796_v31  ;;  %v5834_v31 = vld [vmem:[#allocation10 + $0x4c] ss:$16 sps:$4 sm:$0xff]  }
 0x9a0   : > { %5205 = vmatprep.subr.bf16.mxu1 %v5797_v15 }
 0x9a1   : > { %v5159_v46 = vpop.f32.mrf.mxu0 }
 0x9a2   : > { %v5714_v1 = vpack.i.bf16 %v5159_v46, %v5151_v60 }
 0x9a3   : > { %v2736_v12 = vpop.f32.mrf.mxu0  ;;  %5206 = vmatpush3.bf16.msra.mxu1 %v5797_v15  ;;  %v5846_v15 = vld [vmem:[#allocation10 + $0xc] ss:$16 sps:$4 sm:$0xff]  }
 0x9a4   : > { %v5710_v16 = vpack.i.bf16 %v2736_v12, %v2679_v14  ;;  %5207 = vmatprep.subr.bf16.mxu1 %v5798_v57 }
 0x9a5   : > { %v5160_v44 = vpop.f32.mrf.mxu0 }
 0x9a6   : > { %5711 = vxpose.xlu1.b32.start [1/3] (short) (narrow) %v5710_v16, 16 }
 0x9a7   : > { %v2739_v28 = vpop.f32.mrf.mxu0  ;;  %5208 = vmatpush3.bf16.msra.mxu1 %v5798_v57  ;;  %v5841_v57 = vld [vmem:[#allocation10] ss:$16 sps:$4 sm:$0xff]  }
 0x9a8   : > { %v5712_v62 = vpack.i.bf16 %v2739_v28, %v2682_v29  ;;  %v3284_v28 = vld [vmem:[#allocation6 + $0x6] ss:$0 sm:$0xff] }
 0x9aa   : > { %5713 = vxpose.xlu1.b32.cont [2/3] (short) (narrow) %v5712_v62, 16 }
 0x9ad   : > { %v5167_v40 = vpop.f32.mrf.mxu1 }
 0x9ae   : > { %5715 = vxpose.xlu1.b32.end [3/3] (short) (narrow) %v5714_v1, 16 }
 0x9af   : > { %v2793_v23 = vpop.f32.mrf.mxu1 }
 0x9b1   : > { %v5168_v19 = vpop.f32.mrf.mxu1 }
 0x9b3   : > { %v2796_v13 = vpop.f32.mrf.mxu1 }
 0x9b9   : > { %v5175_v27 = vpop.f32.mrf.mxu0 }
 0x9ba   : > { %v5730_v22 = vpack.i.bf16 %v5175_v27, %v5167_v40  ;;  %v6049_v27 = vld [vmem:[#allocation4] sm:$0xff] }
 0x9bb   : > { %v2850_v20 = vpop.f32.mrf.mxu0 }
 0x9bc   : > { %v5726_v32 = vpack.i.bf16 %v2850_v20, %v2793_v23 }
 0x9bd   : > { %v5176_v0 = vpop.f32.mrf.mxu0 }
 0x9be   : > { %5727 = vxpose.xlu1.b32.start [1/3] (short) (narrow) %v5726_v32, 16 }
 0x9bf   : > { %v2853_v39 = vpop.f32.mrf.mxu0 }
 0x9c0   : > { %v5728_v26 = vpack.i.bf16 %v2853_v39, %v2796_v13  ;;  %v6050_v13 = vld [vmem:[#allocation4 + $0x8] sm:$0xff] }
 0x9c2   : > { %5729 = vxpose.xlu1.b32.cont [2/3] (short) (narrow) %v5728_v26, 16  ;;  %v5799_v26 = vld [vmem:[#allocation10 + $0xe0] ss:$16 sps:$4 sm:$0xff]  }
 0x9c6   : > { %5731 = vxpose.xlu1.b32.end [3/3] (short) (narrow) %v5730_v22, 16  ;;  %v5801_v22 = vld [vmem:[#allocation10 + $0xe4] ss:$16 sps:$4 sm:$0xff]  }
 0x9c7   : > { %3642 = vmatprep.subr.bf16.mxu0 %v5801_v22  ;;  %v5847_v22 = vld [vmem:[#allocation12 + $0x78] sm:$0xff]  }
 0x9c8   : > { %3643 = vmatpush1.bf16.msra.mxu0 %v5799_v26 }
 0xa0a   : > { %v5700_v2 = vpop.trf.xlu0 }
 0xa0b   : > { %v5701_v51 = vunpack.i.l.bf16 %v5700_v2  ;;  %v5704_v58 = vunpack.i.h.bf16 %v5700_v2  ;;  %v5802_v2 = vld [vmem:[#allocation10 + $0xe8] ss:$16 sps:$4 sm:$0xff]  }
 0xa0e   : > { %v5705_v52 = vpop.trf.xlu0 }
 0xa0f   : > { %v5706_v33 = vunpack.i.l.bf16 %v5705_v52  ;;  %v5709_v50 = vunpack.i.h.bf16 %v5705_v52  ;;  %v5804_v52 = vld [vmem:[#allocation10 + $0xec] ss:$16 sps:$4 sm:$0xff]  }
 0xa10   : > { %3693 = vmatprep.subr.bf16.mxu1 %v5804_v52  ;;  %v5849_v52 = vld [vmem:[#allocation12 + $0x38] sm:$0xff]  }
 0xa22   : > { %v5716_v54 = vpop.trf.xlu1 }
 0xa23   : > { %v5717_v25 = vunpack.i.l.bf16 %v5716_v54  ;;  %v5720_v53 = vunpack.i.h.bf16 %v5716_v54 }
 0xa26   : > { %v5721_v56 = vpop.trf.xlu1 }
 0xa27   : > { %v5722_v10 = vunpack.i.l.bf16 %v5721_v56  ;;  %v5725_v61 = vunpack.i.h.bf16 %v5721_v56 }
 0xa3a   : > { %v5732_v63 = vpop.trf.xlu1 }
 0xa3b   : > { %v5733_v47 = vunpack.i.l.bf16 %v5732_v63  ;;  %v5736_v37 = vunpack.i.h.bf16 %v5732_v63 }
 0xa3e   : > { %v5737_v17 = vpop.trf.xlu1 }
 0xa3f   : > { %v5738_v21 = vunpack.i.l.bf16 %v5737_v17  ;;  %v5741_v36 = vunpack.i.h.bf16 %v5737_v17 }
 0xa4a   : > { %v5183_v8 = vpop.f32.mrf.mxu1  ;;  %v5191_v59 = vpop.f32.mrf.mxu0 }
 0xa4b   : > { %v5746_v48 = vpack.i.bf16 %v5191_v59, %v5183_v8 }
 0xa4c   : > { %v2907_v18 = vpop.f32.mrf.mxu1  ;;  %v2964_v11 = vpop.f32.mrf.mxu0 }
 0xa4d   : > { %v5742_v30 = vpack.i.bf16 %v2964_v11, %v2907_v18 }
 0xa4e   : > { %v5184_v42 = vpop.f32.mrf.mxu1  ;;  %v5192_v45 = vpop.f32.mrf.mxu0 }
 0xa4f   : > { %5743 = vxpose.xlu1.b32.start [1/3] (short) (narrow) %v5742_v30, 16  ;;  %v5807_v42 = vld [vmem:[#allocation10 + $0xc4] ss:$16 sps:$4 sm:$0xff]   ;;  %v5810_v45 = vld [vmem:[#allocation10 + $0xcc] ss:$16 sps:$4 sm:$0xff]  }
 0xa50   : > { %v2910_v38 = vpop.f32.mrf.mxu1  ;;  %v2967_v6 = vpop.f32.mrf.mxu0  ;;  %3644 = vmatprep.subr.bf16.mxu0 %v5807_v42  ;;  %v5858_v42 = vld [vmem:[#allocation12 + $0xa8] sm:$0xff]  }
 0xa51   : > { %v5744_v4 = vpack.i.bf16 %v2967_v6, %v2910_v38  ;;  %v5805_v38 = vld [vmem:[#allocation10 + $0xc0] ss:$16 sps:$4 sm:$0xff]   ;;  %v5808_v6 = vld [vmem:[#allocation10 + $0xc8] ss:$16 sps:$4 sm:$0xff]  }
 0xa52   : > { %3645 = vmatpush1.bf16.msra.mxu0 %v5805_v38  ;;  %v5859_v38 = vld [vmem:[#allocation12 + $0x60] sm:$0xff]  }
 0xa53   : > { %5745 = vxpose.xlu1.b32.cont [2/3] (short) (narrow) %v5744_v4, 16  ;;  %v5813_v4 = vld [vmem:[#allocation10 + $0xa4] ss:$16 sps:$4 sm:$0xff]  }
 0xa54   : > { %3646 = vmatprep.subr.bf16.mxu0 %v5813_v4  ;;  %v5861_v4 = vld [vmem:[#allocation12 + $0x20] sm:$0xff]  }
 0xa57   : > { %5747 = vxpose.xlu1.b32.end [3/3] (short) (narrow) %v5746_v48, 16  ;;  %v5816_v48 = vld [vmem:[#allocation10 + $0xac] ss:$16 sps:$4 sm:$0xff]  }
 0xa5b   : > { %3234 = vxpose.xlu1.b32.start [1/16] (narrow) %v5701_v51, 24  ;;  %v5811_v51 = vld [vmem:[#allocation10 + $0xa0] ss:$16 sps:$4 sm:$0xff]  }
 0xa5c   : > { %3647 = vmatpush1.bf16.msra.mxu0 %v5811_v51  ;;  %v5863_v51 = vld [vmem:[#allocation12 + $0x58] sm:$0xff]  }
 0xa5f   : > { %3235 = vxpose.xlu1.b32.cont [2/16] (narrow) %v5706_v33, 24  ;;  %v5820_v33 = vld [vmem:[#allocation10 + $0x88] ss:$16 sps:$4 sm:$0xff]  }
 0xa63   : > { %3236 = vxpose.xlu1.b32.cont [3/16] (narrow) %v5704_v58, 24  ;;  %v5825_v58 = vld [vmem:[#allocation10 + $0x64] ss:$16 sps:$4 sm:$0xff]  }
 0xa67   : > { %3237 = vxpose.xlu1.b32.cont [4/16] (narrow) %v5709_v50, 24  ;;  %v5823_v50 = vld [vmem:[#allocation10 + $0x60] ss:$16 sps:$4 sm:$0xff]  }
 0xa6b   : > { %3238 = vxpose.xlu1.b32.cont [5/16] (narrow) %v5717_v25, 24  ;;  %v5831_v25 = vld [vmem:[#allocation10 + $0x44] ss:$16 sps:$4 sm:$0xff]  }
 0xa6f   : > { %3239 = vxpose.xlu1.b32.cont [6/16] (narrow) %v5722_v10, 24  ;;  %v5829_v10 = vld [vmem:[#allocation10 + $0x40] ss:$16 sps:$4 sm:$0xff]  }
 0xa73   : > { %3240 = vxpose.xlu1.b32.cont [7/16] (narrow) %v5720_v53, 24  ;;  %v5832_v53 = vld [vmem:[#allocation10 + $0x48] ss:$16 sps:$4 sm:$0xff]  }
 0xa77   : > { %3241 = vxpose.xlu1.b32.cont [8/16] (narrow) %v5725_v61, 24  ;;  %v5837_v61 = vld [vmem:[#allocation10 + $0x24] ss:$16 sps:$4 sm:$0xff]  }
 0xa7b   : > { %3242 = vxpose.xlu1.b32.cont [9/16] (narrow) %v5733_v47, 24  ;;  %v5840_v47 = vld [vmem:[#allocation10 + $0x2c] ss:$16 sps:$4 sm:$0xff]  }
 0xa7f   : > { %3243 = vxpose.xlu1.b32.cont [10/16] (narrow) %v5738_v21, 24  ;;  %v5835_v21 = vld [vmem:[#allocation10 + $0x20] ss:$16 sps:$4 sm:$0xff]  }
 0xa83   : > { %3244 = vxpose.xlu1.b32.cont [11/16] (narrow) %v5736_v37, 24  ;;  %v5838_v37 = vld [vmem:[#allocation10 + $0x28] ss:$16 sps:$4 sm:$0xff]  }
 0xa87   : > { %3245 = vxpose.xlu1.b32.cont [12/16] (narrow) %v5741_v36, 24  ;;  %v5843_v36 = vld [vmem:[#allocation10 + $0x4] ss:$16 sps:$4 sm:$0xff]  }
 0xacb   : > { %v5748_v49 = vpop.trf.xlu1 }
 0xacc   : > { %v5749_v24 = vunpack.i.l.bf16 %v5748_v49  ;;  %v5752_v14 = vunpack.i.h.bf16 %v5748_v49  ;;  %v5844_v49 = vld [vmem:[#allocation10 + $0x8] ss:$16 sps:$4 sm:$0xff]  }
 0xace   : > { %3246 = vxpose.xlu1.b32.cont [13/16] (narrow) %v5749_v24, 24 }
 0xacf   : > { %v5753_v41 = vpop.trf.xlu1 }
 0xad0   : > { %v5754_v60 = vunpack.i.l.bf16 %v5753_v41  ;;  %v5757_v55 = vunpack.i.h.bf16 %v5753_v41 }
 0xad2   : > { %3247 = vxpose.xlu1.b32.cont [14/16] (narrow) %v5754_v60, 24 }
 0xad6   : > { %3248 = vxpose.xlu1.b32.cont [15/16] (narrow) %v5752_v14, 24 }
 0xada   : > { %3249 = vxpose.xlu1.b32.end [16/16] (narrow) %v5757_v55, 24 }
 0xb1a   : > { %v3250_v46 = vpop.trf.xlu1 }
 0xb1e   : > { %v3251_v12 = vpop.trf.xlu1 }
 0xb1f   : > { %v3266_v16 = vpack.c.bf16 %v3251_v12, %v3250_v46 }
 0xb21   : > { %5209 = vmatprep.mubr.bf16.mxu1 %v3266_v16 }
 0xb22   : > { %v3252_v44 = vpop.trf.xlu1 }
 0xb23   : > { %v3267_v29 = vpack.c.bf16 %v3252_v44, %v3252_v44 }
 0xb25   : > { %5210 = vmatmul.mubr.bf16.vlgmr.msra.gmra.mxu1 %v3267_v29 }
 0xb26   : > { %3725 = vmatprep.mubr.bf16.mxu1 %v7312_v7  ;;  %3694 = vmatpush1.bf16.msra.mxu1 %v5802_v2  ;;  %v5848_v2 = vld [vmem:[#allocation12 + $0xf8] sm:$0xff]  }
 0xb27   : > { %3695 = vmatprep.subr.bf16.mxu1 %v5810_v45 }
 0xb2a   : > { %3696 = vmatpush1.bf16.msra.mxu1 %v5808_v6  ;;  %v5860_v6 = vld [vmem:[#allocation12 + $0xe0] sm:$0xff]  }
 0xb2b   : > { %3697 = vmatprep.subr.bf16.mxu1 %v5816_v48  ;;  %v5862_v48 = vld [vmem:[#allocation12 + $0xa0] sm:$0xff]  }
 0xb2e   : > { %3698 = vmatpush1.bf16.msra.mxu1 %v5814_v43  ;;  %v5864_v43 = vld [vmem:[#allocation12 + $0xd8] sm:$0xff]  }
 0xb2f   : > { %3699 = vmatprep.subr.bf16.mxu1 %v5822_v34  ;;  %v5868_v34 = vld [vmem:[#allocation12 + $0xd0] sm:$0xff]  }
 0xb32   : > { %3700 = vmatpush1.bf16.msra.mxu1 %v5820_v33  ;;  %v5867_v33 = vld [vmem:[#allocation12 + $0x50] sm:$0xff]  }
 0xb33   : > { %3701 = vmatprep.subr.bf16.mxu1 %v5828_v3  ;;  %v5870_v3 = vld [vmem:[#allocation12 + $0x90] sm:$0xff]  }
 0xb36   : > { %3702 = vmatpush1.bf16.msra.mxu1 %v5826_v9  ;;  %v5872_v9 = vld [vmem:[#allocation12 + $0xc8] sm:$0xff]  }
 0xb37   : > { %3703 = vmatprep.subr.bf16.mxu1 %v5834_v31  ;;  %v5874_v31 = vld [vmem:[#allocation12 + $0x88] sm:$0xff]  }
 0xb3a   : > { %3704 = vmatpush1.bf16.msra.mxu1 %v5832_v53 }
 0xb3b   : > { %3705 = vmatprep.subr.bf16.mxu1 %v5840_v47  ;;  %v5876_v47 = vld [vmem:[#allocation12 + $0xc0] sm:$0xff]  }
 0xb3e   : > { %3706 = vmatpush1.bf16.msra.mxu1 %v5838_v37  ;;  %v5877_v37 = vld [vmem:[#allocation12] sm:$0xff]  }
 0xb3f   : > { %3707 = vmatprep.subr.bf16.mxu1 %v5846_v15 }
 0xb42   : > { %3708 = vmatpush1.bf16.msra.mxu1 %v5844_v49 }
 0xb43   : > { %5002 = vmatprep.subr.bf16.mxu1 %v5848_v2 }
 0xbe5   : > { %v5211_v62 = vpop.f32.mrf.mxu1 }
 0xbe6   : > { %v3376_v1 = vadd.f32 %v5211_v62, %v3284_v28 }
 0xbe7   : > { %v3367_v40 = vpop.f32.mrf.mxu1 }
 0xbe8   : > { %v3368_v23 = vadd.f32 %v3367_v40, %v3284_v28  ;;  %v7030_v11 = vadd.f32 %v3376_v1, %v6578_v35  ;;  %v5819_v35 = vld [vmem:[#allocation10 + $0x84] ss:$16 sps:$4 sm:$0xff]  }
 0xbe9   : > { %v5212_v19 = vpop.f32.mrf.mxu1  ;;  %3648 = vmatprep.subr.bf16.mxu0 %v5819_v35  ;;  %v7041_v1 = vld [vmem:[#allocation6 + $0x7] ss:$0 sm:$0xff]  ;;  %v5865_v35 = vld [vmem:[#allocation12 + $0x18] sm:$0xff]  }
 0xbea   : > { %v7015_v20 = vadd.f32 %v6049_v27, %v3368_v23  ;;  %3649 = vmatpush1.bf16.msra.mxu0 %v5817_v5  ;;  %v7045_v27 = vld [vmem:[#allocation6 + $0x20] ss:$0 sm:$0xff]  ;;  %v5866_v5 = vld [vmem:[#allocation12 + $0x98] sm:$0xff]  }
 0xbeb   : > { %v3370_v32 = vpop.f32.mrf.mxu1  ;;  %3650 = vmatprep.subr.bf16.mxu0 %v5825_v58  ;;  %v5869_v58 = vld [vmem:[#allocation12 + $0x10] sm:$0xff]  }
 0xbec   : > { %v3371_v0 = vadd.f32 %v3370_v32, %v3284_v28  ;;  %3384 = vadd.xlane.f32.xlu0 %v7015_v20 }
 0xbee   : > { %v7018_v39 = vadd.f32 %v6050_v13, %v3371_v0  ;;  %3651 = vmatpush1.bf16.msra.mxu0 %v5823_v50  ;;  %v5871_v50 = vld [vmem:[#allocation12 + $0x48] sm:$0xff]  }
 0xbef   : > { %3652 = vmatprep.subr.bf16.mxu0 %v5831_v25  ;;  %v5873_v25 = vld [vmem:[#allocation12 + $0x8] sm:$0xff]  }
 0xbf0   : > { %3386 = vadd.xlane.f32.xlu0 %v7018_v39 }
 0xbf2   : > { %3653 = vmatpush1.bf16.msra.mxu0 %v5829_v10 }
 0xbf3   : > { %3654 = vmatprep.subr.bf16.mxu0 %v5837_v61  ;;  %v5875_v61 = vld [vmem:[#allocation12 + $0x40] sm:$0xff]  }
 0xbf6   : > { %3655 = vmatpush1.bf16.msra.mxu0 %v5835_v21 }
 0xbf7   : > { %3656 = vmatprep.subr.bf16.mxu0 %v5843_v36  ;;  %v5878_v36 = vld [vmem:[#allocation12 + $0x80] sm:$0xff]  }
 0xbfa   : > { %3657 = vmatpush1.bf16.msra.mxu0 %v5841_v57  ;;  %v7313_v57 = vmov 0.0  }
 0xbfb   : > { %4974 = vmatprep.subr.bf16.mxu0 %v5847_v22 }
 0xc75   : > { %v3385_v54 = vpop.xlane.xlu0 %3384 }
 0xc76   : > { %v3390_v56 = vmul.f32 0.0078125, %v3385_v54  ;;  %v5850_v54 = vld [vmem:[#allocation12 + $0xb8] sm:$0xff]  }
 0xc78   : > { %v7022_v63 = vsub.f32 %v7015_v20, %v3390_v56  ;;  %v5851_v56 = vld [vmem:[#allocation12 + $0x70] sm:$0xff]  }
 0xc79   : > { %v3387_v17 = vpop.xlane.xlu0 %3386 }
 0xc7a   : > { %v3391_v8 = vmul.f32 0.0078125, %v3387_v17  ;;  %v3396_v59 = vmul.f32 %v7022_v63, %v7022_v63  ;;  %v5853_v17 = vld [vmem:[#allocation12 + $0x30] sm:$0xff]  }
 0xc7c   : > { %v7027_v18 = vsub.f32 %v7018_v39, %v3391_v8  ;;  %3399 = vadd.xlane.f32.xlu0 %v3396_v59  ;;  %v5854_v8 = vld [vmem:[#allocation12 + $0xb0] sm:$0xff]  }
 0xc7e   : > { %v3397_v30 = vmul.f32 %v7027_v18, %v7027_v18 }
 0xc80   : > { %3388 = vadd.xlane.f32.xlu0 %v7030_v11  ;;  %3401 = vadd.xlane.f32.xlu1 %v3397_v30  ;;  %v5857_v30 = vld [vmem:[#allocation12 + $0x28] sm:$0xff]  }
 0xd05   : > { %v3400_v24 = vpop.xlane.xlu0 %3399 }
 0xd06   : > { %v3405_v41 = vmul.f32 0.0078125, %v3400_v24  ;;  %v3460_v24 = vld [vmem:[#allocation6 + $0x21] ss:$8 sm:$0xf] }
 0xd08   : > { %v3408_v60 = vadd.f32 1e-05, %v3405_v41  ;;  %v7314_v41 = vld [vmem:[#allocation20_spill] sm:$0xff] }
 0xd09   : > { %v3402_v14 = vpop.xlane.xlu1 %3401  ;;  %v3389_v55 = vpop.xlane.xlu0 %3388 }
 0xd0a   : > { %5991 = vrsqrt.f32 %v3408_v60  ;;  %v3406_v46 = vmul.f32 0.0078125, %v3402_v14  ;;  %v3392_v12 = vmul.f32 0.0078125, %v3389_v55  ;;  %v3476_v60 = vsub.s32 3, %v7314_v41 }
 0xd0b   : > { %v7315_v14 = vsub.s32 0, %v7314_v41 }
 0xd0c   : > { %v3409_v16 = vadd.f32 1e-05, %v3406_v46  ;;  %v7036_v44 = vsub.f32 %v7030_v11, %v3392_v12  ;;  %v5856_v11 = vld [vmem:[#allocation12 + $0xe8] sm:$0xff]   ;;  %v7316_v46 = vsub.s32 2, %v7314_v41 }
 0xd0d   : > { %v7059_v55 = vrot.slane %v3460_v24, %v7315_v14 }
 0xd0e   : > { %5993 = vrsqrt.f32 %v3409_v16  ;;  %v3398_v29 = vmul.f32 %v7036_v44, %v7036_v44  ;;  %v7063_v12 = vrot.slane %v3460_v24, %v7316_v46 }
 0xd10   : > { %3403 = vadd.xlane.f32.xlu0 %v3398_v29  ;;  %v7317_v29 = vsub.s32 1, %v7314_v41 }
 0xd17   : > { %v5992_v28 = vpop.eup %5991 }
 0xd18   : > { %v3414_v62 = vmul.f32 %v5992_v28, %v7022_v63  ;;  %v5852_v63 = vld [vmem:[#allocation12 + $0xf0] sm:$0xff]   ;;  %v7067_v28 = vrot.slane %v3460_v24, %v7317_v29 }
 0xd1a   : > { %v3418_v19 = vmul.f32 %v7041_v1, %v3414_v62  ;;  %v7069_v62 = vrot.slane %v3460_v24, %v3476_v60 }
 0xd1b   : > { %v5994_v40 = vpop.eup %5993 }
 0xd1c   : > { %v3415_v23 = vmul.f32 %v5994_v40, %v7027_v18  ;;  %v3422_v0 = vadd.f32 %v7045_v27, %v3418_v19  ;;  %v5855_v18 = vld [vmem:[#allocation12 + $0x68] sm:$0xff]  }
 0xd1e   : > { %v3419_v32 = vmul.f32 %v7041_v1, %v3415_v23 }
 0xd20   : > { %v3423_v13 = vadd.f32 %v7045_v27, %v3419_v32 }
 0xd22   : > { %v3425_v26 = vpack.c.bf16 %v3423_v13, %v3422_v0 }
 0xd24   : > { %3675 = vmatmul.mubr.bf16.vlgmr.msra.gmra.mxu0 %v3425_v26  ;;  %3726 = vmatmul.mubr.bf16.vlgmr.msra.gmra.mxu1 %v3425_v26 }
 0xd25   : > { %3684 = vmatprep.mubr.bf16.mxu0 %v7312_v7  ;;  %3735 = vmatprep.mubr.bf16.mxu1 %v7312_v7 }
 0xd26   : > { %4975 = vmatpush3.bf16.msra.mxu0 %v5849_v52  ;;  %5003 = vmatpush3.bf16.msra.mxu1 %v5850_v54 }
 0xd27   : > { %4976 = vmatprep.subr.bf16.mxu0 %v5851_v56  ;;  %5004 = vmatprep.subr.bf16.mxu1 %v5852_v63 }
 0xd2a   : > { %4977 = vmatpush3.bf16.msra.mxu0 %v5853_v17  ;;  %5005 = vmatpush3.bf16.msra.mxu1 %v5854_v8 }
 0xd2b   : > { %4978 = vmatprep.subr.bf16.mxu0 %v5855_v18  ;;  %5006 = vmatprep.subr.bf16.mxu1 %v5856_v11 }
 0xd2e   : > { %4979 = vmatpush3.bf16.msra.mxu0 %v5857_v30  ;;  %5007 = vmatpush3.bf16.msra.mxu1 %v5858_v42 }
 0xd2f   : > { %4980 = vmatprep.subr.bf16.mxu0 %v5859_v38  ;;  %5008 = vmatprep.subr.bf16.mxu1 %v5860_v6 }
 0xd32   : > { %4981 = vmatpush3.bf16.msra.mxu0 %v5861_v4  ;;  %5009 = vmatpush3.bf16.msra.mxu1 %v5862_v48 }
 0xd33   : > { %4982 = vmatprep.subr.bf16.mxu0 %v5863_v51  ;;  %5010 = vmatprep.subr.bf16.mxu1 %v5864_v43 }
 0xd36   : > { %4983 = vmatpush3.bf16.msra.mxu0 %v5865_v35  ;;  %5011 = vmatpush3.bf16.msra.mxu1 %v5866_v5 }
 0xd37   : > { %4984 = vmatprep.subr.bf16.mxu0 %v5867_v33  ;;  %5012 = vmatprep.subr.bf16.mxu1 %v5868_v34 }
 0xd3a   : > { %4985 = vmatpush3.bf16.msra.mxu0 %v5869_v58  ;;  %5013 = vmatpush3.bf16.msra.mxu1 %v5870_v3 }
 0xd3b   : > { %4986 = vmatprep.subr.bf16.mxu0 %v5871_v50  ;;  %5014 = vmatprep.subr.bf16.mxu1 %v5872_v9 }
 0xd3e   : > { %4987 = vmatpush3.bf16.msra.mxu0 %v5873_v25  ;;  %5015 = vmatpush3.bf16.msra.mxu1 %v5874_v31 }
 0xd3f   : > { %4988 = vmatprep.subr.bf16.mxu0 %v5875_v61  ;;  %5016 = vmatprep.subr.bf16.mxu1 %v5876_v47 }
 0xd42   : > { %4989 = vmatpush3.bf16.msra.mxu0 %v5877_v37  ;;  %5017 = vmatpush3.bf16.msra.mxu1 %v5878_v36 }
 0xd43   : > { %5213 = vmatprep.subr.bf16.mxu0 %v7313_v57 }
 0xd99   : > { %v3404_v59 = vpop.xlane.xlu0 %3403 }
 0xd9a   : > { %v3407_v7 = vmul.f32 0.0078125, %v3404_v59 }
 0xd9c   : > { %v3410_v45 = vadd.f32 1e-05, %v3407_v7 }
 0xd9e   : > { %5995 = vrsqrt.f32 %v3410_v45 }
 0xdab   : > { %v5996_v10 = vpop.eup %5995 }
 0xdac   : > { %v3416_v53 = vmul.f32 %v5996_v10, %v7036_v44 }
 0xdae   : > { %v3420_v21 = vmul.f32 %v7041_v1, %v3416_v53 }
 0xdb0   : > { %v3424_v15 = vadd.f32 %v7045_v27, %v3420_v21 }
 0xdb2   : > { %v3426_v49 = vpack.c.bf16 %v3424_v15, %v3424_v15 }
 0xdb4   : > { %3685 = vmatmul.mubr.bf16.gmra.mxu0 %v3426_v49  ;;  %3736 = vmatmul.mubr.bf16.gmra.mxu1 %v3426_v49 }
 0xde4   : > { %v3676_v16 = vpop.f32.mrf.mxu0  ;;  %v3727_v44 = vpop.f32.mrf.mxu1 }
 0xde5   : > { %v7072_v1 = vadd.f32 %v3676_v16, %v7059_v55  ;;  %v7075_v40 = vadd.f32 %v3727_v44, %v7063_v12 }
 0xde6   : > { %v3678_v23 = vpop.f32.mrf.mxu0  ;;  %v3729_v19 = vpop.f32.mrf.mxu1 }
 0xde7   : > { %v7078_v27 = vmul.f32 0.70710677, %v7072_v1  ;;  %v7081_v32 = vmul.f32 0.70710677, %v7075_v40  ;;  %v7084_v0 = vadd.f32 %v3678_v23, %v7067_v28  ;;  %v7087_v13 = vadd.f32 %v3729_v19, %v7069_v62 }
 0xde8   : > { %v3680_v63 = vpop.f32.mrf.mxu0  ;;  %v3731_v42 = vpop.f32.mrf.mxu1 }
 0xde9   : > { %v3756_v26 = vand.u32 2147483647, %v7078_v27  ;;  %v3758_v22 = vand.u32 2147483647, %v7081_v32  ;;  %v7092_v2 = vmul.f32 0.70710677, %v7084_v0  ;;  %v7103_v30 = vadd.f32 %v3680_v63, %v7059_v55 }
 0xdea   : > { %v7095_v52 = vmul.f32 0.70710677, %v7087_v13  ;;  %v3682_v45 = vpop.f32.mrf.mxu0  ;;  %v7109_v48 = vadd.f32 %v3731_v42, %v7063_v12  ;;  %v3733_v33 = vpop.f32.mrf.mxu1  ;;  %vm3996_vm6 = vcmp.lt.f32.partialorder %v7078_v27, 0.0  ;;  %vm3998_vm9 = vcmp.lt.f32.partialorder %v7081_v32, 0.0 }
 0xdeb   : > { %v3768_v54 = vmul.f32 0.3275911, %v3756_v26  ;;  %v3770_v56 = vmul.f32 0.3275911, %v3758_v22  ;;  %v3757_v17 = vand.u32 2147483647, %v7092_v2  ;;  %v7112_v51 = vadd.f32 %v3682_v45, %v7067_v28 }
 0xdec   : > { %v7099_v8 = vand.u32 2147483647, %v7095_v52  ;;  %v7106_v4 = vmul.f32 0.70710677, %v7103_v30  ;;  %v7116_v35 = vmul.f32 0.70710677, %v7109_v48  ;;  %v7124_v9 = vadd.f32 %v3733_v33, %v7069_v62 }
 0xded   : > { %v3780_v59 = vadd.f32 1.0, %v3768_v54  ;;  %v3782_v18 = vadd.f32 1.0, %v3770_v56  ;;  %v3769_v11 = vmul.f32 0.3275911, %v3757_v17  ;;  %v7119_v5 = vmul.f32 0.70710677, %v7112_v51 }
 0xdee   : > { %v3771_v7 = vmul.f32 0.3275911, %v7099_v8  ;;  %v3760_v43 = vand.u32 2147483647, %v7106_v4  ;;  %v3762_v58 = vand.u32 2147483647, %v7116_v35 }
 0xdef   : > { %5997 = vrcp.f32 %v3780_v59  ;;  %v3781_v38 = vadd.f32 1.0, %v3769_v11  ;;  %v3761_v3 = vand.u32 2147483647, %v7119_v5  ;;  %v3924_v10 = vsub.f32 0.0, %v3756_v26 }
 0xdf0   : > { %5999 = vrcp.f32 %v3782_v18  ;;  %v3783_v6 = vadd.f32 1.0, %v3771_v7  ;;  %v3772_v34 = vmul.f32 0.3275911, %v3760_v43  ;;  %v3774_v25 = vmul.f32 0.3275911, %v3762_v58 }
 0xdf1   : > { %6001 = vrcp.f32 %v3781_v38  ;;  %v3773_v31 = vmul.f32 0.3275911, %v3761_v3  ;;  %v7127_v53 = vmul.f32 0.70710677, %v7124_v9  ;;  %v3925_v61 = vsub.f32 0.0, %v3757_v17 }
 0xdf2   : > { %6003 = vrcp.f32 %v3783_v6  ;;  %v3784_v50 = vadd.f32 1.0, %v3772_v34  ;;  %v3786_v47 = vadd.f32 1.0, %v3774_v25  ;;  %v3926_v15 = vsub.f32 0.0, %v3758_v22 }
 0xdf3   : > { %v3785_v21 = vadd.f32 1.0, %v3773_v31  ;;  %v7130_v37 = vand.u32 2147483647, %v7127_v53  ;;  %v3936_v41 = vmul.f32 %v3924_v10, %v3756_v26  ;;  %v3937_v46 = vmul.f32 %v3925_v61, %v3757_v17 }
 0xdf4   : > { %6005 = vrcp.f32 %v3784_v50  ;;  %v3928_v16 = vsub.f32 0.0, %v3760_v43  ;;  %v3938_v54 = vmul.f32 %v3926_v15, %v3758_v22  ;;  %v3927_v56 = vsub.f32 0.0, %v7099_v8 }
 0xdf5   : > { %6007 = vrcp.f32 %v3786_v47  ;;  %v3775_v60 = vmul.f32 0.3275911, %v7130_v37  ;;  %v3948_v59 = vmul.f32 1.442695, %v3936_v41  ;;  %v3950_v17 = vmul.f32 1.442695, %v3937_v46 }
 0xdf6   : > { %6009 = vrcp.f32 %v3785_v21  ;;  %v3940_v7 = vmul.f32 %v3928_v16, %v3760_v43  ;;  %v3930_v42 = vsub.f32 0.0, %v3762_v58  ;;  %v3952_v33 = vmul.f32 1.442695, %v3938_v54 }
 0xdf7   : > { %v3787_v29 = vadd.f32 1.0, %v3775_v60  ;;  %v3939_v34 = vmul.f32 %v3927_v56, %v7099_v8  ;;  %v3929_v50 = vsub.f32 0.0, %v3761_v3  ;;  %vm4000_vm4 = vcmp.lt.f32.partialorder %v7106_v4, 0.0 }
 0xdf8   : > { %v3956_v47 = vmul.f32 1.442695, %v3940_v7  ;;  %v3942_v21 = vmul.f32 %v3930_v42, %v3762_v58  ;;  %vm3997_vm5 = vcmp.lt.f32.partialorder %v7092_v2, 0.0  ;;  %vm4001_vm7 = vcmp.lt.f32.partialorder %v7119_v5, 0.0 }
 0xdf9   : > { %6011 = vrcp.f32 %v3787_v29  ;;  %v3954_v60 = vmul.f32 1.442695, %v3939_v34  ;;  %vm4002_vm8 = vcmp.lt.f32.partialorder %v7116_v35, 0.0  ;;  %vm3999_vm10 = vcmp.lt.f32.partialorder %v7095_v52, 0.0 }
 0xdfa   : > { %6013 = vpow2.f32 %v3948_v59  ;;  %v3960_v56 = vmul.f32 1.442695, %v3942_v21  ;;  %vm4003_vm11 = vcmp.lt.f32.partialorder %v7127_v53, 0.0  ;;  %v4038_v32 = vmul.f32 0.5, %v7109_v48 }
 0xdfb   : > { %6015 = vpow2.f32 %v3950_v17  ;;  %v4035_v52 = vmul.f32 0.5, %v7087_v13 }
 0xdfc   : > { %v7132_v36 = vpop.eup %5997  ;;  %6017 = vpow2.f32 %v3952_v33 }
 0xdfd   : > { %v7134_v49 = vpop.eup %5999  ;;  %v3816_v24 = vmul.f32 1.0614054, %v7132_v36  ;;  %6019 = vpow2.f32 %v3956_v47 }
 0xdfe   : > { %v3818_v14 = vmul.f32 1.0614054, %v7134_v49  ;;  %v7139_v23 = vpop.eup %6001  ;;  %6021 = vpow2.f32 %v3954_v60 }
 0xdff   : > { %v4821_v44 = vadd.f32 -1.4531521, %v3816_v24  ;;  %v3817_v26 = vmul.f32 1.0614054, %v7139_v23  ;;  %v7144_v18 = vpop.eup %6003  ;;  %6023 = vpow2.f32 %v3960_v56 }
 0xe00   : > { %v4823_v19 = vadd.f32 -1.4531521, %v3818_v14  ;;  %v3819_v6 = vmul.f32 1.0614054, %v7144_v18  ;;  %v3941_v14 = vmul.f32 %v3929_v50, %v3761_v3 }
 0xe01   : > { %v3840_v63 = vmul.f32 %v7132_v36, %v4821_v44  ;;  %v4822_v38 = vadd.f32 -1.4531521, %v3817_v26  ;;  %v7151_v61 = vpop.eup %6005 }
 0xe02   : > { %v3842_v11 = vmul.f32 %v7134_v49, %v4823_v19  ;;  %v4824_v10 = vadd.f32 -1.4531521, %v3819_v6  ;;  %v3820_v8 = vmul.f32 1.0614054, %v7151_v61  ;;  %v7156_v46 = vpop.eup %6007  ;;  %v3958_v42 = vmul.f32 1.442695, %v3941_v14 }
 0xe03   : > { %v3852_v45 = vadd.f32 1.4214138, %v3840_v63  ;;  %v3841_v31 = vmul.f32 %v7139_v23, %v4822_v38  ;;  %v7160_v54 = vpop.eup %6009  ;;  %v3822_v58 = vmul.f32 1.0614054, %v7156_v46  ;;  %v3931_v63 = vsub.f32 0.0, %v7130_v37 }
 0xe04   : > { %v3854_v22 = vadd.f32 1.4214138, %v3842_v11  ;;  %v3843_v41 = vmul.f32 %v7144_v18, %v4824_v10  ;;  %v4825_v19 = vadd.f32 -1.4531521, %v3820_v8  ;;  %v3821_v7 = vmul.f32 1.0614054, %v7160_v54 }
 0xe05   : > { %v3864_v25 = vmul.f32 %v7132_v36, %v3852_v45  ;;  %v3853_v24 = vadd.f32 1.4214138, %v3841_v31  ;;  %v4827_v17 = vadd.f32 -1.4531521, %v3822_v58  ;;  %6025 = vpow2.f32 %v3958_v42 }
 0xe06   : > { %v3866_v43 = vmul.f32 %v7134_v49, %v3854_v22  ;;  %v3855_v29 = vadd.f32 1.4214138, %v3843_v41  ;;  %v3844_v11 = vmul.f32 %v7151_v61, %v4825_v19  ;;  %v7168_v33 = vpop.eup %6011  ;;  %v4826_v50 = vadd.f32 -1.4531521, %v3821_v7 }
 0xe07   : > { %v4833_v15 = vadd.f32 -0.28449672, %v3864_v25  ;;  %v3865_v44 = vmul.f32 %v7139_v23, %v3853_v24  ;;  %v3846_v34 = vmul.f32 %v7156_v46, %v4827_v17  ;;  %v3943_v25 = vmul.f32 %v3931_v63, %v7130_v37  ;;  %v6014_v14 = vpop.eup %6013 }
 0xe08   : > { %v4835_v59 = vadd.f32 -0.28449672, %v3866_v43  ;;  %v3867_v3 = vmul.f32 %v7144_v18, %v3855_v29  ;;  %v3856_v22 = vadd.f32 1.4214138, %v3844_v11  ;;  %v3823_v24 = vmul.f32 1.0614054, %v7168_v33  ;;  %v6016_v29 = vpop.eup %6015 }
 0xe09   : > { %v3888_v16 = vmul.f32 %v7132_v36, %v4833_v15  ;;  %v4834_v26 = vadd.f32 -0.28449672, %v3865_v44  ;;  %v3858_v21 = vadd.f32 1.4214138, %v3846_v34  ;;  %v3845_v15 = vmul.f32 %v7160_v54, %v4826_v50  ;;  %v6018_v11 = vpop.eup %6017 }
 0xe0a   : > { %v4836_v6 = vadd.f32 -0.28449672, %v3867_v3  ;;  %v3890_v31 = vmul.f32 %v7134_v49, %v4835_v59  ;;  %v3868_v47 = vmul.f32 %v7151_v61, %v3856_v22  ;;  %v4828_v44 = vadd.f32 -1.4531521, %v3823_v24 }
 0xe0b   : > { %v3900_v45 = vadd.f32 0.2548296, %v3888_v16  ;;  %v3889_v38 = vmul.f32 %v7139_v23, %v4834_v26  ;;  %v3870_v37 = vmul.f32 %v7156_v46, %v3858_v21  ;;  %v3857_v16 = vadd.f32 1.4214138, %v3845_v15 }
 0xe0c   : > { %v3891_v43 = vmul.f32 %v7144_v18, %v4836_v6  ;;  %v4837_v60 = vadd.f32 -0.28449672, %v3868_v47  ;;  %v3902_v19 = vadd.f32 0.2548296, %v3890_v31  ;;  %v3962_v63 = vmul.f32 1.442695, %v3943_v25 }
 0xe0d   : > { %v3901_v10 = vadd.f32 0.2548296, %v3889_v38  ;;  %v3912_v41 = vmul.f32 %v7132_v36, %v3900_v45  ;;  %v4839_v26 = vadd.f32 -0.28449672, %v3870_v37  ;;  %v3869_v3 = vmul.f32 %v7160_v54, %v3857_v16  ;;  %v6020_v45 = vpop.eup %6019 }
 0xe0e   : > { %v3903_v58 = vadd.f32 0.2548296, %v3891_v43  ;;  %v3892_v56 = vmul.f32 %v7151_v61, %v4837_v60  ;;  %v3847_v36 = vmul.f32 %v7168_v33, %v4828_v44  ;;  %v3914_v38 = vmul.f32 %v7134_v49, %v3902_v19 }
 0xe0f   : > { %v3913_v8 = vmul.f32 %v7139_v23, %v3901_v10  ;;  %v3972_v23 = vmul.f32 %v6014_v14, %v3912_v41  ;;  %v3894_v7 = vmul.f32 %v7156_v46, %v4839_v26  ;;  %v4838_v42 = vadd.f32 -0.28449672, %v3869_v3  ;;  %v6022_v10 = vpop.eup %6021 }
 0xe10   : > { %v3904_v17 = vadd.f32 0.2548296, %v3892_v56  ;;  %v3915_v6 = vmul.f32 %v7144_v18, %v3903_v58  ;;  %6027 = vpow2.f32 %v3962_v63  ;;  %v3859_v31 = vadd.f32 1.4214138, %v3847_v36  ;;  %v6024_v41 = vpop.eup %6023 }
 0xe11   : > { %v3973_v59 = vmul.f32 %v6016_v29, %v3913_v8  ;;  %v3906_v50 = vadd.f32 0.2548296, %v3894_v7  ;;  %v3893_v25 = vmul.f32 %v7160_v54, %v4838_v42  ;;  %v3984_v43 = vsub.f32 1.0, %v3972_v23 }
 0xe12   : > { %v3916_v22 = vmul.f32 %v7151_v61, %v3904_v17  ;;  %v3871_v24 = vmul.f32 %v7168_v33, %v3859_v31  ;;  %v3975_v49 = vmul.f32 %v6022_v10, %v3915_v6  ;;  %v3974_v18 = vmul.f32 %v6018_v11, %v3914_v38  ;;  %v6026_v37 = vpop.eup %6025 }
 0xe13   : > { %v3985_v34 = vsub.f32 1.0, %v3973_v59  ;;  %v3918_v21 = vmul.f32 %v7156_v46, %v3906_v50  ;;  %v3905_v15 = vadd.f32 0.2548296, %v3893_v25  ;;  %v4008_v16 = vsub.f32 0.0, %v3984_v43 }
 0xe14   : > { %v3976_v47 = vmul.f32 %v6020_v45, %v3916_v22  ;;  %v4840_v29 = vadd.f32 -0.28449672, %v3871_v24  ;;  %v3987_v46 = vsub.f32 1.0, %v3975_v49  ;;  %v3986_v59 = vsub.f32 1.0, %v3974_v18 }
 0xe15   : > { %v4009_v60 = vsub.f32 0.0, %v3985_v34  ;;  %v3978_v61 = vmul.f32 %v6024_v41, %v3918_v21  ;;  %v3917_v14 = vmul.f32 %v7160_v54, %v3905_v15  ;;  %v4020_v54 = vsel %vm3996_vm6, %v4008_v16, %v3984_v43 }
 0xe16   : > { %v3988_v8 = vsub.f32 1.0, %v3976_v47  ;;  %v3895_v63 = vmul.f32 %v7168_v33, %v4840_v29  ;;  %v4032_v36 = vmul.f32 0.5, %v7072_v1  ;;  %v4033_v23 = vmul.f32 0.5, %v7084_v0 }
 0xe17   : > { %v3990_v19 = vsub.f32 1.0, %v3978_v61  ;;  %v3977_v58 = vmul.f32 %v6026_v37, %v3917_v14  ;;  %v4021_v26 = vsel %vm3997_vm5, %v4009_v60, %v3985_v34  ;;  %v4011_v2 = vsub.f32 0.0, %v3987_v46 }
 0xe18   : > { %v4012_v44 = vsub.f32 0.0, %v3988_v8  ;;  %v3907_v11 = vadd.f32 0.2548296, %v3895_v63  ;;  %v4045_v42 = vadd.f32 1.0, %v4021_v26  ;;  %v4044_v27 = vadd.f32 1.0, %v4020_v54 }
 0xe19   : > { %v3989_v3 = vsub.f32 1.0, %v3977_v58  ;;  %v4014_v17 = vsub.f32 0.0, %v3990_v19  ;;  %v4010_v6 = vsub.f32 0.0, %v3986_v59  ;;  %v4036_v22 = vmul.f32 0.5, %v7103_v30 }
 0xe1a   : > { %v4024_v56 = vsel %vm4000_vm4, %v4012_v44, %v3988_v8  ;;  %v3919_v45 = vmul.f32 %v7168_v33, %v3907_v11  ;;  %v4037_v1 = vmul.f32 0.5, %v7112_v51  ;;  %v4057_v31 = vmul.f32 %v4045_v42, %v4033_v23 }
 0xe1b   : > { %v4048_v4 = vadd.f32 1.0, %v4024_v56  ;;  %v4013_v7 = vsub.f32 0.0, %v3989_v3  ;;  %v4026_v5 = vsel %vm4002_vm8, %v4014_v17, %v3990_v19  ;;  %v4023_v33 = vsel %vm3999_vm10, %v4011_v2, %v3987_v46 }
 0xe1c   : > { %v4056_v47 = vmul.f32 %v4044_v27, %v4032_v36  ;;  %v4022_v21 = vsel %vm3998_vm9, %v4010_v6, %v3986_v59  ;;  %v4050_v30 = vadd.f32 1.0, %v4026_v5  ;;  %v4047_v35 = vadd.f32 1.0, %v4023_v33 }
 0xe1d   : > { %v6028_v38 = vpop.eup %6027  ;;  %v4025_v34 = vsel %vm4001_vm7, %v4013_v7, %v3989_v3  ;;  %v4060_v25 = vmul.f32 %v4048_v4, %v4036_v22  ;;  %v4046_v51 = vadd.f32 1.0, %v4022_v21  ;;  %v4039_v8 = vmul.f32 0.5, %v7124_v9 }
 0xe1e   : > { %v4049_v0 = vadd.f32 1.0, %v4025_v34  ;;  %v3979_v50 = vmul.f32 %v6028_v38, %v3919_v45  ;;  %v4034_v60 = vmul.f32 0.5, %v7075_v40  ;;  %v4062_v61 = vmul.f32 %v4050_v30, %v4038_v32 }
 0xe1f   : > { %v4068_v41 = vpack.c.bf16 %v4060_v25, %v4056_v47  ;;  %v4059_v14 = vmul.f32 %v4047_v35, %v4035_v52 }
 0xe20   : > { %v4061_v10 = vmul.f32 %v4049_v0, %v4037_v1  ;;  %v3991_v43 = vsub.f32 1.0, %v3979_v50  ;;  %v4058_v16 = vmul.f32 %v4046_v51, %v4034_v60 }
 0xe22   : > { %v4015_v15 = vsub.f32 0.0, %v3991_v43  ;;  %v4069_v24 = vpack.c.bf16 %v4061_v10, %v4057_v31  ;;  %v4070_v29 = vpack.c.bf16 %v4062_v61, %v4058_v16 }
 0xe24   : > { %v4027_v49 = vsel %vm4003_vm11, %v4015_v15, %v3991_v43  ;;  %4365 = vmatprep.mubr.bf16.mxu0 %v4069_v24 }
 0xe25   : > { %v4051_v18 = vadd.f32 1.0, %v4027_v49  ;;  %4366 = vmatmul.mubr.bf16.vlgmr.msra.gmra.mxu0 %v4068_v41 }
 0xe27   : > { %v4063_v37 = vmul.f32 %v4051_v18, %v4039_v8 }
 0xe29   : > { %v4071_v44 = vpack.c.bf16 %v4063_v37, %v4059_v14 }
 0xe2b   : > { %4412 = vmatprep.mubr.bf16.mxu1 %v4071_v44 }
 0xe2c   : > { %4413 = vmatmul.mubr.bf16.vlgmr.msra.gmra.mxu1 %v4070_v29 }
 0xe74   : > { %v3686_v53 = vpop.f32.mrf.mxu0  ;;  %v3737_v48 = vpop.f32.mrf.mxu1 }
 0xe75   : > { %v7210_v19 = vadd.f32 %v3686_v53, %v7059_v55  ;;  %v7213_v13 = vadd.f32 %v3737_v48, %v7063_v12 }
 0xe76   : > { %v3688_v9 = vpop.f32.mrf.mxu0  ;;  %v3739_v58 = vpop.f32.mrf.mxu1 }
 0xe77   : > { %v7216_v40 = vmul.f32 0.70710677, %v7210_v19  ;;  %v7219_v46 = vmul.f32 0.70710677, %v7213_v13  ;;  %v7222_v56 = vadd.f32 %v3688_v9, %v7067_v28  ;;  %v7225_v63 = vadd.f32 %v3739_v58, %v7069_v62 }
 0xe78   : > { %v3690_v59 = vpop.f32.mrf.mxu0  ;;  %v3741_v55 = vpop.f32.mrf.mxu1 }
 0xe79   : > { %v3764_v26 = vand.u32 2147483647, %v7216_v40  ;;  %v3766_v12 = vand.u32 2147483647, %v7219_v46  ;;  %v7230_v3 = vmul.f32 0.70710677, %v7222_v56 }
 0xe7a   : > { %v7233_v54 = vmul.f32 0.70710677, %v7225_v63  ;;  %v3691_v36 = vpop.f32.mrf.mxu0  ;;  %v3742_v11 = vpop.f32.mrf.mxu1  ;;  %vm4004_vm12 = vcmp.lt.f32.partialorder %v7216_v40, 0.0  ;;  %vm4006_vm13 = vcmp.lt.f32.partialorder %v7219_v46, 0.0  ;;  %v4042_v46 = vmul.f32 0.5, %v7213_v13 }
 0xe7b   : > { %v3776_v23 = vmul.f32 0.3275911, %v3764_v26  ;;  %v3778_v28 = vmul.f32 0.3275911, %v3766_v12  ;;  %v3765_v4 = vand.u32 2147483647, %v7230_v3 }
 0xe7c   : > { %v3767_v62 = vand.u32 2147483647, %v7233_v54  ;;  %v3932_v27 = vsub.f32 0.0, %v3764_v26  ;;  %v3934_v6 = vsub.f32 0.0, %v3766_v12  ;;  %vm4005_vm14 = vcmp.lt.f32.partialorder %v7230_v3, 0.0 }
 0xe7d   : > { %v3788_v17 = vadd.f32 1.0, %v3776_v23  ;;  %v3790_v7 = vadd.f32 1.0, %v3778_v28  ;;  %v3777_v42 = vmul.f32 0.3275911, %v3765_v4  ;;  %v3933_v34 = vsub.f32 0.0, %v3765_v4 }
 0xe7e   : > { %v3779_v2 = vmul.f32 0.3275911, %v3767_v62  ;;  %v3944_v22 = vmul.f32 %v3932_v27, %v3764_v26  ;;  %v3946_v1 = vmul.f32 %v3934_v6, %v3766_v12  ;;  %v3935_v0 = vsub.f32 0.0, %v3767_v62 }
 0xe7f   : > { %6029 = vrcp.f32 %v3788_v17  ;;  %v3789_v45 = vadd.f32 1.0, %v3777_v42  ;;  %v3945_v31 = vmul.f32 %v3933_v34, %v3765_v4  ;;  %vm4007_vm15 = vcmp.lt.f32.partialorder %v7233_v54, 0.0 }
 0xe80   : > { %6031 = vrcp.f32 %v3790_v7  ;;  %v3791_v38 = vadd.f32 1.0, %v3779_v2  ;;  %v3964_v5 = vmul.f32 1.442695, %v3944_v22  ;;  %v3968_v10 = vmul.f32 1.442695, %v3946_v1 }
 0xe81   : > { %6033 = vrcp.f32 %v3789_v45  ;;  %v3947_v43 = vmul.f32 %v3935_v0, %v3767_v62  ;;  %v3966_v24 = vmul.f32 1.442695, %v3945_v31 }
 0xe82   : > { %6035 = vrcp.f32 %v3791_v38 }
 0xe83   : > { %6037 = vpow2.f32 %v3964_v5  ;;  %v3970_v32 = vmul.f32 1.442695, %v3947_v43 }
 0xe84   : > { %6039 = vpow2.f32 %v3968_v10 }
 0xe85   : > { %6041 = vpow2.f32 %v3966_v24  ;;  %v4040_v24 = vmul.f32 0.5, %v7210_v19 }
 0xe86   : > { %6043 = vpow2.f32 %v3970_v32  ;;  %v4041_v32 = vmul.f32 0.5, %v7222_v56 }
 0xe8c   : > { %v6030_v50 = vpop.eup %6029 }
 0xe8d   : > { %v6032_v25 = vpop.eup %6031  ;;  %v3824_v33 = vmul.f32 1.0614054, %v6030_v50 }
 0xe8e   : > { %v3826_v47 = vmul.f32 1.0614054, %v6032_v25  ;;  %v6034_v30 = vpop.eup %6033 }
 0xe8f   : > { %v4829_v21 = vadd.f32 -1.4531521, %v3824_v33  ;;  %v3825_v35 = vmul.f32 1.0614054, %v6034_v30  ;;  %v6036_v51 = vpop.eup %6035 }
 0xe90   : > { %v4831_v15 = vadd.f32 -1.4531521, %v3826_v47  ;;  %v3827_v8 = vmul.f32 1.0614054, %v6036_v51  ;;  %v6038_v62 = vpop.eup %6037 }
 0xe91   : > { %v3848_v41 = vmul.f32 %v6030_v50, %v4829_v21  ;;  %v4830_v52 = vadd.f32 -1.4531521, %v3825_v35  ;;  %v6040_v7 = vpop.eup %6039 }
 0xe92   : > { %v3850_v49 = vmul.f32 %v6032_v25, %v4831_v15  ;;  %v4832_v14 = vadd.f32 -1.4531521, %v3827_v8  ;;  %v6042_v34 = vpop.eup %6041  ;;  %v4043_v8 = vmul.f32 0.5, %v7225_v63  ;;  %v4140_v63 = vld [vmem:[#allocation6 + $0x22] ss:$0 sm:$0xff] }
 0xe93   : > { %v3860_v18 = vadd.f32 1.4214138, %v3848_v41  ;;  %v3849_v61 = vmul.f32 %v6034_v30, %v4830_v52  ;;  %v6044_v33 = vpop.eup %6043 }
 0xe94   : > { %v3862_v60 = vadd.f32 1.4214138, %v3850_v49  ;;  %v3851_v29 = vmul.f32 %v6036_v51, %v4832_v14 }
 0xe95   : > { %v3872_v37 = vmul.f32 %v6030_v50, %v3860_v18  ;;  %v3861_v44 = vadd.f32 1.4214138, %v3849_v61 }
 0xe96   : > { %v3874_v16 = vmul.f32 %v6032_v25, %v3862_v60  ;;  %v3863_v58 = vadd.f32 1.4214138, %v3851_v29 }
 0xe97   : > { %v4841_v53 = vadd.f32 -0.28449672, %v3872_v37  ;;  %v3873_v9 = vmul.f32 %v6034_v30, %v3861_v44 }
 0xe98   : > { %v4843_v48 = vadd.f32 -0.28449672, %v3874_v16  ;;  %v3875_v12 = vmul.f32 %v6036_v51, %v3863_v58 }
 0xe99   : > { %v3896_v59 = vmul.f32 %v6030_v50, %v4841_v53  ;;  %v4842_v26 = vadd.f32 -0.28449672, %v3873_v9 }
 0xe9a   : > { %v3898_v55 = vmul.f32 %v6032_v25, %v4843_v48  ;;  %v4844_v28 = vadd.f32 -0.28449672, %v3875_v12 }
 0xe9b   : > { %v3908_v36 = vadd.f32 0.2548296, %v3896_v59  ;;  %v3897_v23 = vmul.f32 %v6034_v30, %v4842_v26 }
 0xe9c   : > { %v3910_v11 = vadd.f32 0.2548296, %v3898_v55  ;;  %v3899_v2 = vmul.f32 %v6036_v51, %v4844_v28 }
 0xe9d   : > { %v3920_v4 = vmul.f32 %v6030_v50, %v3908_v36  ;;  %v3909_v42 = vadd.f32 0.2548296, %v3897_v23 }
 0xe9e   : > { %v3922_v17 = vmul.f32 %v6032_v25, %v3910_v11  ;;  %v3911_v6 = vadd.f32 0.2548296, %v3899_v2 }
 0xe9f   : > { %v3980_v45 = vmul.f32 %v6038_v62, %v3920_v4  ;;  %v3921_v27 = vmul.f32 %v6034_v30, %v3909_v42  ;;  %v5879_v62 = vld [vmem:[#allocation13 + $0x38] sm:$0xff]  }
 0xea0   : > { %v3982_v38 = vmul.f32 %v6040_v7, %v3922_v17  ;;  %v3923_v5 = vmul.f32 %v6036_v51, %v3911_v6  ;;  %5214 = vmatpush3.bf16.msra.mxu0 %v5879_v62 }
 0xea1   : > { %v3992_v22 = vsub.f32 1.0, %v3980_v45  ;;  %v3981_v0 = vmul.f32 %v6042_v34, %v3921_v27  ;;  %5215 = vmatprep.subr.bf16.mxu0 %v7313_v57 }
 0xea2   : > { %v3994_v1 = vsub.f32 1.0, %v3982_v38  ;;  %v3983_v25 = vmul.f32 %v6044_v33, %v3923_v5  ;;  %v5880_v33 = vld [vmem:[#allocation13 + $0x30] sm:$0xff]  }
 0xea3   : > { %v4016_v31 = vsub.f32 0.0, %v3992_v22  ;;  %v3993_v50 = vsub.f32 1.0, %v3981_v0 }
 0xea4   : > { %v4018_v10 = vsub.f32 0.0, %v3994_v1  ;;  %v3995_v15 = vsub.f32 1.0, %v3983_v25  ;;  %5216 = vmatpush3.bf16.msra.mxu0 %v5880_v33  ;;  %v5883_v25 = vld [vmem:[#allocation13 + $0x18] sm:$0xff]  }
 0xea5   : > { %v4028_v43 = vsel %vm4004_vm12, %v4016_v31, %v3992_v22  ;;  %v4017_v21 = vsub.f32 0.0, %v3993_v50  ;;  %5217 = vmatprep.subr.bf16.mxu0 %v7313_v57 }
 0xea6   : > { %v4030_v47 = vsel %vm4006_vm13, %v4018_v10, %v3994_v1  ;;  %v4052_v30 = vadd.f32 1.0, %v4028_v43  ;;  %v4019_v41 = vsub.f32 0.0, %v3995_v15  ;;  %v5881_v10 = vld [vmem:[#allocation13 + $0x28] sm:$0xff]   ;;  %v5884_v43 = vld [vmem:[#allocation13 + $0x10] sm:$0xff]  }
 0xea7   : > { %v4029_v35 = vsel %vm4005_vm14, %v4017_v21, %v3993_v50  ;;  %v4054_v51 = vadd.f32 1.0, %v4030_v47  ;;  %v5882_v50 = vld [vmem:[#allocation13 + $0x20] sm:$0xff]   ;;  %v5885_v47 = vld [vmem:[#allocation13 + $0x8] sm:$0xff]  }
 0xea8   : > { %v4053_v40 = vadd.f32 1.0, %v4029_v35  ;;  %v4031_v49 = vsel %vm4007_vm15, %v4019_v41, %v3995_v15  ;;  %v4064_v52 = vmul.f32 %v4052_v30, %v4040_v24  ;;  %5218 = vmatpush3.bf16.msra.mxu0 %v5881_v10  ;;  %v5886_v21 = vld [vmem:[#allocation13] sm:$0xff]  }
 0xea9   : > { %v4055_v60 = vadd.f32 1.0, %v4031_v49  ;;  %v4066_v61 = vmul.f32 %v4054_v51, %v4042_v46  ;;  %5219 = vmatprep.subr.bf16.mxu0 %v7313_v57  ;;  %v4451_v46 = vld [vmem:[#allocation6 + $0x23] ss:$0 sm:$0xff] }
 0xeaa   : > { %v4065_v18 = vmul.f32 %v4053_v40, %v4041_v32  ;;  %v4072_v19 = vpack.c.bf16 %v4064_v52, %v4064_v52 }
 0xeab   : > { %v4067_v14 = vmul.f32 %v4055_v60, %v4043_v8  ;;  %v4074_v16 = vpack.c.bf16 %v4066_v61, %v4066_v61 }
 0xeac   : > { %v4073_v3 = vpack.c.bf16 %v4065_v18, %v4065_v18  ;;  %5220 = vmatpush3.bf16.msra.mxu0 %v5882_v50  ;;  %v4454_v18 = vld [vmem:[#allocation6 + $0x24] ss:$0 sm:$0xff] }
 0xead   : > { %v4075_v37 = vpack.c.bf16 %v4067_v14, %v4067_v14  ;;  %5221 = vmatprep.subr.bf16.mxu0 %v7313_v57  ;;  %v4474_v14 = vld [vmem:[#allocation6 + $0x25] ss:$0 sm:$0xff] }
 0xeae   : > { %4373 = vmatprep.mubr.bf16.mxu0 %v4073_v3 }
 0xeaf   : > { %4374 = vmatmul.mubr.bf16.gmra.mxu0 %v4072_v19  ;;  %4420 = vmatprep.mubr.bf16.mxu1 %v4075_v37 }
 0xeb0   : > { %5229 = vmatprep.mubr.msk.bf16.mxu0 %vm6332_vm0, %v7313_v57  ;;  %4421 = vmatmul.mubr.bf16.gmra.mxu1 %v4074_v16 }
 0xeb1   : > { %5222 = vmatpush3.bf16.msra.mxu0 %v5883_v25 }
 0xeb2   : > { %5223 = vmatprep.subr.bf16.mxu0 %v7313_v57 }
 0xeb5   : > { %5224 = vmatpush3.bf16.msra.mxu0 %v5884_v43 }
 0xeb6   : > { %5225 = vmatprep.subr.bf16.mxu0 %v7313_v57 }
 0xeb9   : > { %5226 = vmatpush3.bf16.msra.mxu0 %v5885_v47 }
 0xeba   : > { %5227 = vmatprep.subr.bf16.mxu0 %v7313_v57 }
 0xebd   : > { %5228 = vmatpush3.bf16.msra.mxu0 %v5886_v21 }
 0xee5   : > { %v4990_v13 = vpop.f32.mrf.mxu0 }
 0xee7   : > { %v4991_v56 = vpop.f32.mrf.mxu0 }
 0xee8   : > { %v4992_v54 = vadd.f32 %v4991_v56, %v4990_v13 }
 0xee9   : > { %v4993_v44 = vpop.f32.mrf.mxu0 }
 0xeea   : > { %v4368_v48 = vadd.f32 %v4992_v54, %v4140_v63 }
 0xeeb   : > { %v4994_v29 = vpop.f32.mrf.mxu0 }
 0xeec   : > { %v5018_v53 = vpop.f32.mrf.mxu1  ;;  %v4995_v9 = vadd.f32 %v4994_v29, %v4993_v44 }
 0xeee   : > { %v5019_v58 = vpop.f32.mrf.mxu1  ;;  %v4371_v12 = vadd.f32 %v4995_v9, %v4140_v63 }
 0xeef   : > { %v5020_v59 = vadd.f32 %v5019_v58, %v5018_v53 }
 0xef0   : > { %v5021_v55 = vpop.f32.mrf.mxu1 }
 0xef1   : > { %v4415_v26 = vadd.f32 %v5020_v59, %v4368_v48 }
 0xef2   : > { %v5022_v36 = vpop.f32.mrf.mxu1 }
 0xef3   : > { %v5023_v11 = vadd.f32 %v5022_v36, %v5021_v55  ;;  %v4427_v23 = vadd.f32 %v4415_v26, %v7015_v20 }
 0xef5   : > { %v4418_v28 = vadd.f32 %v5023_v11, %v4371_v12  ;;  %4429 = vadd.xlane.f32.xlu0 %v4427_v23 }
 0xef7   : > { %v4428_v4 = vadd.f32 %v4418_v28, %v7018_v39 }
 0xef9   : > { %4431 = vadd.xlane.f32.xlu0 %v4428_v4 }
 0xf6f   : > { %v4996_v17 = vpop.f32.mrf.mxu0 }
 0xf70   : > { %v5024_v7 = vpop.f32.mrf.mxu1 }
 0xf71   : > { %v4997_v42 = vpop.f32.mrf.mxu0 }
 0xf72   : > { %v5025_v2 = vpop.f32.mrf.mxu1 }
 0xf73   : > { %v4999_v45 = vpop.f32.mrf.mxu0 }
 0xf74   : > { %v5027_v38 = vpop.f32.mrf.mxu1 }
 0xf75   : > { %v5000_v27 = vpop.f32.mrf.mxu0 }
 0xf76   : > { %v5028_v6 = vpop.f32.mrf.mxu1 }
 0xf7e   : > { %v4430_v22 = vpop.xlane.xlu0 %4429 }
 0xf7f   : > { %v4433_v34 = vmul.f32 0.0078125, %v4430_v22 }
 0xf81   : > { %v4435_v20 = vsub.f32 %v4427_v23, %v4433_v34 }
 0xf82   : > { %v4432_v1 = vpop.xlane.xlu0 %4431 }
 0xf83   : > { %v4434_v0 = vmul.f32 0.0078125, %v4432_v1  ;;  %v4437_v5 = vmul.f32 %v4435_v20, %v4435_v20 }
 0xf85   : > { %v4436_v39 = vsub.f32 %v4428_v4, %v4434_v0  ;;  %4439 = vadd.xlane.f32.xlu0 %v4437_v5 }
 0xf87   : > { %v4438_v31 = vmul.f32 %v4436_v39, %v4436_v39 }
 0xf89   : > { %4441 = vadd.xlane.f32.xlu0 %v4438_v31 }
0x100e   : > { %v4440_v15 = vpop.xlane.xlu0 %4439 }
0x100f   : > { %v4443_v30 = vmul.f32 0.0078125, %v4440_v15 }
0x1011   : > { %v4445_v24 = vadd.f32 1e-05, %v4443_v30 }
0x1012   : > { %v4442_v35 = vpop.xlane.xlu0 %4441 }
0x1013   : > { %6045 = vrsqrt.f32 %v4445_v24  ;;  %v4444_v41 = vmul.f32 0.0078125, %v4442_v35 }
0x1015   : > { %v4446_v51 = vadd.f32 1e-05, %v4444_v41 }
0x1017   : > { %6047 = vrsqrt.f32 %v4446_v51 }
0x1020   : > { %v6046_v32 = vpop.eup %6045 }
0x1021   : > { %v4449_v40 = vmul.f32 %v6046_v32, %v4435_v20 }
0x1023   : > { %v4452_v8 = vmul.f32 %v4451_v46, %v4449_v40 }
0x1024   : > { %v6048_v49 = vpop.eup %6047 }
0x1025   : > { %v4450_v52 = vmul.f32 %v6048_v49, %v4436_v39  ;;  %v4455_v57 = vadd.f32 %v4454_v18, %v4452_v8 }
0x1027   : > { %v4453_v60 = vmul.f32 %v4451_v46, %v4450_v52 }
0x1029   : > { %v4456_v61 = vadd.f32 %v4454_v18, %v4453_v60 }
0x102b   : > { %v4457_v3 = vpack.c.bf16 %v4456_v61, %v4455_v57 }
0x102d   : > { %5230 = vmatmul.mubr.bf16.vlgmr.msra.gmra.mxu0 %v4457_v3 }
0x10ed   : > { %v4557_v19 = vpop.f32.mrf.mxu0 }
0x10ee   : > { %v4558_v37 = vadd.f32 %v4557_v19, %v4474_v14 }
0x10ef   : > { %v5231_v16 = vpop.f32.mrf.mxu0 }
0x10f0   : > { %4564 = vst [vmem:[%s451_s23] sm:$0xff] %v4558_v37 }
0x10f1   : > { %v4560_v13 = vpop.f32.mrf.mxu0 }
0x10f2   : > { %v4561_v56 = vadd.f32 %v4560_v13, %v4474_v14 }
0x10f3   : > { %v5232_v54 = vpop.f32.mrf.mxu0 }
0x10f4   : > { %4565 = vst [vmem:[%s451_s23 + $0x8] sm:$0xff] %v4561_v56 }
0x10f5 PF: > { %p23_p11 = scmp.ge.s32.totalorder %s6497_s19, 4   ;;  %s7318_s30 = smov %s6303_s10 }
0x10f6   : > { %s7319_s10 = smov %s6307_s11  ;;  %s7320_s11 = smov %s6508_s27 }
0x10f7   : > { %s7321_s12 = smov %s6497_s19  ;;  %25 = sbr.rel (!%p23_p11) target bundleno = 7 (0x7), region = 126 }
0x10fc   :  { %4587 = vsyncpa [#allocation3], 1 }
0x10fd   :  { %4589 = vsyncpa [#allocation3 + $0x1], 1 }
0x10fe   :  { %4590 = vsyncpa [#allocation5], 1 }
0x10ff   :  { %4591 = vsyncpa [#allocation8], 1 }
0x1100   :  { %4592 = vsyncpa [#allocation11], 1 }
0x1101   :  { %4593 = vsyncpa [#allocation14], 1 }

</bundles_post_ra>
